<compile_context>
chip_gen: v7x
topology: tpu7x:2x2x1
jax: 0.10.0
libtpu: 0.0.40
codegen_flags: <defaults>
</compile_context>

<pallas_src>
import functools

import jax
import jax.numpy as jnp
from jax import lax
from jax.experimental import pallas as pl
from jax.experimental.pallas import tpu as pltpu


# ----------------------------------------------------------------------------
# Pallas kernel: full-K, full-N GEMM with fused bias (+ optional ReLU)
# ----------------------------------------------------------------------------
def _gemm_bias_act_kernel(x_ref, w_ref, b_ref, o_ref, *, apply_relu):
    acc = jnp.dot(x_ref[...], w_ref[...], preferred_element_type=jnp.float32)
    y = acc + b_ref[...]
    if apply_relu:
        y = jnp.maximum(y, 0.0)
    o_ref[...] = y.astype(o_ref.dtype)


_VMEM_BUDGET = 24 * 1024 * 1024  # headroom under 32 MiB scoped default (all gens)


def _step_bytes(tm, K, N):
    # double-buffered bf16 x / bf16 w / fp32 bias blocks + double-buffered out
    return 2 * (tm * K * 2 + K * N * 2 + N * 4) + 2 * tm * N * 4


def _choose_tm(M, K, N):
    if _step_bytes(M, K, N) <= _VMEM_BUDGET:
        return M                      # one fat grid step, no M padding at all
    for tm in (1024, 512, 256, 128):  # all multiples of 8 (bf16 sublane ok)
        if _step_bytes(tm, K, N) <= _VMEM_BUDGET:
            return tm
    return 128


def matmul_bias_act(x_bf16, w_bf16, b_f32, *, apply_relu=True,
                    out_dtype=jnp.float32):
    """y = act(x @ w + b).  x:(M,K) bf16, w:(K,N) bf16, b:(1,N) fp32."""
    M, K = x_bf16.shape
    Kw, N = w_bf16.shape
    assert Kw == K and b_f32.shape == (1, N)

    tm = _choose_tm(M, K, N)
    grid_m = pl.cdiv(M, tm)
    kernel = functools.partial(_gemm_bias_act_kernel, apply_relu=apply_relu)

    return pl.pallas_call(
        kernel,
        out_shape=jax.ShapeDtypeStruct((M, N), out_dtype),
        grid_spec=pltpu.PrefetchScalarGridSpec(
            num_scalar_prefetch=0,
            grid=(grid_m,),
            in_specs=[
                pl.BlockSpec((tm, K), lambda i: (i, 0)),   # full-K activation
                pl.BlockSpec((K, N), lambda i: (0, 0)),    # whole weight
                pl.BlockSpec((1, N), lambda i: (0, 0)),    # bias row
            ],
            out_specs=pl.BlockSpec((tm, N), lambda i: (i, 0)),
        ),
        compiler_params=pltpu.CompilerParams(
            dimension_semantics=("parallel",)),
    )(x_bf16, w_bf16, b_f32)


# ----------------------------------------------------------------------------
# Conv = NHWC im2col (XLA glue) + Pallas GEMM with folded BN + ReLU
# ----------------------------------------------------------------------------
def _im2col_nhwc(x, kh, kw, sh, sw, ph, pw):
    n, h, w, c = x.shape
    oh = (h + 2 * ph - kh) // sh + 1
    ow = (w + 2 * pw - kw) // sw + 1
    if (kh, kw, sh, sw, ph, pw) == (1, 1, 1, 1, 0, 0):
        return x.reshape(n * h * w, c), oh, ow        # free reshape in NHWC
    xp = x
    if ph or pw:
        xp = jnp.pad(x, ((0, 0), (ph, ph), (pw, pw), (0, 0)))
    cols = []
    for i in range(kh):
        for j in range(kw):
            sl = lax.slice(xp, (0, i, j, 0),
                           (n, i + (oh - 1) * sh + 1, j + (ow - 1) * sw + 1, c),
                           (1, sh, sw, 1))
            cols.append(sl)                            # (n, oh, ow, c)
    # Column order matches weight reshape (cout, cin*kh*kw): cin-major,
    # (i*kw + j)-minor.
    patches = jnp.stack(cols, axis=-1)                 # (n, oh, ow, c, kh*kw)
    return patches.reshape(n * oh * ow, c * kh * kw), oh, ow


def basic_conv2d(x_nhwc, wts, cfg, *, out_dtype=jnp.float32):
    """Conv2d(bias=False) + BatchNorm2d(eval) + ReLU, NHWC in / NHWC out."""
    kh, kw = cfg["ksize"]
    sh, sw = cfg["stride"]
    ph, pw = cfg["pad"]
    n = x_nhwc.shape[0]
    patches, oh, ow = _im2col_nhwc(x_nhwc.astype(jnp.bfloat16),
                                   kh, kw, sh, sw, ph, pw)
    y = matmul_bias_act(patches, wts["w"], wts["b"],
                        apply_relu=True, out_dtype=out_dtype)
    return y.reshape(n, oh, ow, cfg["cout"])


def max_pool3x3_s2_nhwc(x):
    return lax.reduce_window(x, -jnp.inf, lax.max,
                             (1, 3, 3, 1), (1, 2, 2, 1), padding="VALID")


# ----------------------------------------------------------------------------
# Parameter construction (deterministic), weight pre-baking:
#   fold BN scale, reshape/transpose to (K, Cout), cast bf16.  No padding.
# ----------------------------------------------------------------------------
def make_basic_conv2d(key, cin, cout, ksize, stride=(1, 1), pad=(0, 0),
                      std=0.1, eps=1e-3):
    kh, kw = (ksize, ksize) if isinstance(ksize, int) else ksize
    w = std * jax.random.truncated_normal(key, -2.0, 2.0,
                                          (cout, cin, kh, kw), jnp.float32)
    # Fresh BatchNorm2d in eval mode: gamma=1, beta=0, running mean=0, var=1.
    gamma = jnp.ones((cout,), jnp.float32)
    beta = jnp.zeros((cout,), jnp.float32)
    mean = jnp.zeros((cout,), jnp.float32)
    var = jnp.ones((cout,), jnp.float32)
    scale = gamma / jnp.sqrt(var + eps)
    bias = beta - mean * scale

    wmat = (w * scale[:, None, None, None]).reshape(cout, cin * kh * kw).T
    weights = dict(w=wmat.astype(jnp.bfloat16),
                   b=bias.reshape(1, cout).astype(jnp.float32),
                   w_raw=w)  # kept only for the reference check
    cfg = dict(cout=cout, ksize=(kh, kw), stride=stride, pad=pad)
    return weights, cfg


def inception_b_init(in_channels, seed=0):
    key = jax.random.PRNGKey(seed)
    k1, k2, k3, k4 = jax.random.split(key, 4)
    w1, c1 = make_basic_conv2d(k1, in_channels, 384, (3, 3), stride=(2, 2))
    w2, c2 = make_basic_conv2d(k2, in_channels, 64, (1, 1))
    w3, c3 = make_basic_conv2d(k3, 64, 96, (3, 3), pad=(1, 1))
    w4, c4 = make_basic_conv2d(k4, 96, 96, (3, 3), stride=(2, 2))
    weights = dict(b3x3=w1, dbl1=w2, dbl2=w3, dbl3=w4)
    cfgs = dict(b3x3=c1, dbl1=c2, dbl2=c3, dbl3=c4)
    return weights, cfgs


# ----------------------------------------------------------------------------
# InceptionB forward (NCHW in -> NCHW out, NHWC internally).
# Static configs live in the closure (never traced); only arrays are jit args.
# ----------------------------------------------------------------------------
def make_inception_b_forward(cfgs):
    def forward(x_nchw, weights):
        x = jnp.transpose(x_nchw, (0, 2, 3, 1))                 # NCHW -> NHWC

        branch3x3 = basic_conv2d(x, weights["b3x3"], cfgs["b3x3"],
                                 out_dtype=jnp.float32)           # (N,8,8,384)

        dbl = basic_conv2d(x, weights["dbl1"], cfgs["dbl1"],
                           out_dtype=jnp.bfloat16)                # 1x1
        dbl = basic_conv2d(dbl, weights["dbl2"], cfgs["dbl2"],
                           out_dtype=jnp.bfloat16)                # 3x3 pad 1
        dbl = basic_conv2d(dbl, weights["dbl3"], cfgs["dbl3"],
                           out_dtype=jnp.float32)                 # 3x3 s2

        branch_pool = max_pool3x3_s2_nhwc(x)                      # (N,8,8,Cin)

        out = jnp.concatenate([branch3x3, dbl, branch_pool], axis=-1)
        return jnp.transpose(out, (0, 3, 1, 2))                   # NHWC -> NCHW
    return forward


# ----------------------------------------------------------------------------
# Pure-JAX reference (same bf16 input/weight rounding) for a sanity check
# ----------------------------------------------------------------------------
def _ref_conv(x_nhwc, w_raw, cfg, eps=1e-3, out_dtype=jnp.float32):
    scale = 1.0 / jnp.sqrt(1.0 + eps)        # fresh eval BN: gamma=1, var=1
    ph, pw = cfg["pad"]
    y = lax.conv_general_dilated(
        x_nhwc.astype(jnp.bfloat16),
        w_raw.astype(jnp.bfloat16).transpose(2, 3, 1, 0),   # OIHW -> HWIO
        window_strides=cfg["stride"], padding=[(ph, ph), (pw, pw)],
        dimension_numbers=("NHWC", "HWIO", "NHWC"),
        preferred_element_type=jnp.float32)
    return jnp.maximum(y * scale, 0.0).astype(out_dtype)


def reference_forward(x_nchw, weights, cfgs):
    x = jnp.transpose(x_nchw, (0, 2, 3, 1))
    b3 = _ref_conv(x, weights["b3x3"]["w_raw"], cfgs["b3x3"])
    d = _ref_conv(x, weights["dbl1"]["w_raw"], cfgs["dbl1"], out_dtype=jnp.bfloat16)
    d = _ref_conv(d, weights["dbl2"]["w_raw"], cfgs["dbl2"], out_dtype=jnp.bfloat16)
    d = _ref_conv(d, weights["dbl3"]["w_raw"], cfgs["dbl3"])
    pool = max_pool3x3_s2_nhwc(x)
    out = jnp.concatenate([b3, d, pool], axis=-1)
    return jnp.transpose(out, (0, 3, 1, 2))


# ----------------------------------------------------------------------------
if __name__ == "__main__":
    batch, in_channels, spatial = 2, 64, 17
    x = jax.random.normal(jax.random.PRNGKey(0),
                          (batch, in_channels, spatial, spatial), jnp.float32)
    weights, cfgs = inception_b_init(in_channels, seed=0)

    fwd = jax.jit(make_inception_b_forward(cfgs))
    out = jax.block_until_ready(fwd(x, weights))

    oh = (spatial - 3) // 2 + 1
    expected = (batch, 384 + 96 + in_channels, oh, oh)
    assert out.shape == expected, (out.shape, expected)
    assert bool(jnp.all(jnp.isfinite(out)))

    # Loose-tolerance check vs an XLA conv reference (bf16 inputs/weights,
    # fp32 accumulate; differences come only from where BN scale is folded).
    ref = jax.block_until_ready(reference_forward(x, weights, cfgs))
    max_err = float(jnp.max(jnp.abs(out - ref)))
    assert max_err < 5e-2, f"max abs error vs reference: {max_err}"

    print("KERNEL_OK")
</pallas_src>

<mosaic_0001>
module attributes {stable_mosaic.version = 11 : i64} {
  func.func @_gemm_bias_act_kernel(%arg0: i32, %arg1: memref<578x64xbf16, #tpu.memory_space<vmem>>, %arg2: memref<64x64xbf16, #tpu.memory_space<vmem>>, %arg3: memref<1x64xf32, #tpu.memory_space<vmem>>, %arg4: memref<578x64xbf16, #tpu.memory_space<vmem>>) attributes {dimension_semantics = [#tpu.dimension_semantics<parallel>], iteration_bounds = array<i64: 1>, scalar_prefetch = 0 : i64, scratch_operands = 0 : i64, tpu.core_type = #tpu.core_type<tc>, window_params = [{transform_indices = @transform_0, window_bounds = array<i64: 578, 64>}, {pipeline_mode = #tpu.pipeline_mode<synchronous>, transform_indices = @transform_1, window_bounds = array<i64: 64, 64>}, {pipeline_mode = #tpu.pipeline_mode<synchronous>, transform_indices = @transform_2, window_bounds = array<i64: 1, 64>}, {transform_indices = @transform_3, window_bounds = array<i64: 578, 64>}]} {
    %c0 = arith.constant 0 : index
    %c0_0 = arith.constant 0 : index
    %0 = vector.load %arg1[%c0, %c0_0] : memref<578x64xbf16, #tpu.memory_space<vmem>>, vector<578x64xbf16>
    %c0_1 = arith.constant 0 : index
    %c0_2 = arith.constant 0 : index
    %1 = vector.load %arg2[%c0_1, %c0_2] : memref<64x64xbf16, #tpu.memory_space<vmem>>, vector<64x64xbf16>
    %cst = arith.constant dense<0.000000e+00> : vector<578x64xf32>
    %2 = tpu.matmul %0, %1, %cst {dimension_numbers = #tpu.dot_dimension_numbers<[1], [0], [0], [1], [0, 0, 1, 1], [], []>} : vector<578x64xbf16>, vector<64x64xbf16>, vector<578x64xf32> -> vector<578x64xf32>
    %c0_3 = arith.constant 0 : index
    %c0_4 = arith.constant 0 : index
    %3 = vector.load %arg3[%c0_3, %c0_4] : memref<1x64xf32, #tpu.memory_space<vmem>>, vector<1x64xf32>
    %4 = vector.broadcast %3 : vector<1x64xf32> to vector<578x64xf32>
    %5 = arith.addf %2, %4 : vector<578x64xf32>
    %cst_5 = arith.constant 0.000000e+00 : f32
    %6 = vector.broadcast %cst_5 : f32 to vector<578x64xf32>
    %7 = arith.maximumf %5, %6 : vector<578x64xf32>
    %8 = arith.truncf %7 : vector<578x64xf32> to vector<578x64xbf16>
    %c0_6 = arith.constant 0 : index
    %c0_7 = arith.constant 0 : index
    %9 = vector.load %arg4[%c0_6, %c0_7] : memref<578x64xbf16, #tpu.memory_space<vmem>>, vector<578x64xbf16>
    tpu.vector_store %arg4[%c0_6, %c0_7], %8 {strides = array<i32>} : memref<578x64xbf16, #tpu.memory_space<vmem>>, vector<578x64xbf16>,
    return
  }
  func.func @transform_0(%arg0: i32) -> (i32, i32) {
    %c0_i32 = arith.constant 0 : i32
    %c0_i32_0 = arith.constant 0 : i32
    return %arg0, %c0_i32 : i32, i32
  }
  func.func @transform_1(%arg0: i32) -> (i32, i32) {
    %c0_i32 = arith.constant 0 : i32
    %c0_i32_0 = arith.constant 0 : i32
    %c0_i32_1 = arith.constant 0 : i32
    return %c0_i32, %c0_i32_0 : i32, i32
  }
  func.func @transform_2(%arg0: i32) -> (i32, i32) {
    %c0_i32 = arith.constant 0 : i32
    %c0_i32_0 = arith.constant 0 : i32
    %c0_i32_1 = arith.constant 0 : i32
    return %c0_i32, %c0_i32_0 : i32, i32
  }
  func.func @transform_3(%arg0: i32) -> (i32, i32) {
    %c0_i32 = arith.constant 0 : i32
    %c0_i32_0 = arith.constant 0 : i32
    return %arg0, %c0_i32 : i32, i32
  }
}

module attributes {stable_mosaic.version = 11 : i64} {
  func.func @_gemm_bias_act_kernel(%arg0: i32, %arg1: memref<578x576xbf16, #tpu.memory_space<vmem>>, %arg2: memref<576x96xbf16, #tpu.memory_space<vmem>>, %arg3: memref<1x96xf32, #tpu.memory_space<vmem>>, %arg4: memref<578x96xbf16, #tpu.memory_space<vmem>>) attributes {dimension_semantics = [#tpu.dimension_semantics<parallel>], iteration_bounds = array<i64: 1>, scalar_prefetch = 0 : i64, scratch_operands = 0 : i64, tpu.core_type = #tpu.core_type<tc>, window_params = [{transform_indices = @transform_0, window_bounds = array<i64: 578, 576>}, {pipeline_mode = #tpu.pipeline_mode<synchronous>, transform_indices = @transform_1, window_bounds = array<i64: 576, 96>}, {pipeline_mode = #tpu.pipeline_mode<synchronous>, transform_indices = @transform_2, window_bounds = array<i64: 1, 96>}, {transform_indices = @transform_3, window_bounds = array<i64: 578, 96>}]} {
    %c0 = arith.constant 0 : index
    %c0_0 = arith.constant 0 : index
    %0 = vector.load %arg1[%c0, %c0_0] : memref<578x576xbf16, #tpu.memory_space<vmem>>, vector<578x576xbf16>
    %c0_1 = arith.constant 0 : index
    %c0_2 = arith.constant 0 : index
    %1 = vector.load %arg2[%c0_1, %c0_2] : memref<576x96xbf16, #tpu.memory_space<vmem>>, vector<576x96xbf16>
    %cst = arith.constant dense<0.000000e+00> : vector<578x96xf32>
    %2 = tpu.matmul %0, %1, %cst {dimension_numbers = #tpu.dot_dimension_numbers<[1], [0], [0], [1], [0, 0, 1, 1], [], []>} : vector<578x576xbf16>, vector<576x96xbf16>, vector<578x96xf32> -> vector<578x96xf32>
    %c0_3 = arith.constant 0 : index
    %c0_4 = arith.constant 0 : index
    %3 = vector.load %arg3[%c0_3, %c0_4] : memref<1x96xf32, #tpu.memory_space<vmem>>, vector<1x96xf32>
    %4 = vector.broadcast %3 : vector<1x96xf32> to vector<578x96xf32>
    %5 = arith.addf %2, %4 : vector<578x96xf32>
    %cst_5 = arith.constant 0.000000e+00 : f32
    %6 = vector.broadcast %cst_5 : f32 to vector<578x96xf32>
    %7 = arith.maximumf %5, %6 : vector<578x96xf32>
    %8 = arith.truncf %7 : vector<578x96xf32> to vector<578x96xbf16>
    %c0_6 = arith.constant 0 : index
    %c0_7 = arith.constant 0 : index
    %9 = vector.load %arg4[%c0_6, %c0_7] : memref<578x96xbf16, #tpu.memory_space<vmem>>, vector<578x96xbf16>
    tpu.vector_store %arg4[%c0_6, %c0_7], %8 {strides = array<i32>} : memref<578x96xbf16, #tpu.memory_space<vmem>>, vector<578x96xbf16>,
    return
  }
  func.func @transform_0(%arg0: i32) -> (i32, i32) {
    %c0_i32 = arith.constant 0 : i32
    %c0_i32_0 = arith.constant 0 : i32
    return %arg0, %c0_i32 : i32, i32
  }
  func.func @transform_1(%arg0: i32) -> (i32, i32) {
    %c0_i32 = arith.constant 0 : i32
    %c0_i32_0 = arith.constant 0 : i32
    %c0_i32_1 = arith.constant 0 : i32
    return %c0_i32, %c0_i32_0 : i32, i32
  }
  func.func @transform_2(%arg0: i32) -> (i32, i32) {
    %c0_i32 = arith.constant 0 : i32
    %c0_i32_0 = arith.constant 0 : i32
    %c0_i32_1 = arith.constant 0 : i32
    return %c0_i32, %c0_i32_0 : i32, i32
  }
  func.func @transform_3(%arg0: i32) -> (i32, i32) {
    %c0_i32 = arith.constant 0 : i32
    %c0_i32_0 = arith.constant 0 : i32
    return %arg0, %c0_i32 : i32, i32
  }
}

module attributes {stable_mosaic.version = 11 : i64} {
  func.func @_gemm_bias_act_kernel(%arg0: i32, %arg1: memref<128x864xbf16, #tpu.memory_space<vmem>>, %arg2: memref<864x96xbf16, #tpu.memory_space<vmem>>, %arg3: memref<1x96xf32, #tpu.memory_space<vmem>>, %arg4: memref<128x96xf32, #tpu.memory_space<vmem>>) attributes {dimension_semantics = [#tpu.dimension_semantics<parallel>], iteration_bounds = array<i64: 1>, scalar_prefetch = 0 : i64, scratch_operands = 0 : i64, tpu.core_type = #tpu.core_type<tc>, window_params = [{transform_indices = @transform_0, window_bounds = array<i64: 128, 864>}, {pipeline_mode = #tpu.pipeline_mode<synchronous>, transform_indices = @transform_1, window_bounds = array<i64: 864, 96>}, {pipeline_mode = #tpu.pipeline_mode<synchronous>, transform_indices = @transform_2, window_bounds = array<i64: 1, 96>}, {transform_indices = @transform_3, window_bounds = array<i64: 128, 96>}]} {
    %c0 = arith.constant 0 : index
    %c0_0 = arith.constant 0 : index
    %0 = vector.load %arg1[%c0, %c0_0] : memref<128x864xbf16, #tpu.memory_space<vmem>>, vector<128x864xbf16>
    %c0_1 = arith.constant 0 : index
    %c0_2 = arith.constant 0 : index
    %1 = vector.load %arg2[%c0_1, %c0_2] : memref<864x96xbf16, #tpu.memory_space<vmem>>, vector<864x96xbf16>
    %cst = arith.constant dense<0.000000e+00> : vector<128x96xf32>
    %2 = tpu.matmul %0, %1, %cst {dimension_numbers = #tpu.dot_dimension_numbers<[1], [0], [0], [1], [0, 0, 1, 1], [], []>} : vector<128x864xbf16>, vector<864x96xbf16>, vector<128x96xf32> -> vector<128x96xf32>
    %c0_3 = arith.constant 0 : index
    %c0_4 = arith.constant 0 : index
    %3 = vector.load %arg3[%c0_3, %c0_4] : memref<1x96xf32, #tpu.memory_space<vmem>>, vector<1x96xf32>
    %4 = vector.broadcast %3 : vector<1x96xf32> to vector<128x96xf32>
    %5 = arith.addf %2, %4 : vector<128x96xf32>
    %cst_5 = arith.constant 0.000000e+00 : f32
    %6 = vector.broadcast %cst_5 : f32 to vector<128x96xf32>
    %7 = arith.maximumf %5, %6 : vector<128x96xf32>
    %c0_6 = arith.constant 0 : index
    %c0_7 = arith.constant 0 : index
    %8 = vector.load %arg4[%c0_6, %c0_7] : memref<128x96xf32, #tpu.memory_space<vmem>>, vector<128x96xf32>
    tpu.vector_store %arg4[%c0_6, %c0_7], %7 {strides = array<i32>} : memref<128x96xf32, #tpu.memory_space<vmem>>, vector<128x96xf32>,
    return
  }
  func.func @transform_0(%arg0: i32) -> (i32, i32) {
    %c0_i32 = arith.constant 0 : i32
    %c0_i32_0 = arith.constant 0 : i32
    return %arg0, %c0_i32 : i32, i32
  }
  func.func @transform_1(%arg0: i32) -> (i32, i32) {
    %c0_i32 = arith.constant 0 : i32
    %c0_i32_0 = arith.constant 0 : i32
    %c0_i32_1 = arith.constant 0 : i32
    return %c0_i32, %c0_i32_0 : i32, i32
  }
  func.func @transform_2(%arg0: i32) -> (i32, i32) {
    %c0_i32 = arith.constant 0 : i32
    %c0_i32_0 = arith.constant 0 : i32
    %c0_i32_1 = arith.constant 0 : i32
    return %c0_i32, %c0_i32_0 : i32, i32
  }
  func.func @transform_3(%arg0: i32) -> (i32, i32) {
    %c0_i32 = arith.constant 0 : i32
    %c0_i32_0 = arith.constant 0 : i32
    return %arg0, %c0_i32 : i32, i32
  }
}

module attributes {stable_mosaic.version = 11 : i64} {
  func.func @_gemm_bias_act_kernel(%arg0: i32, %arg1: memref<128x576xbf16, #tpu.memory_space<vmem>>, %arg2: memref<576x384xbf16, #tpu.memory_space<vmem>>, %arg3: memref<1x384xf32, #tpu.memory_space<vmem>>, %arg4: memref<128x384xf32, #tpu.memory_space<vmem>>) attributes {dimension_semantics = [#tpu.dimension_semantics<parallel>], iteration_bounds = array<i64: 1>, scalar_prefetch = 0 : i64, scratch_operands = 0 : i64, tpu.core_type = #tpu.core_type<tc>, window_params = [{transform_indices = @transform_0, window_bounds = array<i64: 128, 576>}, {pipeline_mode = #tpu.pipeline_mode<synchronous>, transform_indices = @transform_1, window_bounds = array<i64: 576, 384>}, {pipeline_mode = #tpu.pipeline_mode<synchronous>, transform_indices = @transform_2, window_bounds = array<i64: 1, 384>}, {transform_indices = @transform_3, window_bounds = array<i64: 128, 384>}]} {
    %c0 = arith.constant 0 : index
    %c0_0 = arith.constant 0 : index
    %0 = vector.load %arg1[%c0, %c0_0] : memref<128x576xbf16, #tpu.memory_space<vmem>>, vector<128x576xbf16>
    %c0_1 = arith.constant 0 : index
    %c0_2 = arith.constant 0 : index
    %1 = vector.load %arg2[%c0_1, %c0_2] : memref<576x384xbf16, #tpu.memory_space<vmem>>, vector<576x384xbf16>
    %cst = arith.constant dense<0.000000e+00> : vector<128x384xf32>
    %2 = tpu.matmul %0, %1, %cst {dimension_numbers = #tpu.dot_dimension_numbers<[1], [0], [0], [1], [0, 0, 1, 1], [], []>} : vector<128x576xbf16>, vector<576x384xbf16>, vector<128x384xf32> -> vector<128x384xf32>
    %c0_3 = arith.constant 0 : index
    %c0_4 = arith.constant 0 : index
    %3 = vector.load %arg3[%c0_3, %c0_4] : memref<1x384xf32, #tpu.memory_space<vmem>>, vector<1x384xf32>
    %4 = vector.broadcast %3 : vector<1x384xf32> to vector<128x384xf32>
    %5 = arith.addf %2, %4 : vector<128x384xf32>
    %cst_5 = arith.constant 0.000000e+00 : f32
    %6 = vector.broadcast %cst_5 : f32 to vector<128x384xf32>
    %7 = arith.maximumf %5, %6 : vector<128x384xf32>
    %c0_6 = arith.constant 0 : index
    %c0_7 = arith.constant 0 : index
    %8 = vector.load %arg4[%c0_6, %c0_7] : memref<128x384xf32, #tpu.memory_space<vmem>>, vector<128x384xf32>
    tpu.vector_store %arg4[%c0_6, %c0_7], %7 {strides = array<i32>} : memref<128x384xf32, #tpu.memory_space<vmem>>, vector<128x384xf32>,
    return
  }
  func.func @transform_0(%arg0: i32) -> (i32, i32) {
    %c0_i32 = arith.constant 0 : i32
    %c0_i32_0 = arith.constant 0 : i32
    return %arg0, %c0_i32 : i32, i32
  }
  func.func @transform_1(%arg0: i32) -> (i32, i32) {
    %c0_i32 = arith.constant 0 : i32
    %c0_i32_0 = arith.constant 0 : i32
    %c0_i32_1 = arith.constant 0 : i32
    return %c0_i32, %c0_i32_0 : i32, i32
  }
  func.func @transform_2(%arg0: i32) -> (i32, i32) {
    %c0_i32 = arith.constant 0 : i32
    %c0_i32_0 = arith.constant 0 : i32
    %c0_i32_1 = arith.constant 0 : i32
    return %c0_i32, %c0_i32_0 : i32, i32
  }
  func.func @transform_3(%arg0: i32) -> (i32, i32) {
    %c0_i32 = arith.constant 0 : i32
    %c0_i32_0 = arith.constant 0 : i32
    return %arg0, %c0_i32 : i32, i32
  }
}

</mosaic_0001>

<bundles_post_ra>
// kernel: forward.5
= control target key start
LH: loop header
LB: loop body
LE: loop exit
PB: predicated region body
PF: predicated region fallthrough
CT: control target
= control target key end

     0   :  { %8 = vsyncpa [#allocation3], 0  ;;  %s2394_s0 = inlined_call_operand.vmem [shape: bf16[578,64], index: 0, kind: input, shape index: {}]   ;;  %s2395_s1 = inlined_call_operand.hbm [shape: bf16[64,64], index: 1, kind: input, shape index: {}]   ;;  %s2396_s2 = inlined_call_operand.hbm [shape: f32[1,64], index: 2, kind: input, shape index: {}]   ;;  %s2397_s3 = inlined_call_operand.vmem [shape: bf16[578,64], index: 3, kind: output, shape index: {}]  }
   0x1   :  { %9 = vsyncpa [#allocation5], 0  ;;  %s1748_s12 = smov [#allocation2]   ;;  %s1700_s16 = scalar_lea.hbm %s2395_s1, 512 }
   0x2   :  { %s17_s13 = sshll.u32 %s1748_s12, 4  ;;  %p1701_p0 = scmp.ne.s32.totalorder %s2395_s1, %s1700_s16  ;;  %s18_s13 = int_to_ptr.vmem [resolvable:$true] %s17_s13 }
   0x3   :  { %p1704_p1 = scmp.lt.u32.totalorder %s1700_s16, %s2395_s1 }
   0x5   :  { %p1706_p2 = pnand %p1704_p1, %p1701_p0 }
   0x7   :  { %1709 = shalt.err (!%p1706_p2)
}
   0x8   :  { %s1710_s21 = scalar_lea.vmem %s18_s13, 512  ;;  %p1715_p4 = scmp.lt.s32.totalorder %s18_s13, %s18_s13 }
   0x9   :  { %p1711_p3 = scmp.ne.s32.totalorder %s18_s13, %s1710_s21  ;;  %p1716_p5 = scmp.lt.s32.totalorder %s1710_s21, %s1710_s21 }
   0xb   :  { %p1717_p6 = por %p1716_p5, %p1715_p4 }
   0xd   :  { %p1718_p7 = pnand %p1717_p6, %p1711_p3 }
   0xf   :  { %1721 = shalt.err (!%p1718_p7)
}
  0x10   :  { %s1749_s22 = smov 64   ;;  %s1750_s23 = smov 4  }
  0x11   :  { %23 = dma.hbm_to_vmem [thread:$0]  %s2395_s1, 512, %s18_s13, [#allocation3], %s1749_s22, %s1749_s22, %s1750_s23  }
  0x12   :  { %s1751_s26 = smov [#allocation4]   ;;  %s1722_s30 = scalar_lea.hbm %s2396_s2, 16 }
  0x13   :  { %s30_s27 = sshll.u32 %s1751_s26, 4  ;;  %p1723_p8 = scmp.ne.s32.totalorder %s2396_s2, %s1722_s30  ;;  %s31_s27 = int_to_ptr.vmem [resolvable:$true] %s30_s27 }
  0x14   :  { %p1726_p9 = scmp.lt.u32.totalorder %s1722_s30, %s2396_s2 }
  0x16   :  { %p1728_p10 = pnand %p1726_p9, %p1723_p8 }
  0x18   :  { %1731 = shalt.err (!%p1728_p10)
}
  0x19   :  { %s1732_s8 = scalar_lea.vmem %s31_s27, 16  ;;  %s1736_s1 = scalar_lea.vmem %s31_s27, 32 }
  0x1a   :  { %p1733_p11 = scmp.ne.s32.totalorder %s31_s27, %s1732_s8  ;;  %p1737_p12 = scmp.lt.s32.totalorder %s31_s27, %s31_s27 }
  0x1b   :  { %p1738_p13 = scmp.lt.s32.totalorder %s1736_s1, %s1732_s8 }
  0x1d   :  { %p1739_p0 = por %p1738_p13, %p1737_p12 }
  0x1f   :  { %p1740_p1 = pnand %p1739_p0, %p1733_p11 }
  0x21   :  { %1743 = shalt.err (!%p1740_p1)
}
  0x22   :  { %33 = dma.hbm_to_vmem [thread:$0]  %s2396_s2, 16, %s31_s27, [#allocation5]  }
  0x23   :  { %1744 = dma.done.wait [#allocation3], 512  }
  0x24   :  { %1745 = vsyncadd [#allocation3], 4294966784 }
  0x25   :  { %1746 = dma.done.wait [#allocation5], 16  }
  0x26   :  { %1747 = vsyncadd [#allocation5], 4294967280  ;;  %v1752_v0 = vmov 0.0   ;;  %vm1753_vm0 = vmmov 0   ;;  %v1659_v1 = vld [vmem:[#allocation2] sm:$0xff]   ;;  %v1660_v2 = vld [vmem:[#allocation2 + $0x8] sm:$0xff]  }
  0x27   :  { %1489 = vmatprep.subr.bf16.mxu0 %v1752_v0  ;;  %1645 = vmatprep.subr.bf16.mxu1 %v1752_v0  ;;  %v1661_v3 = vld [vmem:[#allocation2 + $0x10] sm:$0xff]   ;;  %v1662_v4 = vld [vmem:[#allocation2 + $0x18] sm:$0xff]   ;;  %v1663_v5 = vld [vmem:[%s2394_s0] sm:$0xff]   ;;  %vm336_vm1 = vcmask 523264   ;;  %vm1142_vm2 = vcmask 519168   ;;  %vm1215_vm3 = vcmask 516096  }
  0x28   :  { %1497 = vmatprep.mubr.msk.bf16.mxu0 %vm1753_vm0, %v1752_v0  ;;  %1573 = vmatprep.mubr.msk.bf16.mxu1 %vm1753_vm0, %v1752_v0  ;;  %v1664_v6 = vld [vmem:[%s2394_s0 + $0x98] sm:$0xff]   ;;  %v1665_v7 = vld [vmem:[%s2394_s0 + $0x8] sm:$0xff]   ;;  %v1666_v8 = vld [vmem:[%s2394_s0 + $0xa0] sm:$0xff]  }
  0x29   :  { %1490 = vmatpush3.bf16.msra.mxu0 %v1659_v1  ;;  %1649 = vmatpush3.bf16.msra.mxu1 %v1659_v1  ;;  %v1667_v9 = vld [vmem:[%s2394_s0 + $0x10] sm:$0xff]   ;;  %v1668_v10 = vld [vmem:[%s2394_s0 + $0xa8] sm:$0xff]   ;;  %v1669_v11 = vld [vmem:[%s2394_s0 + $0x18] sm:$0xff]  }
  0x2a   :  { %1491 = vmatprep.subr.bf16.mxu0 %v1752_v0  ;;  %1646 = vmatprep.subr.bf16.mxu1 %v1752_v0  ;;  %v1670_v12 = vld [vmem:[%s2394_s0 + $0xb0] sm:$0xff]   ;;  %v1671_v13 = vld [vmem:[%s2394_s0 + $0x20] sm:$0xff]   ;;  %v1672_v14 = vld [vmem:[%s2394_s0 + $0xb8] sm:$0xff]  }
  0x2b   :  { %v1673_v15 = vld [vmem:[%s2394_s0 + $0x28] sm:$0xff]   ;;  %v1674_v16 = vld [vmem:[%s2394_s0 + $0xc0] sm:$0xff]   ;;  %v1675_v17 = vld [vmem:[%s2394_s0 + $0x30] sm:$0xff]  }
  0x2c   :  { %v1676_v18 = vld [vmem:[%s2394_s0 + $0xc8] sm:$0xff]   ;;  %v1677_v19 = vld [vmem:[%s2394_s0 + $0x38] sm:$0xff]   ;;  %v1678_v20 = vld [vmem:[%s2394_s0 + $0xd0] sm:$0xff]  }
  0x2d   :  { %1492 = vmatpush3.bf16.msra.mxu0 %v1660_v2  ;;  %1650 = vmatpush3.bf16.msra.mxu1 %v1660_v2  ;;  %v1679_v21 = vld [vmem:[%s2394_s0 + $0x40] sm:$0xff]   ;;  %v1680_v22 = vld [vmem:[%s2394_s0 + $0xd8] sm:$0xff]   ;;  %v1681_v23 = vld [vmem:[%s2394_s0 + $0x48] sm:$0xff]  }
  0x2e   :  { %1493 = vmatprep.subr.bf16.mxu0 %v1752_v0  ;;  %1647 = vmatprep.subr.bf16.mxu1 %v1752_v0  ;;  %v1682_v24 = vld [vmem:[%s2394_s0 + $0xe0] sm:$0xff]   ;;  %v1683_v25 = vld [vmem:[%s2394_s0 + $0x50] sm:$0xff]   ;;  %v1684_v26 = vld [vmem:[%s2394_s0 + $0xe8] sm:$0xff]  }
  0x2f   :  { %v1685_v27 = vld [vmem:[%s2394_s0 + $0x58] sm:$0xff]   ;;  %v1686_v28 = vld [vmem:[%s2394_s0 + $0xf0] sm:$0xff]   ;;  %v1687_v29 = vld [vmem:[%s2394_s0 + $0x60] sm:$0xff]  }
  0x30   :  { %v1688_v30 = vld [vmem:[%s2394_s0 + $0xf8] sm:$0xff]   ;;  %v1689_v31 = vld [vmem:[%s2394_s0 + $0x68] sm:$0xff]   ;;  %v1690_v32 = vld [vmem:[%s2394_s0 + $0x100] sm:$0xff]  }
  0x31   :  { %1494 = vmatpush3.bf16.msra.mxu0 %v1661_v3  ;;  %1651 = vmatpush3.bf16.msra.mxu1 %v1661_v3  ;;  %v1691_v33 = vld [vmem:[%s2394_s0 + $0x70] sm:$0xff]   ;;  %v1692_v34 = vld [vmem:[%s2394_s0 + $0x108] sm:$0xff]   ;;  %v1693_v35 = vld [vmem:[%s2394_s0 + $0x78] sm:$0xff]  }
  0x32   :  { %1495 = vmatprep.subr.bf16.mxu0 %v1752_v0  ;;  %1648 = vmatprep.subr.bf16.mxu1 %v1752_v0  ;;  %v1694_v36 = vld [vmem:[%s2394_s0 + $0x110] sm:$0xff]   ;;  %v1695_v37 = vld [vmem:[%s2394_s0 + $0x80] sm:$0xff]   ;;  %v1696_v38 = vld [vmem:[%s2394_s0 + $0x118] sm:$0xff]  }
  0x33   :  { %v1697_v39 = vld [vmem:[%s2394_s0 + $0x88] sm:$0xff]   ;;  %v1698_v40 = vld [vmem:[%s2394_s0 + $0x120] ss:$0 sps:$4 sm:$0x11]   ;;  %v1699_v41 = vld [vmem:[%s2394_s0 + $0x90] sm:$0xff]  }
  0x34   :  { %v2028_v42 = vld [vmem:[#allocation4] ss:$0 sm:$0xff] }
  0x35   :  { %1496 = vmatpush3.bf16.msra.mxu0 %v1662_v4  ;;  %1652 = vmatpush3.bf16.msra.mxu1 %v1662_v4 }
  0x38   :  { %1498 = vmatmul.mubr.msk.bf16.vlgmr.msra.gmra.mrb[0].mxu0 %vm336_vm1, %v1663_v5  ;;  %1574 = vmatmul.mubr.msk.bf16.vlgmr.msra.gmra.mrb[0].mxu1 %vm336_vm1, %v1664_v6 }
  0x39   :  { %1501 = vmatprep.mubr.msk.bf16.mxu0 %vm1753_vm0, %v1752_v0  ;;  %1577 = vmatprep.mubr.msk.bf16.mxu1 %vm1753_vm0, %v1752_v0 }
  0x40   :  { %1502 = vmatmul.mubr.msk.bf16.gmra.mrb[4].mxu0 %vm336_vm1, %v1665_v7  ;;  %1578 = vmatmul.mubr.msk.bf16.gmra.mrb[4].mxu1 %vm336_vm1, %v1666_v8 }
  0x41   :  { %1505 = vmatprep.mubr.msk.bf16.mxu0 %vm1753_vm0, %v1752_v0  ;;  %1581 = vmatprep.mubr.msk.bf16.mxu1 %vm1753_vm0, %v1752_v0 }
  0x48   :  { %1506 = vmatmul.mubr.msk.bf16.gmra.mrb[8].mxu0 %vm336_vm1, %v1667_v9  ;;  %1582 = vmatmul.mubr.msk.bf16.gmra.mrb[8].mxu1 %vm336_vm1, %v1668_v10 }
  0x49   :  { %1509 = vmatprep.mubr.msk.bf16.mxu0 %vm1753_vm0, %v1752_v0  ;;  %1585 = vmatprep.mubr.msk.bf16.mxu1 %vm1753_vm0, %v1752_v0 }
  0x50   :  { %1510 = vmatmul.mubr.msk.bf16.gmra.mrb[12].mxu0 %vm336_vm1, %v1669_v11  ;;  %1586 = vmatmul.mubr.msk.bf16.gmra.mrb[12].mxu1 %vm336_vm1, %v1670_v12 }
  0x51   :  { %1513 = vmatprep.mubr.msk.bf16.mxu0 %vm1753_vm0, %v1752_v0  ;;  %1589 = vmatprep.mubr.msk.bf16.mxu1 %vm1753_vm0, %v1752_v0 }
  0x58   :  { %1514 = vmatmul.mubr.msk.bf16.gmra.mrb[16].mxu0 %vm336_vm1, %v1671_v13  ;;  %1590 = vmatmul.mubr.msk.bf16.gmra.mrb[16].mxu1 %vm336_vm1, %v1672_v14 }
  0x59   :  { %1517 = vmatprep.mubr.msk.bf16.mxu0 %vm1753_vm0, %v1752_v0  ;;  %1593 = vmatprep.mubr.msk.bf16.mxu1 %vm1753_vm0, %v1752_v0 }
  0x60   :  { %1518 = vmatmul.mubr.msk.bf16.gmra.mrb[20].mxu0 %vm336_vm1, %v1673_v15  ;;  %1594 = vmatmul.mubr.msk.bf16.gmra.mrb[20].mxu1 %vm336_vm1, %v1674_v16 }
  0x61   :  { %1521 = vmatprep.mubr.msk.bf16.mxu0 %vm1753_vm0, %v1752_v0  ;;  %1597 = vmatprep.mubr.msk.bf16.mxu1 %vm1753_vm0, %v1752_v0 }
  0x68   :  { %1522 = vmatmul.mubr.msk.bf16.gmra.mrb[24].mxu0 %vm336_vm1, %v1675_v17  ;;  %1598 = vmatmul.mubr.msk.bf16.gmra.mrb[24].mxu1 %vm336_vm1, %v1676_v18 }
  0x69   :  { %1525 = vmatprep.mubr.msk.bf16.mxu0 %vm1753_vm0, %v1752_v0  ;;  %1601 = vmatprep.mubr.msk.bf16.mxu1 %vm1753_vm0, %v1752_v0 }
  0x70   :  { %1526 = vmatmul.mubr.msk.bf16.gmra.mrb[28].mxu0 %vm336_vm1, %v1677_v19  ;;  %1602 = vmatmul.mubr.msk.bf16.gmra.mrb[28].mxu1 %vm336_vm1, %v1678_v20 }
  0x71   :  { %1529 = vmatprep.mubr.msk.bf16.mxu0 %vm1753_vm0, %v1752_v0  ;;  %1605 = vmatprep.mubr.msk.bf16.mxu1 %vm1753_vm0, %v1752_v0 }
  0x78   :  { %1530 = vmatmul.mubr.msk.bf16.gmra.mrb[32].mxu0 %vm336_vm1, %v1679_v21  ;;  %1606 = vmatmul.mubr.msk.bf16.gmra.mrb[32].mxu1 %vm336_vm1, %v1680_v22 }
  0x79   :  { %1533 = vmatprep.mubr.msk.bf16.mxu0 %vm1753_vm0, %v1752_v0  ;;  %1609 = vmatprep.mubr.msk.bf16.mxu1 %vm1753_vm0, %v1752_v0 }
  0x80   :  { %1534 = vmatmul.mubr.msk.bf16.gmra.mrb[36].mxu0 %vm336_vm1, %v1681_v23  ;;  %1610 = vmatmul.mubr.msk.bf16.gmra.mrb[36].mxu1 %vm336_vm1, %v1682_v24 }
  0x81   :  { %1537 = vmatprep.mubr.msk.bf16.mxu0 %vm1753_vm0, %v1752_v0  ;;  %1613 = vmatprep.mubr.msk.bf16.mxu1 %vm1753_vm0, %v1752_v0 }
  0x88   :  { %1538 = vmatmul.mubr.msk.bf16.gmra.mrb[40].mxu0 %vm336_vm1, %v1683_v25  ;;  %1614 = vmatmul.mubr.msk.bf16.gmra.mrb[40].mxu1 %vm336_vm1, %v1684_v26 }
  0x89   :  { %1541 = vmatprep.mubr.msk.bf16.mxu0 %vm1753_vm0, %v1752_v0  ;;  %1617 = vmatprep.mubr.msk.bf16.mxu1 %vm1753_vm0, %v1752_v0 }
  0x90   :  { %1542 = vmatmul.mubr.msk.bf16.gmra.mrb[44].mxu0 %vm336_vm1, %v1685_v27  ;;  %1618 = vmatmul.mubr.msk.bf16.gmra.mrb[44].mxu1 %vm336_vm1, %v1686_v28 }
  0x91   :  { %1545 = vmatprep.mubr.msk.bf16.mxu0 %vm1753_vm0, %v1752_v0  ;;  %1621 = vmatprep.mubr.msk.bf16.mxu1 %vm1753_vm0, %v1752_v0 }
  0x98   :  { %1546 = vmatmul.mubr.msk.bf16.gmra.mrb[48].mxu0 %vm336_vm1, %v1687_v29  ;;  %1622 = vmatmul.mubr.msk.bf16.gmra.mrb[48].mxu1 %vm336_vm1, %v1688_v30 }
  0x99   :  { %1549 = vmatprep.mubr.msk.bf16.mxu0 %vm1753_vm0, %v1752_v0  ;;  %1625 = vmatprep.mubr.msk.bf16.mxu1 %vm1753_vm0, %v1752_v0 }
  0xa0   :  { %1550 = vmatmul.mubr.msk.bf16.gmra.mrb[52].mxu0 %vm336_vm1, %v1689_v31  ;;  %1626 = vmatmul.mubr.msk.bf16.gmra.mrb[52].mxu1 %vm336_vm1, %v1690_v32 }
  0xa1   :  { %1553 = vmatprep.mubr.msk.bf16.mxu0 %vm1753_vm0, %v1752_v0  ;;  %1629 = vmatprep.mubr.msk.bf16.mxu1 %vm1753_vm0, %v1752_v0 }
  0xa8   :  { %1554 = vmatmul.mubr.msk.bf16.gmra.mrb[56].mxu0 %vm336_vm1, %v1691_v33  ;;  %1630 = vmatmul.mubr.msk.bf16.gmra.mrb[56].mxu1 %vm336_vm1, %v1692_v34 }
  0xa9   :  { %1557 = vmatprep.mubr.msk.bf16.mxu0 %vm1753_vm0, %v1752_v0  ;;  %1633 = vmatprep.mubr.msk.bf16.mxu1 %vm1753_vm0, %v1752_v0 }
  0xb0   :  { %1558 = vmatmul.mubr.msk.bf16.gmra.mrb[60].mxu0 %vm336_vm1, %v1693_v35  ;;  %1634 = vmatmul.mubr.msk.bf16.gmra.mrb[60].mxu1 %vm336_vm1, %v1694_v36 }
  0xb1   :  { %1561 = vmatprep.mubr.msk.bf16.mxu0 %vm1753_vm0, %v1752_v0  ;;  %1637 = vmatprep.mubr.msk.bf16.mxu1 %vm1753_vm0, %v1752_v0 }
  0xb8   :  { %1562 = vmatmul.mubr.msk.bf16.gmra.mrb[64].mxu0 %vm336_vm1, %v1695_v37  ;;  %1638 = vmatmul.mubr.msk.bf16.gmra.mrb[64].mxu1 %vm336_vm1, %v1696_v38 }
  0xb9   :  { %1565 = vmatprep.mubr.msk.bf16.mxu0 %vm1753_vm0, %v1752_v0  ;;  %1641 = vmatprep.mubr.msk.bf16.mxu1 %vm1753_vm0, %v1752_v0 }
  0xc0   :  { %1566 = vmatmul.mubr.msk.bf16.gmra.mrb[68].mxu0 %vm336_vm1, %v1697_v39  ;;  %1642 = vmatmul.mubr.msk.bf16.gmra.mrb[68].mxu1 %vm336_vm1, %v1698_v40 }
  0xc1   :  { %1569 = vmatprep.mubr.msk.bf16.mxu0 %vm1753_vm0, %v1752_v0 }
  0xc8   :  { %1570 = vmatmul.mubr.msk.bf16.gmra.mrb[72].mxu0 %vm336_vm1, %v1699_v41 }
 0x10b   :  { %v482_v43 = vpop.f32.mrb[0].mxu0  ;;  %v634_v44 = vpop.f32.mrb[0].mxu1 }
 0x10c   :  { %v483_v45 = vadd.f32 %v2028_v42, %v482_v43  ;;  %v1499_v46 = vpop.f32.mrb[1].mxu0  ;;  %v635_v47 = vadd.f32 %v2028_v42, %v634_v44  ;;  %v1575_v48 = vpop.f32.mrb[1].mxu1 }
 0x10d   :  { %v485_v49 = vpop.f32.mrb[2].mxu0  ;;  %v637_v50 = vpop.f32.mrb[2].mxu1 }
 0x10e   :  { %v776_v51 = vmax.f32 %v483_v45, 0.0  ;;  %v486_v52 = vadd.f32 %v2028_v42, %v485_v49  ;;  %v1500_v53 = vpop.f32.mrb[3].mxu0  ;;  %v814_v54 = vmax.f32 %v635_v47, 0.0  ;;  %v638_v55 = vadd.f32 %v2028_v42, %v637_v50  ;;  %v1576_v56 = vpop.f32.mrb[3].mxu1 }
 0x110   :  { %v1375_v57 = vpack.c.bf16 %v776_v51, %v776_v51  ;;  %v777_v58 = vmax.f32 %v486_v52, 0.0  ;;  %v1413_v59 = vpack.c.bf16 %v814_v54, %v814_v54  ;;  %v815_v60 = vmax.f32 %v638_v55, 0.0 }
 0x112   :  { %1143 = vst.msk [vmem:[%s2397_s3] sm:$0xf] %vm1142_vm2, %v1375_v57  ;;  %v1376_v61 = vpack.c.bf16 %v777_v58, %v777_v58  ;;  %1181 = vst.msk [vmem:[%s2397_s3 + $0x98] sm:$0xf] %vm1142_vm2, %v1413_v59  ;;  %v1414_v62 = vpack.c.bf16 %v815_v60, %v815_v60 }
 0x113   :  { %v490_v63 = vpop.f32.mrb[4].mxu0  ;;  %v642_v0 = vpop.f32.mrb[4].mxu1 }
 0x114   :  { %1144 = vst.msk [vmem:[%s2397_s3 + $0x4] sm:$0xf] %vm1142_vm2, %v1376_v61  ;;  %v491_v1 = vadd.f32 %v2028_v42, %v490_v63  ;;  %v1503_v2 = vpop.f32.mrb[5].mxu0  ;;  %1182 = vst.msk [vmem:[%s2397_s3 + $0x9c] sm:$0xf] %vm1142_vm2, %v1414_v62  ;;  %v643_v3 = vadd.f32 %v2028_v42, %v642_v0  ;;  %v1579_v4 = vpop.f32.mrb[5].mxu1 }
 0x115   :  { %v493_v5 = vpop.f32.mrb[6].mxu0  ;;  %v645_v6 = vpop.f32.mrb[6].mxu1 }
 0x116   :  { %v778_v7 = vmax.f32 %v491_v1, 0.0  ;;  %v494_v8 = vadd.f32 %v2028_v42, %v493_v5  ;;  %v1504_v9 = vpop.f32.mrb[7].mxu0  ;;  %v816_v10 = vmax.f32 %v643_v3, 0.0  ;;  %v646_v11 = vadd.f32 %v2028_v42, %v645_v6  ;;  %v1580_v12 = vpop.f32.mrb[7].mxu1 }
 0x118   :  { %v1377_v13 = vpack.c.bf16 %v778_v7, %v778_v7  ;;  %v779_v14 = vmax.f32 %v494_v8, 0.0  ;;  %v1415_v15 = vpack.c.bf16 %v816_v10, %v816_v10  ;;  %v817_v16 = vmax.f32 %v646_v11, 0.0 }
 0x11a   :  { %1145 = vst.msk [vmem:[%s2397_s3 + $0x8] sm:$0xf] %vm1142_vm2, %v1377_v13  ;;  %v1378_v17 = vpack.c.bf16 %v779_v14, %v779_v14  ;;  %1183 = vst.msk [vmem:[%s2397_s3 + $0xa0] sm:$0xf] %vm1142_vm2, %v1415_v15  ;;  %v1416_v18 = vpack.c.bf16 %v817_v16, %v817_v16 }
 0x11b   :  { %v498_v19 = vpop.f32.mrb[8].mxu0  ;;  %v650_v20 = vpop.f32.mrb[8].mxu1 }
 0x11c   :  { %1146 = vst.msk [vmem:[%s2397_s3 + $0xc] sm:$0xf] %vm1142_vm2, %v1378_v17  ;;  %v499_v21 = vadd.f32 %v2028_v42, %v498_v19  ;;  %v1507_v22 = vpop.f32.mrb[9].mxu0  ;;  %1184 = vst.msk [vmem:[%s2397_s3 + $0xa4] sm:$0xf] %vm1142_vm2, %v1416_v18  ;;  %v651_v23 = vadd.f32 %v2028_v42, %v650_v20  ;;  %v1583_v24 = vpop.f32.mrb[9].mxu1 }
 0x11d   :  { %v501_v25 = vpop.f32.mrb[10].mxu0  ;;  %v653_v26 = vpop.f32.mrb[10].mxu1 }
 0x11e   :  { %v780_v27 = vmax.f32 %v499_v21, 0.0  ;;  %v502_v28 = vadd.f32 %v2028_v42, %v501_v25  ;;  %v1508_v29 = vpop.f32.mrb[11].mxu0  ;;  %v818_v30 = vmax.f32 %v651_v23, 0.0  ;;  %v654_v31 = vadd.f32 %v2028_v42, %v653_v26  ;;  %v1584_v32 = vpop.f32.mrb[11].mxu1 }
 0x120   :  { %v1379_v33 = vpack.c.bf16 %v780_v27, %v780_v27  ;;  %v781_v34 = vmax.f32 %v502_v28, 0.0  ;;  %v1417_v35 = vpack.c.bf16 %v818_v30, %v818_v30  ;;  %v819_v36 = vmax.f32 %v654_v31, 0.0 }
 0x122   :  { %1147 = vst.msk [vmem:[%s2397_s3 + $0x10] sm:$0xf] %vm1142_vm2, %v1379_v33  ;;  %v1380_v37 = vpack.c.bf16 %v781_v34, %v781_v34  ;;  %1185 = vst.msk [vmem:[%s2397_s3 + $0xa8] sm:$0xf] %vm1142_vm2, %v1417_v35  ;;  %v1418_v38 = vpack.c.bf16 %v819_v36, %v819_v36 }
 0x123   :  { %v506_v39 = vpop.f32.mrb[12].mxu0  ;;  %v658_v40 = vpop.f32.mrb[12].mxu1 }
 0x124   :  { %1148 = vst.msk [vmem:[%s2397_s3 + $0x14] sm:$0xf] %vm1142_vm2, %v1380_v37  ;;  %v507_v41 = vadd.f32 %v2028_v42, %v506_v39  ;;  %v1511_v43 = vpop.f32.mrb[13].mxu0  ;;  %1186 = vst.msk [vmem:[%s2397_s3 + $0xac] sm:$0xf] %vm1142_vm2, %v1418_v38  ;;  %v659_v44 = vadd.f32 %v2028_v42, %v658_v40  ;;  %v1587_v45 = vpop.f32.mrb[13].mxu1 }
 0x125   :  { %v509_v46 = vpop.f32.mrb[14].mxu0  ;;  %v661_v47 = vpop.f32.mrb[14].mxu1 }
 0x126   :  { %v782_v48 = vmax.f32 %v507_v41, 0.0  ;;  %v510_v49 = vadd.f32 %v2028_v42, %v509_v46  ;;  %v1512_v50 = vpop.f32.mrb[15].mxu0  ;;  %v820_v51 = vmax.f32 %v659_v44, 0.0  ;;  %v662_v52 = vadd.f32 %v2028_v42, %v661_v47  ;;  %v1588_v53 = vpop.f32.mrb[15].mxu1 }
 0x128   :  { %v1381_v54 = vpack.c.bf16 %v782_v48, %v782_v48  ;;  %v783_v55 = vmax.f32 %v510_v49, 0.0  ;;  %v1419_v56 = vpack.c.bf16 %v820_v51, %v820_v51  ;;  %v821_v57 = vmax.f32 %v662_v52, 0.0 }
 0x12a   :  { %1149 = vst.msk [vmem:[%s2397_s3 + $0x18] sm:$0xf] %vm1142_vm2, %v1381_v54  ;;  %v1382_v58 = vpack.c.bf16 %v783_v55, %v783_v55  ;;  %1187 = vst.msk [vmem:[%s2397_s3 + $0xb0] sm:$0xf] %vm1142_vm2, %v1419_v56  ;;  %v1420_v59 = vpack.c.bf16 %v821_v57, %v821_v57 }
 0x12b   :  { %v514_v60 = vpop.f32.mrb[16].mxu0  ;;  %v666_v61 = vpop.f32.mrb[16].mxu1 }
 0x12c   :  { %1150 = vst.msk [vmem:[%s2397_s3 + $0x1c] sm:$0xf] %vm1142_vm2, %v1382_v58  ;;  %v515_v62 = vadd.f32 %v2028_v42, %v514_v60  ;;  %v1515_v63 = vpop.f32.mrb[17].mxu0  ;;  %1188 = vst.msk [vmem:[%s2397_s3 + $0xb4] sm:$0xf] %vm1142_vm2, %v1420_v59  ;;  %v667_v0 = vadd.f32 %v2028_v42, %v666_v61  ;;  %v1591_v1 = vpop.f32.mrb[17].mxu1 }
 0x12d   :  { %v517_v2 = vpop.f32.mrb[18].mxu0  ;;  %v669_v3 = vpop.f32.mrb[18].mxu1 }
 0x12e   :  { %v784_v4 = vmax.f32 %v515_v62, 0.0  ;;  %v518_v5 = vadd.f32 %v2028_v42, %v517_v2  ;;  %v1516_v6 = vpop.f32.mrb[19].mxu0  ;;  %v822_v7 = vmax.f32 %v667_v0, 0.0  ;;  %v670_v8 = vadd.f32 %v2028_v42, %v669_v3  ;;  %v1592_v9 = vpop.f32.mrb[19].mxu1 }
 0x130   :  { %v1383_v10 = vpack.c.bf16 %v784_v4, %v784_v4  ;;  %v785_v11 = vmax.f32 %v518_v5, 0.0  ;;  %v1421_v12 = vpack.c.bf16 %v822_v7, %v822_v7  ;;  %v823_v13 = vmax.f32 %v670_v8, 0.0 }
 0x132   :  { %1151 = vst.msk [vmem:[%s2397_s3 + $0x20] sm:$0xf] %vm1142_vm2, %v1383_v10  ;;  %v1384_v14 = vpack.c.bf16 %v785_v11, %v785_v11  ;;  %1189 = vst.msk [vmem:[%s2397_s3 + $0xb8] sm:$0xf] %vm1142_vm2, %v1421_v12  ;;  %v1422_v15 = vpack.c.bf16 %v823_v13, %v823_v13 }
 0x133   :  { %v522_v16 = vpop.f32.mrb[20].mxu0  ;;  %v674_v17 = vpop.f32.mrb[20].mxu1 }
 0x134   :  { %1152 = vst.msk [vmem:[%s2397_s3 + $0x24] sm:$0xf] %vm1142_vm2, %v1384_v14  ;;  %v523_v18 = vadd.f32 %v2028_v42, %v522_v16  ;;  %v1519_v19 = vpop.f32.mrb[21].mxu0  ;;  %1190 = vst.msk [vmem:[%s2397_s3 + $0xbc] sm:$0xf] %vm1142_vm2, %v1422_v15  ;;  %v675_v20 = vadd.f32 %v2028_v42, %v674_v17  ;;  %v1595_v21 = vpop.f32.mrb[21].mxu1 }
 0x135   :  { %v525_v22 = vpop.f32.mrb[22].mxu0  ;;  %v677_v23 = vpop.f32.mrb[22].mxu1 }
 0x136   :  { %v786_v24 = vmax.f32 %v523_v18, 0.0  ;;  %v526_v25 = vadd.f32 %v2028_v42, %v525_v22  ;;  %v1520_v26 = vpop.f32.mrb[23].mxu0  ;;  %v824_v27 = vmax.f32 %v675_v20, 0.0  ;;  %v678_v28 = vadd.f32 %v2028_v42, %v677_v23  ;;  %v1596_v29 = vpop.f32.mrb[23].mxu1 }
 0x138   :  { %v1385_v30 = vpack.c.bf16 %v786_v24, %v786_v24  ;;  %v787_v31 = vmax.f32 %v526_v25, 0.0  ;;  %v1423_v32 = vpack.c.bf16 %v824_v27, %v824_v27  ;;  %v825_v33 = vmax.f32 %v678_v28, 0.0 }
 0x13a   :  { %1153 = vst.msk [vmem:[%s2397_s3 + $0x28] sm:$0xf] %vm1142_vm2, %v1385_v30  ;;  %v1386_v34 = vpack.c.bf16 %v787_v31, %v787_v31  ;;  %1191 = vst.msk [vmem:[%s2397_s3 + $0xc0] sm:$0xf] %vm1142_vm2, %v1423_v32  ;;  %v1424_v35 = vpack.c.bf16 %v825_v33, %v825_v33 }
 0x13b   :  { %v530_v36 = vpop.f32.mrb[24].mxu0  ;;  %v682_v37 = vpop.f32.mrb[24].mxu1 }
 0x13c   :  { %1154 = vst.msk [vmem:[%s2397_s3 + $0x2c] sm:$0xf] %vm1142_vm2, %v1386_v34  ;;  %v531_v38 = vadd.f32 %v2028_v42, %v530_v36  ;;  %v1523_v39 = vpop.f32.mrb[25].mxu0  ;;  %1192 = vst.msk [vmem:[%s2397_s3 + $0xc4] sm:$0xf] %vm1142_vm2, %v1424_v35  ;;  %v683_v40 = vadd.f32 %v2028_v42, %v682_v37  ;;  %v1599_v41 = vpop.f32.mrb[25].mxu1 }
 0x13d   :  { %v533_v43 = vpop.f32.mrb[26].mxu0  ;;  %v685_v44 = vpop.f32.mrb[26].mxu1 }
 0x13e   :  { %v788_v45 = vmax.f32 %v531_v38, 0.0  ;;  %v534_v46 = vadd.f32 %v2028_v42, %v533_v43  ;;  %v1524_v47 = vpop.f32.mrb[27].mxu0  ;;  %v826_v48 = vmax.f32 %v683_v40, 0.0  ;;  %v686_v49 = vadd.f32 %v2028_v42, %v685_v44  ;;  %v1600_v50 = vpop.f32.mrb[27].mxu1 }
 0x140   :  { %v1387_v51 = vpack.c.bf16 %v788_v45, %v788_v45  ;;  %v789_v52 = vmax.f32 %v534_v46, 0.0  ;;  %v1425_v53 = vpack.c.bf16 %v826_v48, %v826_v48  ;;  %v827_v54 = vmax.f32 %v686_v49, 0.0 }
 0x142   :  { %1155 = vst.msk [vmem:[%s2397_s3 + $0x30] sm:$0xf] %vm1142_vm2, %v1387_v51  ;;  %v1388_v55 = vpack.c.bf16 %v789_v52, %v789_v52  ;;  %1193 = vst.msk [vmem:[%s2397_s3 + $0xc8] sm:$0xf] %vm1142_vm2, %v1425_v53  ;;  %v1426_v56 = vpack.c.bf16 %v827_v54, %v827_v54 }
 0x143   :  { %v538_v57 = vpop.f32.mrb[28].mxu0  ;;  %v690_v58 = vpop.f32.mrb[28].mxu1 }
 0x144   :  { %1156 = vst.msk [vmem:[%s2397_s3 + $0x34] sm:$0xf] %vm1142_vm2, %v1388_v55  ;;  %v539_v59 = vadd.f32 %v2028_v42, %v538_v57  ;;  %v1527_v60 = vpop.f32.mrb[29].mxu0  ;;  %1194 = vst.msk [vmem:[%s2397_s3 + $0xcc] sm:$0xf] %vm1142_vm2, %v1426_v56  ;;  %v691_v61 = vadd.f32 %v2028_v42, %v690_v58  ;;  %v1603_v62 = vpop.f32.mrb[29].mxu1 }
 0x145   :  { %v541_v63 = vpop.f32.mrb[30].mxu0  ;;  %v693_v0 = vpop.f32.mrb[30].mxu1 }
 0x146   :  { %v790_v1 = vmax.f32 %v539_v59, 0.0  ;;  %v542_v2 = vadd.f32 %v2028_v42, %v541_v63  ;;  %v1528_v3 = vpop.f32.mrb[31].mxu0  ;;  %v828_v4 = vmax.f32 %v691_v61, 0.0  ;;  %v694_v5 = vadd.f32 %v2028_v42, %v693_v0  ;;  %v1604_v6 = vpop.f32.mrb[31].mxu1 }
 0x148   :  { %v1389_v7 = vpack.c.bf16 %v790_v1, %v790_v1  ;;  %v791_v8 = vmax.f32 %v542_v2, 0.0  ;;  %v1427_v9 = vpack.c.bf16 %v828_v4, %v828_v4  ;;  %v829_v10 = vmax.f32 %v694_v5, 0.0 }
 0x14a   :  { %1157 = vst.msk [vmem:[%s2397_s3 + $0x38] sm:$0xf] %vm1142_vm2, %v1389_v7  ;;  %v1390_v11 = vpack.c.bf16 %v791_v8, %v791_v8  ;;  %1195 = vst.msk [vmem:[%s2397_s3 + $0xd0] sm:$0xf] %vm1142_vm2, %v1427_v9  ;;  %v1428_v12 = vpack.c.bf16 %v829_v10, %v829_v10 }
 0x14b   :  { %v546_v13 = vpop.f32.mrb[32].mxu0  ;;  %v698_v14 = vpop.f32.mrb[32].mxu1 }
 0x14c   :  { %1158 = vst.msk [vmem:[%s2397_s3 + $0x3c] sm:$0xf] %vm1142_vm2, %v1390_v11  ;;  %v547_v15 = vadd.f32 %v2028_v42, %v546_v13  ;;  %v1531_v16 = vpop.f32.mrb[33].mxu0  ;;  %1196 = vst.msk [vmem:[%s2397_s3 + $0xd4] sm:$0xf] %vm1142_vm2, %v1428_v12  ;;  %v699_v17 = vadd.f32 %v2028_v42, %v698_v14  ;;  %v1607_v18 = vpop.f32.mrb[33].mxu1 }
 0x14d   :  { %v549_v19 = vpop.f32.mrb[34].mxu0  ;;  %v701_v20 = vpop.f32.mrb[34].mxu1 }
 0x14e   :  { %v792_v21 = vmax.f32 %v547_v15, 0.0  ;;  %v550_v22 = vadd.f32 %v2028_v42, %v549_v19  ;;  %v1532_v23 = vpop.f32.mrb[35].mxu0  ;;  %v830_v24 = vmax.f32 %v699_v17, 0.0  ;;  %v702_v25 = vadd.f32 %v2028_v42, %v701_v20  ;;  %v1608_v26 = vpop.f32.mrb[35].mxu1 }
 0x150   :  { %v1391_v27 = vpack.c.bf16 %v792_v21, %v792_v21  ;;  %v793_v28 = vmax.f32 %v550_v22, 0.0  ;;  %v1429_v29 = vpack.c.bf16 %v830_v24, %v830_v24  ;;  %v831_v30 = vmax.f32 %v702_v25, 0.0 }
 0x152   :  { %1159 = vst.msk [vmem:[%s2397_s3 + $0x40] sm:$0xf] %vm1142_vm2, %v1391_v27  ;;  %v1392_v31 = vpack.c.bf16 %v793_v28, %v793_v28  ;;  %1197 = vst.msk [vmem:[%s2397_s3 + $0xd8] sm:$0xf] %vm1142_vm2, %v1429_v29  ;;  %v1430_v32 = vpack.c.bf16 %v831_v30, %v831_v30 }
 0x153   :  { %v554_v33 = vpop.f32.mrb[36].mxu0  ;;  %v706_v34 = vpop.f32.mrb[36].mxu1 }
 0x154   :  { %1160 = vst.msk [vmem:[%s2397_s3 + $0x44] sm:$0xf] %vm1142_vm2, %v1392_v31  ;;  %v555_v35 = vadd.f32 %v2028_v42, %v554_v33  ;;  %v1535_v36 = vpop.f32.mrb[37].mxu0  ;;  %1198 = vst.msk [vmem:[%s2397_s3 + $0xdc] sm:$0xf] %vm1142_vm2, %v1430_v32  ;;  %v707_v37 = vadd.f32 %v2028_v42, %v706_v34  ;;  %v1611_v38 = vpop.f32.mrb[37].mxu1 }
 0x155   :  { %v557_v39 = vpop.f32.mrb[38].mxu0  ;;  %v709_v40 = vpop.f32.mrb[38].mxu1 }
 0x156   :  { %v794_v41 = vmax.f32 %v555_v35, 0.0  ;;  %v558_v43 = vadd.f32 %v2028_v42, %v557_v39  ;;  %v1536_v44 = vpop.f32.mrb[39].mxu0  ;;  %v832_v45 = vmax.f32 %v707_v37, 0.0  ;;  %v710_v46 = vadd.f32 %v2028_v42, %v709_v40  ;;  %v1612_v47 = vpop.f32.mrb[39].mxu1 }
 0x158   :  { %v1393_v48 = vpack.c.bf16 %v794_v41, %v794_v41  ;;  %v795_v49 = vmax.f32 %v558_v43, 0.0  ;;  %v1431_v50 = vpack.c.bf16 %v832_v45, %v832_v45  ;;  %v833_v51 = vmax.f32 %v710_v46, 0.0 }
 0x15a   :  { %1161 = vst.msk [vmem:[%s2397_s3 + $0x48] sm:$0xf] %vm1142_vm2, %v1393_v48  ;;  %v1394_v52 = vpack.c.bf16 %v795_v49, %v795_v49  ;;  %1199 = vst.msk [vmem:[%s2397_s3 + $0xe0] sm:$0xf] %vm1142_vm2, %v1431_v50  ;;  %v1432_v53 = vpack.c.bf16 %v833_v51, %v833_v51 }
 0x15b   :  { %v562_v54 = vpop.f32.mrb[40].mxu0  ;;  %v714_v55 = vpop.f32.mrb[40].mxu1 }
 0x15c   :  { %1162 = vst.msk [vmem:[%s2397_s3 + $0x4c] sm:$0xf] %vm1142_vm2, %v1394_v52  ;;  %v563_v56 = vadd.f32 %v2028_v42, %v562_v54  ;;  %v1539_v57 = vpop.f32.mrb[41].mxu0  ;;  %1200 = vst.msk [vmem:[%s2397_s3 + $0xe4] sm:$0xf] %vm1142_vm2, %v1432_v53  ;;  %v715_v58 = vadd.f32 %v2028_v42, %v714_v55  ;;  %v1615_v59 = vpop.f32.mrb[41].mxu1 }
 0x15d   :  { %v565_v60 = vpop.f32.mrb[42].mxu0  ;;  %v717_v61 = vpop.f32.mrb[42].mxu1 }
 0x15e   :  { %v796_v62 = vmax.f32 %v563_v56, 0.0  ;;  %v566_v63 = vadd.f32 %v2028_v42, %v565_v60  ;;  %v1540_v0 = vpop.f32.mrb[43].mxu0  ;;  %v834_v1 = vmax.f32 %v715_v58, 0.0  ;;  %v718_v2 = vadd.f32 %v2028_v42, %v717_v61  ;;  %v1616_v3 = vpop.f32.mrb[43].mxu1 }
 0x160   :  { %v1395_v4 = vpack.c.bf16 %v796_v62, %v796_v62  ;;  %v797_v5 = vmax.f32 %v566_v63, 0.0  ;;  %v1433_v6 = vpack.c.bf16 %v834_v1, %v834_v1  ;;  %v835_v7 = vmax.f32 %v718_v2, 0.0 }
 0x162   :  { %1163 = vst.msk [vmem:[%s2397_s3 + $0x50] sm:$0xf] %vm1142_vm2, %v1395_v4  ;;  %v1396_v8 = vpack.c.bf16 %v797_v5, %v797_v5  ;;  %1201 = vst.msk [vmem:[%s2397_s3 + $0xe8] sm:$0xf] %vm1142_vm2, %v1433_v6  ;;  %v1434_v9 = vpack.c.bf16 %v835_v7, %v835_v7 }
 0x163   :  { %v570_v10 = vpop.f32.mrb[44].mxu0  ;;  %v722_v11 = vpop.f32.mrb[44].mxu1 }
 0x164   :  { %1164 = vst.msk [vmem:[%s2397_s3 + $0x54] sm:$0xf] %vm1142_vm2, %v1396_v8  ;;  %v571_v12 = vadd.f32 %v2028_v42, %v570_v10  ;;  %v1543_v13 = vpop.f32.mrb[45].mxu0  ;;  %1202 = vst.msk [vmem:[%s2397_s3 + $0xec] sm:$0xf] %vm1142_vm2, %v1434_v9  ;;  %v723_v14 = vadd.f32 %v2028_v42, %v722_v11  ;;  %v1619_v15 = vpop.f32.mrb[45].mxu1 }
 0x165   :  { %v573_v16 = vpop.f32.mrb[46].mxu0  ;;  %v725_v17 = vpop.f32.mrb[46].mxu1 }
 0x166   :  { %v798_v18 = vmax.f32 %v571_v12, 0.0  ;;  %v574_v19 = vadd.f32 %v2028_v42, %v573_v16  ;;  %v1544_v20 = vpop.f32.mrb[47].mxu0  ;;  %v836_v21 = vmax.f32 %v723_v14, 0.0  ;;  %v726_v22 = vadd.f32 %v2028_v42, %v725_v17  ;;  %v1620_v23 = vpop.f32.mrb[47].mxu1 }
 0x168   :  { %v1397_v24 = vpack.c.bf16 %v798_v18, %v798_v18  ;;  %v799_v25 = vmax.f32 %v574_v19, 0.0  ;;  %v1435_v26 = vpack.c.bf16 %v836_v21, %v836_v21  ;;  %v837_v27 = vmax.f32 %v726_v22, 0.0 }
 0x16a   :  { %1165 = vst.msk [vmem:[%s2397_s3 + $0x58] sm:$0xf] %vm1142_vm2, %v1397_v24  ;;  %v1398_v28 = vpack.c.bf16 %v799_v25, %v799_v25  ;;  %1203 = vst.msk [vmem:[%s2397_s3 + $0xf0] sm:$0xf] %vm1142_vm2, %v1435_v26  ;;  %v1436_v29 = vpack.c.bf16 %v837_v27, %v837_v27 }
 0x16b   :  { %v578_v30 = vpop.f32.mrb[48].mxu0  ;;  %v730_v31 = vpop.f32.mrb[48].mxu1 }
 0x16c   :  { %1166 = vst.msk [vmem:[%s2397_s3 + $0x5c] sm:$0xf] %vm1142_vm2, %v1398_v28  ;;  %v579_v32 = vadd.f32 %v2028_v42, %v578_v30  ;;  %v1547_v33 = vpop.f32.mrb[49].mxu0  ;;  %1204 = vst.msk [vmem:[%s2397_s3 + $0xf4] sm:$0xf] %vm1142_vm2, %v1436_v29  ;;  %v731_v34 = vadd.f32 %v2028_v42, %v730_v31  ;;  %v1623_v35 = vpop.f32.mrb[49].mxu1 }
 0x16d   :  { %v581_v36 = vpop.f32.mrb[50].mxu0  ;;  %v733_v37 = vpop.f32.mrb[50].mxu1 }
 0x16e   :  { %v800_v38 = vmax.f32 %v579_v32, 0.0  ;;  %v582_v39 = vadd.f32 %v2028_v42, %v581_v36  ;;  %v1548_v40 = vpop.f32.mrb[51].mxu0  ;;  %v838_v41 = vmax.f32 %v731_v34, 0.0  ;;  %v734_v43 = vadd.f32 %v2028_v42, %v733_v37  ;;  %v1624_v44 = vpop.f32.mrb[51].mxu1 }
 0x170   :  { %v1399_v45 = vpack.c.bf16 %v800_v38, %v800_v38  ;;  %v801_v46 = vmax.f32 %v582_v39, 0.0  ;;  %v1437_v47 = vpack.c.bf16 %v838_v41, %v838_v41  ;;  %v839_v48 = vmax.f32 %v734_v43, 0.0 }
 0x172   :  { %1167 = vst.msk [vmem:[%s2397_s3 + $0x60] sm:$0xf] %vm1142_vm2, %v1399_v45  ;;  %v1400_v49 = vpack.c.bf16 %v801_v46, %v801_v46  ;;  %1205 = vst.msk [vmem:[%s2397_s3 + $0xf8] sm:$0xf] %vm1142_vm2, %v1437_v47  ;;  %v1438_v50 = vpack.c.bf16 %v839_v48, %v839_v48 }
 0x173   :  { %v586_v51 = vpop.f32.mrb[52].mxu0  ;;  %v738_v52 = vpop.f32.mrb[52].mxu1 }
 0x174   :  { %1168 = vst.msk [vmem:[%s2397_s3 + $0x64] sm:$0xf] %vm1142_vm2, %v1400_v49  ;;  %v587_v53 = vadd.f32 %v2028_v42, %v586_v51  ;;  %v1551_v54 = vpop.f32.mrb[53].mxu0  ;;  %1206 = vst.msk [vmem:[%s2397_s3 + $0xfc] sm:$0xf] %vm1142_vm2, %v1438_v50  ;;  %v739_v55 = vadd.f32 %v2028_v42, %v738_v52  ;;  %v1627_v56 = vpop.f32.mrb[53].mxu1 }
 0x175   :  { %v589_v57 = vpop.f32.mrb[54].mxu0  ;;  %v741_v58 = vpop.f32.mrb[54].mxu1 }
 0x176   :  { %v802_v59 = vmax.f32 %v587_v53, 0.0  ;;  %v590_v60 = vadd.f32 %v2028_v42, %v589_v57  ;;  %v1552_v61 = vpop.f32.mrb[55].mxu0  ;;  %v840_v62 = vmax.f32 %v739_v55, 0.0  ;;  %v742_v63 = vadd.f32 %v2028_v42, %v741_v58  ;;  %v1628_v0 = vpop.f32.mrb[55].mxu1 }
 0x178   :  { %v1401_v1 = vpack.c.bf16 %v802_v59, %v802_v59  ;;  %v803_v2 = vmax.f32 %v590_v60, 0.0  ;;  %v1439_v3 = vpack.c.bf16 %v840_v62, %v840_v62  ;;  %v841_v4 = vmax.f32 %v742_v63, 0.0 }
 0x17a   :  { %1169 = vst.msk [vmem:[%s2397_s3 + $0x68] sm:$0xf] %vm1142_vm2, %v1401_v1  ;;  %v1402_v5 = vpack.c.bf16 %v803_v2, %v803_v2  ;;  %1207 = vst.msk [vmem:[%s2397_s3 + $0x100] sm:$0xf] %vm1142_vm2, %v1439_v3  ;;  %v1440_v6 = vpack.c.bf16 %v841_v4, %v841_v4 }
 0x17b   :  { %v594_v7 = vpop.f32.mrb[56].mxu0  ;;  %v746_v8 = vpop.f32.mrb[56].mxu1 }
 0x17c   :  { %1170 = vst.msk [vmem:[%s2397_s3 + $0x6c] sm:$0xf] %vm1142_vm2, %v1402_v5  ;;  %v595_v9 = vadd.f32 %v2028_v42, %v594_v7  ;;  %v1555_v10 = vpop.f32.mrb[57].mxu0  ;;  %1208 = vst.msk [vmem:[%s2397_s3 + $0x104] sm:$0xf] %vm1142_vm2, %v1440_v6  ;;  %v747_v11 = vadd.f32 %v2028_v42, %v746_v8  ;;  %v1631_v12 = vpop.f32.mrb[57].mxu1 }
 0x17d   :  { %v597_v13 = vpop.f32.mrb[58].mxu0  ;;  %v749_v14 = vpop.f32.mrb[58].mxu1 }
 0x17e   :  { %v804_v15 = vmax.f32 %v595_v9, 0.0  ;;  %v598_v16 = vadd.f32 %v2028_v42, %v597_v13  ;;  %v1556_v17 = vpop.f32.mrb[59].mxu0  ;;  %v842_v18 = vmax.f32 %v747_v11, 0.0  ;;  %v750_v19 = vadd.f32 %v2028_v42, %v749_v14  ;;  %v1632_v20 = vpop.f32.mrb[59].mxu1 }
 0x180   :  { %v1403_v21 = vpack.c.bf16 %v804_v15, %v804_v15  ;;  %v805_v22 = vmax.f32 %v598_v16, 0.0  ;;  %v1441_v23 = vpack.c.bf16 %v842_v18, %v842_v18  ;;  %v843_v24 = vmax.f32 %v750_v19, 0.0 }
 0x182   :  { %1171 = vst.msk [vmem:[%s2397_s3 + $0x70] sm:$0xf] %vm1142_vm2, %v1403_v21  ;;  %v1404_v25 = vpack.c.bf16 %v805_v22, %v805_v22  ;;  %1209 = vst.msk [vmem:[%s2397_s3 + $0x108] sm:$0xf] %vm1142_vm2, %v1441_v23  ;;  %v1442_v26 = vpack.c.bf16 %v843_v24, %v843_v24 }
 0x183   :  { %v602_v27 = vpop.f32.mrb[60].mxu0  ;;  %v754_v28 = vpop.f32.mrb[60].mxu1 }
 0x184   :  { %1172 = vst.msk [vmem:[%s2397_s3 + $0x74] sm:$0xf] %vm1142_vm2, %v1404_v25  ;;  %v603_v29 = vadd.f32 %v2028_v42, %v602_v27  ;;  %v1559_v30 = vpop.f32.mrb[61].mxu0  ;;  %1210 = vst.msk [vmem:[%s2397_s3 + $0x10c] sm:$0xf] %vm1142_vm2, %v1442_v26  ;;  %v755_v31 = vadd.f32 %v2028_v42, %v754_v28  ;;  %v1635_v32 = vpop.f32.mrb[61].mxu1 }
 0x185   :  { %v605_v33 = vpop.f32.mrb[62].mxu0  ;;  %v757_v34 = vpop.f32.mrb[62].mxu1 }
 0x186   :  { %v806_v35 = vmax.f32 %v603_v29, 0.0  ;;  %v606_v36 = vadd.f32 %v2028_v42, %v605_v33  ;;  %v1560_v37 = vpop.f32.mrb[63].mxu0  ;;  %v844_v38 = vmax.f32 %v755_v31, 0.0  ;;  %v758_v39 = vadd.f32 %v2028_v42, %v757_v34  ;;  %v1636_v40 = vpop.f32.mrb[63].mxu1 }
 0x188   :  { %v1405_v41 = vpack.c.bf16 %v806_v35, %v806_v35  ;;  %v807_v43 = vmax.f32 %v606_v36, 0.0  ;;  %v1443_v44 = vpack.c.bf16 %v844_v38, %v844_v38  ;;  %v845_v45 = vmax.f32 %v758_v39, 0.0 }
 0x18a   :  { %1173 = vst.msk [vmem:[%s2397_s3 + $0x78] sm:$0xf] %vm1142_vm2, %v1405_v41  ;;  %v1406_v46 = vpack.c.bf16 %v807_v43, %v807_v43  ;;  %1211 = vst.msk [vmem:[%s2397_s3 + $0x110] sm:$0xf] %vm1142_vm2, %v1443_v44  ;;  %v1444_v47 = vpack.c.bf16 %v845_v45, %v845_v45 }
 0x18b   :  { %v610_v48 = vpop.f32.mrb[64].mxu0  ;;  %v762_v49 = vpop.f32.mrb[64].mxu1 }
 0x18c   :  { %1174 = vst.msk [vmem:[%s2397_s3 + $0x7c] sm:$0xf] %vm1142_vm2, %v1406_v46  ;;  %v611_v50 = vadd.f32 %v2028_v42, %v610_v48  ;;  %v1563_v51 = vpop.f32.mrb[65].mxu0  ;;  %1212 = vst.msk [vmem:[%s2397_s3 + $0x114] sm:$0xf] %vm1142_vm2, %v1444_v47  ;;  %v763_v52 = vadd.f32 %v2028_v42, %v762_v49  ;;  %v1639_v53 = vpop.f32.mrb[65].mxu1 }
 0x18d   :  { %v613_v54 = vpop.f32.mrb[66].mxu0  ;;  %v765_v55 = vpop.f32.mrb[66].mxu1 }
 0x18e   :  { %v808_v56 = vmax.f32 %v611_v50, 0.0  ;;  %v614_v57 = vadd.f32 %v2028_v42, %v613_v54  ;;  %v1564_v58 = vpop.f32.mrb[67].mxu0  ;;  %v846_v59 = vmax.f32 %v763_v52, 0.0  ;;  %v766_v60 = vadd.f32 %v2028_v42, %v765_v55  ;;  %v1640_v61 = vpop.f32.mrb[67].mxu1 }
 0x190   :  { %v1407_v62 = vpack.c.bf16 %v808_v56, %v808_v56  ;;  %v809_v63 = vmax.f32 %v614_v57, 0.0  ;;  %v1445_v0 = vpack.c.bf16 %v846_v59, %v846_v59  ;;  %v847_v1 = vmax.f32 %v766_v60, 0.0 }
 0x192   :  { %1175 = vst.msk [vmem:[%s2397_s3 + $0x80] sm:$0xf] %vm1142_vm2, %v1407_v62  ;;  %v1408_v2 = vpack.c.bf16 %v809_v63, %v809_v63  ;;  %1213 = vst.msk [vmem:[%s2397_s3 + $0x118] sm:$0xf] %vm1142_vm2, %v1445_v0  ;;  %v1446_v3 = vpack.c.bf16 %v847_v1, %v847_v1 }
 0x193   :  { %v618_v4 = vpop.f32.mrb[68].mxu0  ;;  %v770_v5 = vpop.f32.mrb[68].mxu1 }
 0x194   :  { %1176 = vst.msk [vmem:[%s2397_s3 + $0x84] sm:$0xf] %vm1142_vm2, %v1408_v2  ;;  %v619_v6 = vadd.f32 %v2028_v42, %v618_v4  ;;  %v1567_v7 = vpop.f32.mrb[69].mxu0  ;;  %1214 = vst.msk [vmem:[%s2397_s3 + $0x11c] sm:$0xf] %vm1142_vm2, %v1446_v3  ;;  %v771_v8 = vadd.f32 %v2028_v42, %v770_v5  ;;  %v1643_v9 = vpop.f32.mrb[69].mxu1 }
 0x195   :  { %v621_v10 = vpop.f32.mrb[70].mxu0  ;;  %v773_v11 = vpop.f32.mrb[70].mxu1 }
 0x196   :  { %v810_v12 = vmax.f32 %v619_v6, 0.0  ;;  %v622_v13 = vadd.f32 %v2028_v42, %v621_v10  ;;  %v1568_v14 = vpop.f32.mrb[71].mxu0  ;;  %v848_v15 = vmax.f32 %v771_v8, 0.0  ;;  %v1644_v16 = vpop.f32.mrb[71].mxu1 }
 0x198   :  { %v1409_v17 = vpack.c.bf16 %v810_v12, %v810_v12  ;;  %v811_v18 = vmax.f32 %v622_v13, 0.0  ;;  %v1447_v19 = vpack.c.bf16 %v848_v15, %v848_v15 }
 0x19a   :  { %1177 = vst.msk [vmem:[%s2397_s3 + $0x88] sm:$0xf] %vm1142_vm2, %v1409_v17  ;;  %v1410_v20 = vpack.c.bf16 %v811_v18, %v811_v18 }
 0x19b   :  { %1216 = vst.msk [vmem:[%s2397_s3 + $0x120] sm:$0x1] %vm1215_vm3, %v1447_v19  ;;  %v626_v21 = vpop.f32.mrb[72].mxu0 }
 0x19c   :  { %1178 = vst.msk [vmem:[%s2397_s3 + $0x8c] sm:$0xf] %vm1142_vm2, %v1410_v20  ;;  %v627_v22 = vadd.f32 %v2028_v42, %v626_v21  ;;  %v1571_v23 = vpop.f32.mrb[73].mxu0 }
 0x19d   :  { %v629_v24 = vpop.f32.mrb[74].mxu0 }
 0x19e   :  { %v812_v25 = vmax.f32 %v627_v22, 0.0  ;;  %v630_v26 = vadd.f32 %v2028_v42, %v629_v24  ;;  %v1572_v27 = vpop.f32.mrb[75].mxu0 }
 0x1a0   :  { %v1411_v28 = vpack.c.bf16 %v812_v25, %v812_v25  ;;  %v813_v29 = vmax.f32 %v630_v26, 0.0 }
 0x1a2   :  { %1179 = vst.msk [vmem:[%s2397_s3 + $0x90] sm:$0xf] %vm1142_vm2, %v1411_v28  ;;  %v1412_v30 = vpack.c.bf16 %v813_v29, %v813_v29 }
 0x1a4   :  { %1180 = vst.msk [vmem:[%s2397_s3 + $0x94] sm:$0xf] %vm1142_vm2, %v1412_v30 }
 0x1a5   :  { %1221 = vsyncpa [#allocation3], 1 }
 0x1a6   :  { %1222 = vsyncpa [#allocation5], 1 }

// kernel: forward.6
= control target key start
LH: loop header
LB: loop body
LE: loop exit
PB: predicated region body
PF: predicated region fallthrough
CT: control target
= control target key end

     0   :  { %v4212_v0 = vmov 0   ;;  %v4213_v39 = vmov 0.0   ;;  %vm4214_vm0 = vmmov 0   ;;  %vm1446_vm1 = vcmask 523264   ;;  %s5607_s1 = inlined_call_operand.vmem [shape: bf16[576,96], index: 1, kind: input, shape index: {}]   ;;  %s5608_s0 = inlined_call_operand.vmem [shape: bf16[578,576], index: 0, kind: input, shape index: {}]   ;;  %s5609_s2 = inlined_call_operand.vmem [shape: f32[1,96], index: 2, kind: input, shape index: {}]   ;;  %s5610_s3 = inlined_call_operand.vmem [shape: bf16[578,96], index: 3, kind: output, shape index: {}]  }
   0x1   :  { %1558 = vmatprep.subr.bf16.mxu1 %v4212_v0  ;;  %1886 = vmatprep.subr.bf16.mxu0 %v4212_v0  ;;  %v3918_v1 = vld [vmem:[%s5607_s1] sm:$0xff]   ;;  %v3920_v3 = vld [vmem:[%s5607_s1 + $0x8] sm:$0xff]   ;;  %v3922_v5 = vld [vmem:[%s5607_s1 + $0x10] sm:$0xff]   ;;  %vm2908_vm2 = vcmask 781312   ;;  %vm2981_vm3 = vcmask 778240  }
   0x2   :  { %v4243_v2 = vld [vmem:[%s5607_s1 + $0x80] sm:$0xff]   ;;  %1559 = vmatpush1.bf16.msra.mxu1 %v3918_v1  ;;  %v4253_v4 = vld [vmem:[%s5607_s1 + $0x88] sm:$0xff]   ;;  %v4264_v6 = vld [vmem:[%s5607_s1 + $0x90] sm:$0xff]  }
   0x3   :  { %1887 = vmatpush1.bf16.msra.mxu0 %v4243_v2  ;;  %1560 = vmatprep.subr.bf16.mxu1 %v4212_v0  ;;  %v3924_v7 = vld [vmem:[%s5607_s1 + $0x18] sm:$0xff]   ;;  %v3926_v9 = vld [vmem:[%s5607_s1 + $0x20] sm:$0xff]   ;;  %v3928_v11 = vld [vmem:[%s5607_s1 + $0x28] sm:$0xff]  }
   0x4   :  { %1888 = vmatprep.subr.bf16.mxu0 %v4212_v0  ;;  %v4275_v8 = vld [vmem:[%s5607_s1 + $0x98] sm:$0xff]   ;;  %v4286_v10 = vld [vmem:[%s5607_s1 + $0xa0] sm:$0xff]   ;;  %v4297_v12 = vld [vmem:[%s5607_s1 + $0xa8] sm:$0xff]  }
   0x5   :  { %v3930_v13 = vld [vmem:[%s5607_s1 + $0x30] sm:$0xff]   ;;  %v3932_v15 = vld [vmem:[%s5607_s1 + $0x38] sm:$0xff]   ;;  %v3934_v17 = vld [vmem:[%s5607_s1 + $0x40] sm:$0xff]  }
   0x6   :  { %1561 = vmatpush1.bf16.msra.mxu1 %v3920_v3  ;;  %v4308_v14 = vld [vmem:[%s5607_s1 + $0xb0] sm:$0xff]   ;;  %v4319_v16 = vld [vmem:[%s5607_s1 + $0xb8] sm:$0xff]   ;;  %v4330_v18 = vld [vmem:[%s5607_s1 + $0xc0] sm:$0xff]  }
   0x7   :  { %1889 = vmatpush1.bf16.msra.mxu0 %v4253_v4  ;;  %1562 = vmatprep.subr.bf16.mxu1 %v4212_v0  ;;  %v3952_v19 = vld [vmem:[%s5608_s0 + $0x4] ss:$20 sps:$4 sm:$0xff]   ;;  %v3936_v20 = vld [vmem:[%s5607_s1 + $0x48] sm:$0xff]   ;;  %v3938_v23 = vld [vmem:[%s5607_s1 + $0x50] sm:$0xff]  }
   0x8   :  { %1890 = vmatprep.subr.bf16.mxu0 %v4212_v0  ;;  %v3955_v21 = vld [vmem:[%s5608_s0 + $0xc] ss:$20 sps:$4 sm:$0xff]   ;;  %1590 = vmatprep.mubr.bf16.mxu1 %v3952_v19  ;;  %v4358_v24 = vld [vmem:[%s5607_s1 + $0xd0] sm:$0xff]   ;;  %v3940_v25 = vld [vmem:[%s5607_s1 + $0x58] sm:$0xff]  }
   0x9   :  { %v4347_v22 = vld [vmem:[%s5607_s1 + $0xc8] sm:$0xff]   ;;  %1918 = vmatprep.mubr.bf16.mxu0 %v3955_v21  ;;  %v4369_v26 = vld [vmem:[%s5607_s1 + $0xd8] sm:$0xff]   ;;  %v3942_v27 = vld [vmem:[%s5607_s1 + $0x60] sm:$0xff]  }
   0xa   :  { %1563 = vmatpush1.bf16.msra.mxu1 %v3922_v5  ;;  %v4380_v28 = vld [vmem:[%s5607_s1 + $0xe0] sm:$0xff]   ;;  %v3944_v29 = vld [vmem:[%s5607_s1 + $0x68] sm:$0xff]   ;;  %v3946_v31 = vld [vmem:[%s5607_s1 + $0x70] sm:$0xff]  }
   0xb   :  { %1891 = vmatpush1.bf16.msra.mxu0 %v4264_v6  ;;  %1564 = vmatprep.subr.bf16.mxu1 %v4212_v0  ;;  %v4391_v30 = vld [vmem:[%s5607_s1 + $0xe8] sm:$0xff]   ;;  %v4402_v32 = vld [vmem:[%s5607_s1 + $0xf0] sm:$0xff]   ;;  %v3948_v33 = vld [vmem:[%s5607_s1 + $0x78] sm:$0xff]  }
   0xc   :  { %1892 = vmatprep.subr.bf16.mxu0 %v4212_v0  ;;  %v4413_v34 = vld [vmem:[%s5607_s1 + $0xf8] sm:$0xff]   ;;  %v3950_v35 = vld [vmem:[%s5608_s0] ss:$20 sps:$4 sm:$0xff]   ;;  %v3985_v41 = vld [vmem:[%s5607_s1 + $0x108] sm:$0xff]  }
   0xd   :  { %v3953_v36 = vld [vmem:[%s5608_s0 + $0x8] ss:$20 sps:$4 sm:$0xff]   ;;  %v3957_v37 = vld [vmem:[%s5608_s0 + $0x2c] ss:$20 sps:$4 sm:$0xff]   ;;  %v3962_v43 = vld [vmem:[%s5608_s0 + $0x30] ss:$20 sps:$4 sm:$0xff]  }
   0xe   :  { %1565 = vmatpush1.bf16.msra.mxu1 %v3924_v7  ;;  %v3956_v38 = vld [vmem:[%s5607_s1 + $0x100] sm:$0xff]   ;;  %v3959_v40 = vld [vmem:[%s5608_s0 + $0x34] ss:$20 sps:$4 sm:$0xff]   ;;  %v3965_v45 = vld [vmem:[%s5608_s0 + $0x5c] ss:$20 sps:$4 sm:$0xff]  }
   0xf   :  { %1893 = vmatpush1.bf16.msra.mxu0 %v4275_v8  ;;  %1566 = vmatprep.subr.bf16.mxu1 %v4212_v0  ;;  %v3961_v42 = vld [vmem:[%s5608_s0 + $0x28] ss:$20 sps:$4 sm:$0xff]   ;;  %v4012_v46 = vld [vmem:[%s5607_s1 + $0x110] sm:$0xff]   ;;  %v3968_v49 = vld [vmem:[%s5608_s0 + $0x58] ss:$20 sps:$4 sm:$0xff]  }
  0x10   :  { %1894 = vmatprep.subr.bf16.mxu0 %v4212_v0  ;;  %v3963_v44 = vld [vmem:[%s5608_s0 + $0x54] ss:$20 sps:$4 sm:$0xff]   ;;  %v4043_v47 = vld [vmem:[%s5607_s1 + $0x118] sm:$0xff]   ;;  %v3967_v48 = vld [vmem:[%s5608_s0 + $0x50] ss:$20 sps:$4 sm:$0xff]  }
  0x11   :  { %v3969_v50 = vld [vmem:[%s5608_s0 + $0x7c] ss:$20 sps:$4 sm:$0xff]   ;;  %v3971_v51 = vld [vmem:[%s5608_s0 + $0x84] ss:$20 sps:$4 sm:$0xff]   ;;  %v3974_v53 = vld [vmem:[%s5608_s0 + $0x80] ss:$20 sps:$4 sm:$0xff]  }
  0x12   :  { %1567 = vmatpush1.bf16.msra.mxu1 %v3926_v9  ;;  %v3973_v52 = vld [vmem:[%s5608_s0 + $0x78] ss:$20 sps:$4 sm:$0xff]   ;;  %v3979_v56 = vld [vmem:[%s5608_s0 + $0xa0] ss:$20 sps:$4 sm:$0xff]   ;;  %v3980_v57 = vld [vmem:[%s5608_s0 + $0xa8] ss:$20 sps:$4 sm:$0xff]  }
  0x13   :  { %1895 = vmatpush1.bf16.msra.mxu0 %v4286_v10  ;;  %1568 = vmatprep.subr.bf16.mxu1 %v4212_v0  ;;  %v3975_v54 = vld [vmem:[%s5608_s0 + $0xa4] ss:$20 sps:$4 sm:$0xff]   ;;  %v3977_v55 = vld [vmem:[%s5608_s0 + $0xac] ss:$20 sps:$4 sm:$0xff]   ;;  %v3983_v59 = vld [vmem:[%s5608_s0 + $0xd4] ss:$20 sps:$4 sm:$0xff]  }
  0x14   :  { %1896 = vmatprep.subr.bf16.mxu0 %v4212_v0  ;;  %v3981_v58 = vld [vmem:[%s5608_s0 + $0xcc] ss:$20 sps:$4 sm:$0xff]   ;;  %v3986_v60 = vld [vmem:[%s5608_s0 + $0xc8] ss:$20 sps:$4 sm:$0xff]   ;;  %v3987_v61 = vld [vmem:[%s5608_s0 + $0xd0] ss:$20 sps:$4 sm:$0xff]  }
  0x15   :  { %v3988_v62 = vld [vmem:[%s5608_s0 + $0xf4] ss:$20 sps:$4 sm:$0xff]   ;;  %v3990_v63 = vld [vmem:[%s5608_s0 + $0xfc] ss:$20 sps:$4 sm:$0xff]   ;;  %v3998_v5 = vld [vmem:[%s5608_s0 + $0x118] ss:$20 sps:$4 sm:$0xff]  }
  0x16   :  { %1569 = vmatpush1.bf16.msra.mxu1 %v3928_v11  ;;  %v3992_v1 = vld [vmem:[%s5608_s0 + $0xf0] ss:$20 sps:$4 sm:$0xff]   ;;  %v4004_v9 = vld [vmem:[%s5608_s0 + $0x140] ss:$20 sps:$4 sm:$0xff]  }
  0x17   :  { %1897 = vmatpush1.bf16.msra.mxu0 %v4297_v12  ;;  %1570 = vmatprep.subr.bf16.mxu1 %v4212_v0  ;;  %v3994_v3 = vld [vmem:[%s5608_s0 + $0x11c] ss:$20 sps:$4 sm:$0xff]   ;;  %v4000_v7 = vld [vmem:[%s5608_s0 + $0x144] ss:$20 sps:$4 sm:$0xff]   ;;  %v4006_v11 = vld [vmem:[%s5608_s0 + $0x16c] ss:$20 sps:$4 sm:$0xff]  }
  0x18   :  { %1898 = vmatprep.subr.bf16.mxu0 %v4212_v0  ;;  %v4021_v19 = vld [vmem:[%s5608_s0 + $0x1c4] ss:$20 sps:$4 sm:$0xff]   ;;  %v4024_v21 = vld [vmem:[%s5608_s0 + $0x1c0] ss:$20 sps:$4 sm:$0xff]  }
  0x1a   :  { %1571 = vmatpush1.bf16.msra.mxu1 %v3930_v13  ;;  %v4010_v13 = vld [vmem:[%s5608_s0 + $0x168] ss:$20 sps:$4 sm:$0xff]  }
  0x1b   :  { %1899 = vmatpush1.bf16.msra.mxu0 %v4308_v14  ;;  %1572 = vmatprep.subr.bf16.mxu1 %v4212_v0 }
  0x1c   :  { %1900 = vmatprep.subr.bf16.mxu0 %v4212_v0 }
  0x1e   :  { %1573 = vmatpush1.bf16.msra.mxu1 %v3932_v15  ;;  %v4015_v15 = vld [vmem:[%s5608_s0 + $0x19c] ss:$20 sps:$4 sm:$0xff]  }
  0x1f   :  { %1901 = vmatpush1.bf16.msra.mxu0 %v4319_v16  ;;  %1574 = vmatprep.subr.bf16.mxu1 %v4212_v0 }
  0x20   :  { %1902 = vmatprep.subr.bf16.mxu0 %v4212_v0 }
  0x22   :  { %1575 = vmatpush1.bf16.msra.mxu1 %v3934_v17  ;;  %v4018_v17 = vld [vmem:[%s5608_s0 + $0x198] ss:$20 sps:$4 sm:$0xff]  }
  0x23   :  { %1903 = vmatpush1.bf16.msra.mxu0 %v4330_v18  ;;  %1576 = vmatprep.subr.bf16.mxu1 %v4212_v0 }
  0x24   :  { %1904 = vmatprep.subr.bf16.mxu0 %v4212_v0 }
  0x26   :  { %1577 = vmatpush1.bf16.msra.mxu1 %v3936_v20  ;;  %v4023_v20 = vld [vmem:[%s5608_s0 + $0x1b8] ss:$20 sps:$4 sm:$0xff]  }
  0x27   :  { %1905 = vmatpush1.bf16.msra.mxu0 %v4347_v22  ;;  %1578 = vmatprep.subr.bf16.mxu1 %v4212_v0 }
  0x28   :  { %1906 = vmatprep.subr.bf16.mxu0 %v4212_v0 }
  0x2a   :  { %1579 = vmatpush1.bf16.msra.mxu1 %v3938_v23  ;;  %v4027_v23 = vld [vmem:[%s5608_s0 + $0x1ec] ss:$20 sps:$4 sm:$0xff]  }
  0x2b   :  { %1907 = vmatpush1.bf16.msra.mxu0 %v4358_v24  ;;  %1580 = vmatprep.subr.bf16.mxu1 %v4212_v0 }
  0x2c   :  { %1908 = vmatprep.subr.bf16.mxu0 %v4212_v0 }
  0x2e   :  { %1581 = vmatpush1.bf16.msra.mxu1 %v3940_v25  ;;  %v4030_v25 = vld [vmem:[%s5608_s0 + $0x1e8] ss:$20 sps:$4 sm:$0xff]  }
  0x2f   :  { %1909 = vmatpush1.bf16.msra.mxu0 %v4369_v26  ;;  %1582 = vmatprep.subr.bf16.mxu1 %v4212_v0 }
  0x30   :  { %1910 = vmatprep.subr.bf16.mxu0 %v4212_v0 }
  0x32   :  { %1583 = vmatpush1.bf16.msra.mxu1 %v3942_v27  ;;  %v4033_v27 = vld [vmem:[%s5608_s0 + $0x214] ss:$20 sps:$4 sm:$0xff]  }
  0x33   :  { %1911 = vmatpush1.bf16.msra.mxu0 %v4380_v28  ;;  %1584 = vmatprep.subr.bf16.mxu1 %v4212_v0 }
  0x34   :  { %1912 = vmatprep.subr.bf16.mxu0 %v4212_v0 }
  0x36   :  { %1585 = vmatpush1.bf16.msra.mxu1 %v3944_v29  ;;  %v4036_v29 = vld [vmem:[%s5608_s0 + $0x210] ss:$20 sps:$4 sm:$0xff]  }
  0x37   :  { %1913 = vmatpush1.bf16.msra.mxu0 %v4391_v30  ;;  %1586 = vmatprep.subr.bf16.mxu1 %v4212_v0 }
  0x38   :  { %1914 = vmatprep.subr.bf16.mxu0 %v4212_v0 }
  0x3a   :  { %1587 = vmatpush1.bf16.msra.mxu1 %v3946_v31  ;;  %v4039_v31 = vld [vmem:[%s5608_s0 + $0x23c] ss:$20 sps:$4 sm:$0xff]  }
  0x3b   :  { %1915 = vmatpush1.bf16.msra.mxu0 %v4402_v32  ;;  %1588 = vmatprep.subr.bf16.mxu1 %v4212_v0 }
  0x3c   :  { %1916 = vmatprep.subr.bf16.mxu0 %v4212_v0 }
  0x3e   :  { %1589 = vmatpush1.bf16.msra.mxu1 %v3948_v33  ;;  %v4042_v33 = vld [vmem:[%s5608_s0 + $0x238] ss:$20 sps:$4 sm:$0xff]  }
  0x3f   :  { %1917 = vmatpush1.bf16.msra.mxu0 %v4413_v34  ;;  %3589 = vmatprep.subr.bf16.mxu1 %v4212_v0 }
  0x40   :  { %3433 = vmatprep.subr.bf16.mxu0 %v4213_v39 }
  0x41   :  { %1591 = vmatmul.mubr.bf16.vlgmr.msra.gmra.mrb[0].mxu1 %v3950_v35  ;;  %v4046_v35 = vld [vmem:[%s5608_s0 + $0x264] ss:$20 sps:$4 sm:$0xff]  }
  0x42   :  { %1919 = vmatmul.mubr.bf16.vlgmr.msra.gmra.mrb[0].mxu0 %v3953_v36  ;;  %1598 = vmatprep.mubr.bf16.mxu1 %v3957_v37  ;;  %v4048_v36 = vld [vmem:[%s5608_s0 + $0x258] ss:$20 sps:$4 sm:$0xff]   ;;  %v4049_v37 = vld [vmem:[%s5608_s0 + $0x260] ss:$20 sps:$4 sm:$0xff]  }
  0x43   :  { %3434 = vmatpush3.bf16.msra.mxu0 %v3956_v38  ;;  %3605 = vmatpush1.bf16.msra.mxu1 %v4243_v2  ;;  %v3993_v2 = vld [vmem:[%s5608_s0 + $0xf8] ss:$20 sps:$4 sm:$0xff]  }
  0x44   :  { %1926 = vmatprep.mubr.bf16.mxu0 %v3959_v40  ;;  %3590 = vmatprep.subr.bf16.mxu1 %v4212_v0  ;;  %v4050_v38 = vld [vmem:[%s5608_s0 + $0x284] ss:$20 sps:$4 sm:$0xff]   ;;  %v4052_v40 = vld [vmem:[%s5608_s0 + $0x28c] ss:$20 sps:$4 sm:$0xff]  }
  0x45   :  { %3435 = vmatprep.subr.bf16.mxu0 %v4213_v39 }
  0x47   :  { %3606 = vmatpush1.bf16.msra.mxu1 %v4253_v4  ;;  %3436 = vmatpush3.bf16.msra.mxu0 %v3985_v41  ;;  %v3996_v4 = vld [vmem:[%s5608_s0 + $0x124] ss:$20 sps:$4 sm:$0xff]   ;;  %v4054_v41 = vld [vmem:[%s5608_s0 + $0x280] ss:$20 sps:$4 sm:$0xff]  }
  0x48   :  { %3591 = vmatprep.subr.bf16.mxu1 %v4212_v0  ;;  %3437 = vmatprep.subr.bf16.mxu0 %v4213_v39 }
  0x49   :  { %1599 = vmatmul.mubr.bf16.gmra.mrb[4].mxu1 %v3961_v42  ;;  %v4055_v42 = vld [vmem:[%s5608_s0 + $0x288] ss:$20 sps:$4 sm:$0xff]  }
  0x4a   :  { %1927 = vmatmul.mubr.bf16.gmra.mrb[4].mxu0 %v3962_v43  ;;  %1606 = vmatprep.mubr.bf16.mxu1 %v3963_v44  ;;  %v4056_v43 = vld [vmem:[%s5608_s0 + $0x2ac] ss:$20 sps:$4 sm:$0xff]   ;;  %v4058_v44 = vld [vmem:[%s5608_s0 + $0x2b4] ss:$20 sps:$4 sm:$0xff]  }
  0x4b   :  { %1934 = vmatprep.mubr.bf16.mxu0 %v3965_v45  ;;  %3607 = vmatpush1.bf16.msra.mxu1 %v4264_v6  ;;  %v3999_v6 = vld [vmem:[%s5608_s0 + $0x120] ss:$20 sps:$4 sm:$0xff]   ;;  %v4060_v45 = vld [vmem:[%s5608_s0 + $0x2a8] ss:$20 sps:$4 sm:$0xff]  }
  0x4c   :  { %3592 = vmatprep.subr.bf16.mxu1 %v4212_v0  ;;  %3438 = vmatpush3.bf16.msra.mxu0 %v4012_v46  ;;  %v4061_v46 = vld [vmem:[%s5608_s0 + $0x2b0] ss:$20 sps:$4 sm:$0xff]  }
  0x4d   :  { %3439 = vmatprep.subr.bf16.mxu0 %v4213_v39 }
  0x4f   :  { %3608 = vmatpush1.bf16.msra.mxu1 %v4275_v8  ;;  %v4002_v8 = vld [vmem:[%s5608_s0 + $0x14c] ss:$20 sps:$4 sm:$0xff]  }
  0x50   :  { %3593 = vmatprep.subr.bf16.mxu1 %v4212_v0  ;;  %3440 = vmatpush3.bf16.msra.mxu0 %v4043_v47  ;;  %v4062_v47 = vld [vmem:[%s5608_s0 + $0x2d4] ss:$20 sps:$4 sm:$0xff]  }
  0x51   :  { %1607 = vmatmul.mubr.bf16.gmra.mrb[8].mxu1 %v3967_v48  ;;  %v4064_v48 = vld [vmem:[%s5608_s0 + $0x2dc] ss:$20 sps:$4 sm:$0xff]  }
  0x52   :  { %1935 = vmatmul.mubr.bf16.gmra.mrb[8].mxu0 %v3968_v49  ;;  %1614 = vmatprep.mubr.bf16.mxu1 %v3969_v50  ;;  %v4066_v49 = vld [vmem:[%s5608_s0 + $0x2d0] ss:$20 sps:$4 sm:$0xff]   ;;  %v4067_v50 = vld [vmem:[%s5608_s0 + $0x2d8] ss:$20 sps:$4 sm:$0xff]  }
  0x53   :  { %1942 = vmatprep.mubr.bf16.mxu0 %v3971_v51  ;;  %3609 = vmatpush1.bf16.msra.mxu1 %v4286_v10  ;;  %v4005_v10 = vld [vmem:[%s5608_s0 + $0x148] ss:$20 sps:$4 sm:$0xff]  }
  0x54   :  { %3594 = vmatprep.subr.bf16.mxu1 %v4212_v0  ;;  %v4068_v51 = vld [vmem:[%s5608_s0 + $0x2fc] ss:$20 sps:$4 sm:$0xff]  }
  0x57   :  { %3610 = vmatpush1.bf16.msra.mxu1 %v4297_v12  ;;  %v4008_v12 = vld [vmem:[%s5608_s0 + $0x174] ss:$20 sps:$4 sm:$0xff]  }
  0x58   :  { %3595 = vmatprep.subr.bf16.mxu1 %v4212_v0 }
  0x59   :  { %1615 = vmatmul.mubr.bf16.gmra.mrb[12].mxu1 %v3973_v52  ;;  %v4070_v52 = vld [vmem:[%s5608_s0 + $0x2f8] ss:$20 sps:$4 sm:$0xff]  }
  0x5a   :  { %1943 = vmatmul.mubr.bf16.gmra.mrb[12].mxu0 %v3974_v53  ;;  %1622 = vmatprep.mubr.bf16.mxu1 %v3975_v54  ;;  %v4071_v53 = vld [vmem:[%s5608_s0 + $0x10] ss:$20 sps:$4 sm:$0xff]  }
  0x5b   :  { %1950 = vmatprep.mubr.bf16.mxu0 %v3977_v55  ;;  %3611 = vmatpush1.bf16.msra.mxu1 %v4308_v14  ;;  %v4011_v14 = vld [vmem:[%s5608_s0 + $0x170] ss:$20 sps:$4 sm:$0xff]   ;;  %v4074_v55 = vld [vmem:[%s5608_s0 + $0x320] ss:$20 sps:$4 sm:$0xff]  }
  0x5c   :  { %3596 = vmatprep.subr.bf16.mxu1 %v4212_v0  ;;  %v4072_v54 = vld [vmem:[%s5608_s0 + $0x324] ss:$20 sps:$4 sm:$0xff]  }
  0x5f   :  { %3612 = vmatpush1.bf16.msra.mxu1 %v4319_v16  ;;  %v4017_v16 = vld [vmem:[%s5608_s0 + $0x190] ss:$20 sps:$4 sm:$0xff]  }
  0x60   :  { %3597 = vmatprep.subr.bf16.mxu1 %v4212_v0 }
  0x61   :  { %1623 = vmatmul.mubr.bf16.gmra.mrb[16].mxu1 %v3979_v56  ;;  %v4075_v56 = vld [vmem:[%s5608_s0 + $0x38] ss:$20 sps:$4 sm:$0xff]  }
  0x62   :  { %1951 = vmatmul.mubr.bf16.gmra.mrb[16].mxu0 %v3980_v57  ;;  %1630 = vmatprep.mubr.bf16.mxu1 %v3981_v58  ;;  %v4076_v57 = vld [vmem:[%s5608_s0 + $0x34c] ss:$20 sps:$4 sm:$0xff]   ;;  %v4078_v58 = vld [vmem:[%s5608_s0 + $0x348] ss:$20 sps:$4 sm:$0xff]  }
  0x63   :  { %1958 = vmatprep.mubr.bf16.mxu0 %v3983_v59  ;;  %3613 = vmatpush1.bf16.msra.mxu1 %v4330_v18  ;;  %v4019_v18 = vld [vmem:[%s5608_s0 + $0x1bc] ss:$20 sps:$4 sm:$0xff]   ;;  %v4079_v59 = vld [vmem:[%s5608_s0 + $0x60] ss:$20 sps:$4 sm:$0xff]  }
  0x64   :  { %3598 = vmatprep.subr.bf16.mxu1 %v4212_v0 }
  0x67   :  { %3614 = vmatpush1.bf16.msra.mxu1 %v4347_v22  ;;  %v4025_v22 = vld [vmem:[%s5608_s0 + $0x1e4] ss:$20 sps:$4 sm:$0xff]  }
  0x68   :  { %3599 = vmatprep.subr.bf16.mxu1 %v4212_v0 }
  0x69   :  { %1631 = vmatmul.mubr.bf16.gmra.mrb[20].mxu1 %v3986_v60  ;;  %v4080_v60 = vld [vmem:[%s5608_s0 + $0x374] ss:$20 sps:$4 sm:$0xff]  }
  0x6a   :  { %1959 = vmatmul.mubr.bf16.gmra.mrb[20].mxu0 %v3987_v61  ;;  %1638 = vmatprep.mubr.bf16.mxu1 %v3988_v62  ;;  %v4082_v61 = vld [vmem:[%s5608_s0 + $0x370] ss:$20 sps:$4 sm:$0xff]   ;;  %v4083_v62 = vld [vmem:[%s5608_s0 + $0x88] ss:$20 sps:$4 sm:$0xff]  }
  0x6b   :  { %1966 = vmatprep.mubr.bf16.mxu0 %v3990_v63  ;;  %3615 = vmatpush1.bf16.msra.mxu1 %v4358_v24  ;;  %v4029_v24 = vld [vmem:[%s5608_s0 + $0x1e0] ss:$20 sps:$4 sm:$0xff]   ;;  %v4084_v63 = vld [vmem:[%s5608_s0 + $0x39c] ss:$20 sps:$4 sm:$0xff]  }
  0x6c   :  { %3600 = vmatprep.subr.bf16.mxu1 %v4212_v0 }
  0x6f   :  { %3616 = vmatpush1.bf16.msra.mxu1 %v4369_v26  ;;  %v4031_v26 = vld [vmem:[%s5608_s0 + $0x20c] ss:$20 sps:$4 sm:$0xff]  }
  0x70   :  { %3601 = vmatprep.subr.bf16.mxu1 %v4212_v0 }
  0x71   :  { %1639 = vmatmul.mubr.bf16.gmra.mrb[24].mxu1 %v3992_v1  ;;  %v4086_v1 = vld [vmem:[%s5608_s0 + $0x398] ss:$20 sps:$4 sm:$0xff]  }
  0x72   :  { %1967 = vmatmul.mubr.bf16.gmra.mrb[24].mxu0 %v3993_v2  ;;  %1646 = vmatprep.mubr.bf16.mxu1 %v3994_v3  ;;  %v4087_v2 = vld [vmem:[%s5608_s0 + $0xb0] ss:$20 sps:$4 sm:$0xff]  }
  0x73   :  { %1974 = vmatprep.mubr.bf16.mxu0 %v3996_v4  ;;  %3617 = vmatpush1.bf16.msra.mxu1 %v4380_v28  ;;  %v4035_v28 = vld [vmem:[%s5608_s0 + $0x208] ss:$20 sps:$4 sm:$0xff]   ;;  %v4088_v3 = vld [vmem:[%s5608_s0 + $0x3c4] ss:$20 sps:$4 sm:$0xff]   ;;  %v4090_v4 = vld [vmem:[%s5608_s0 + $0x3c0] ss:$20 sps:$4 sm:$0xff]  }
  0x74   :  { %3602 = vmatprep.subr.bf16.mxu1 %v4212_v0 }
  0x77   :  { %3618 = vmatpush1.bf16.msra.mxu1 %v4391_v30  ;;  %v4037_v30 = vld [vmem:[%s5608_s0 + $0x234] ss:$20 sps:$4 sm:$0xff]  }
  0x78   :  { %3603 = vmatprep.subr.bf16.mxu1 %v4212_v0 }
  0x79   :  { %1647 = vmatmul.mubr.bf16.gmra.mrb[28].mxu1 %v3998_v5  ;;  %v4091_v5 = vld [vmem:[%s5608_s0 + $0xd8] ss:$20 sps:$4 sm:$0xff]  }
  0x7a   :  { %1975 = vmatmul.mubr.bf16.gmra.mrb[28].mxu0 %v3999_v6  ;;  %1654 = vmatprep.mubr.bf16.mxu1 %v4000_v7  ;;  %v4092_v6 = vld [vmem:[%s5608_s0 + $0x3ec] ss:$20 sps:$4 sm:$0xff]   ;;  %v4094_v7 = vld [vmem:[%s5608_s0 + $0x3e8] ss:$20 sps:$4 sm:$0xff]  }
  0x7b   :  { %1982 = vmatprep.mubr.bf16.mxu0 %v4002_v8  ;;  %3619 = vmatpush1.bf16.msra.mxu1 %v4402_v32  ;;  %v4041_v32 = vld [vmem:[%s5608_s0 + $0x230] ss:$20 sps:$4 sm:$0xff]   ;;  %v4095_v8 = vld [vmem:[%s5608_s0 + $0x100] ss:$20 sps:$4 sm:$0xff]  }
  0x7c   :  { %3604 = vmatprep.subr.bf16.mxu1 %v4212_v0  ;;  %v4013_v0 = vld [vmem:[%s5608_s0 + $0x194] ss:$20 sps:$4 sm:$0xff]  }
  0x7f   :  { %3620 = vmatpush1.bf16.msra.mxu1 %v4413_v34  ;;  %v4044_v34 = vld [vmem:[%s5608_s0 + $0x25c] ss:$20 sps:$4 sm:$0xff]  }
  0x81   :  { %1655 = vmatmul.mubr.bf16.gmra.mrb[32].mxu1 %v4004_v9  ;;  %v4096_v9 = vld [vmem:[%s5608_s0 + $0x414] ss:$20 sps:$4 sm:$0xff]  }
  0x82   :  { %1983 = vmatmul.mubr.bf16.gmra.mrb[32].mxu0 %v4005_v10  ;;  %1662 = vmatprep.mubr.bf16.mxu1 %v4006_v11  ;;  %v4098_v10 = vld [vmem:[%s5608_s0 + $0x410] ss:$20 sps:$4 sm:$0xff]   ;;  %v4099_v11 = vld [vmem:[%s5608_s0 + $0x128] ss:$20 sps:$4 sm:$0xff]  }
  0x83   :  { %1990 = vmatprep.mubr.bf16.mxu0 %v4008_v12  ;;  %v4100_v12 = vld [vmem:[%s5608_s0 + $0x43c] ss:$20 sps:$4 sm:$0xff]  }
  0x89   :  { %1663 = vmatmul.mubr.bf16.gmra.mrb[36].mxu1 %v4010_v13 }
  0x8a   :  { %1991 = vmatmul.mubr.bf16.gmra.mrb[36].mxu0 %v4011_v14  ;;  %1670 = vmatprep.mubr.bf16.mxu1 %v4013_v0  ;;  %v4102_v0 = vld [vmem:[%s5608_s0 + $0x438] ss:$20 sps:$4 sm:$0xff]  }
  0x8b   :  { %1998 = vmatprep.mubr.bf16.mxu0 %v4015_v15  ;;  %v4103_v15 = vld [vmem:[%s5608_s0 + $0x150] ss:$20 sps:$4 sm:$0xff]  }
  0x91   :  { %1671 = vmatmul.mubr.bf16.gmra.mrb[40].mxu1 %v4017_v16 }
  0x92   :  { %1999 = vmatmul.mubr.bf16.gmra.mrb[40].mxu0 %v4018_v17  ;;  %1678 = vmatprep.mubr.bf16.mxu1 %v4019_v18  ;;  %v4104_v17 = vld [vmem:[%s5608_s0 + $0x464] ss:$20 sps:$4 sm:$0xff]  }
  0x93   :  { %2006 = vmatprep.mubr.bf16.mxu0 %v4021_v19 }
  0x99   :  { %1679 = vmatmul.mubr.bf16.gmra.mrb[44].mxu1 %v4023_v20 }
  0x9a   :  { %2007 = vmatmul.mubr.bf16.gmra.mrb[44].mxu0 %v4024_v21  ;;  %1686 = vmatprep.mubr.bf16.mxu1 %v4025_v22  ;;  %v4106_v21 = vld [vmem:[%s5608_s0 + $0x460] ss:$20 sps:$4 sm:$0xff]   ;;  %v4107_v22 = vld [vmem:[%s5608_s0 + $0x178] ss:$20 sps:$4 sm:$0xff]  }
  0x9b   :  { %2014 = vmatprep.mubr.bf16.mxu0 %v4027_v23 }
  0xa1   :  { %1687 = vmatmul.mubr.bf16.gmra.mrb[48].mxu1 %v4029_v24  ;;  %v4108_v24 = vld [vmem:[%s5608_s0 + $0x48c] ss:$20 sps:$4 sm:$0xff]  }
  0xa2   :  { %2015 = vmatmul.mubr.bf16.gmra.mrb[48].mxu0 %v4030_v25  ;;  %1694 = vmatprep.mubr.bf16.mxu1 %v4031_v26 }
  0xa3   :  { %2022 = vmatprep.mubr.bf16.mxu0 %v4033_v27 }
  0xa9   :  { %1695 = vmatmul.mubr.bf16.gmra.mrb[52].mxu1 %v4035_v28  ;;  %v4110_v28 = vld [vmem:[%s5608_s0 + $0x488] ss:$20 sps:$4 sm:$0xff]  }
  0xaa   :  { %2023 = vmatmul.mubr.bf16.gmra.mrb[52].mxu0 %v4036_v29  ;;  %1702 = vmatprep.mubr.bf16.mxu1 %v4037_v30  ;;  %v4111_v29 = vld [vmem:[%s5608_s0 + $0x1a0] ss:$20 sps:$4 sm:$0xff]  }
  0xab   :  { %2030 = vmatprep.mubr.bf16.mxu0 %v4039_v31  ;;  %v4112_v31 = vld [vmem:[%s5608_s0 + $0x4b4] ss:$20 sps:$4 sm:$0xff]  }
  0xb1   :  { %1703 = vmatmul.mubr.bf16.gmra.mrb[56].mxu1 %v4041_v32 }
  0xb2   :  { %2031 = vmatmul.mubr.bf16.gmra.mrb[56].mxu0 %v4042_v33  ;;  %1710 = vmatprep.mubr.bf16.mxu1 %v4044_v34 }
  0xb3   :  { %2038 = vmatprep.mubr.bf16.mxu0 %v4046_v35  ;;  %v4114_v35 = vld [vmem:[%s5608_s0 + $0x4b0] ss:$20 sps:$4 sm:$0xff]  }
  0xb9   :  { %1711 = vmatmul.mubr.bf16.gmra.mrb[60].mxu1 %v4048_v36  ;;  %v4115_v36 = vld [vmem:[%s5608_s0 + $0x1c8] ss:$20 sps:$4 sm:$0xff]  }
  0xba   :  { %2039 = vmatmul.mubr.bf16.gmra.mrb[60].mxu0 %v4049_v37  ;;  %1718 = vmatprep.mubr.bf16.mxu1 %v4050_v38  ;;  %v4116_v38 = vld [vmem:[%s5608_s0 + $0x4dc] ss:$20 sps:$4 sm:$0xff]  }
  0xbb   :  { %2046 = vmatprep.mubr.bf16.mxu0 %v4052_v40 }
  0xc1   :  { %1719 = vmatmul.mubr.bf16.gmra.mrb[64].mxu1 %v4054_v41 }
  0xc2   :  { %2047 = vmatmul.mubr.bf16.gmra.mrb[64].mxu0 %v4055_v42  ;;  %1726 = vmatprep.mubr.bf16.mxu1 %v4056_v43  ;;  %v4118_v43 = vld [vmem:[%s5608_s0 + $0x4d8] ss:$20 sps:$4 sm:$0xff]  }
  0xc3   :  { %2054 = vmatprep.mubr.bf16.mxu0 %v4058_v44  ;;  %v4119_v44 = vld [vmem:[%s5608_s0 + $0x1f0] ss:$20 sps:$4 sm:$0xff]  }
  0xc9   :  { %1727 = vmatmul.mubr.bf16.gmra.mrb[68].mxu1 %v4060_v45 }
  0xca   :  { %2055 = vmatmul.mubr.bf16.gmra.mrb[68].mxu0 %v4061_v46  ;;  %1734 = vmatprep.mubr.bf16.mxu1 %v4062_v47  ;;  %v4120_v46 = vld [vmem:[%s5608_s0 + $0x504] ss:$20 sps:$4 sm:$0xff]  }
  0xcb   :  { %2062 = vmatprep.mubr.bf16.mxu0 %v4064_v48 }
  0xd1   :  { %1735 = vmatmul.mubr.bf16.gmra.mrb[72].mxu1 %v4066_v49 }
  0xd2   :  { %2063 = vmatmul.mubr.bf16.gmra.mrb[72].mxu0 %v4067_v50  ;;  %1742 = vmatprep.mubr.bf16.mxu1 %v4068_v51  ;;  %v4122_v50 = vld [vmem:[%s5608_s0 + $0x500] ss:$20 sps:$4 sm:$0xff]   ;;  %v4123_v51 = vld [vmem:[%s5608_s0 + $0x218] ss:$20 sps:$4 sm:$0xff]  }
  0xd3   :  { %3441 = vmatprep.mubr.msk.bf16.mxu0 %vm4214_vm0, %v4213_v39 }
  0xd9   :  { %1743 = vmatmul.mubr.bf16.gmra.mrb[76].mxu1 %v4070_v52 }
  0xda   :  { %3442 = vmatmul.mubr.msk.bf16.vlgmr.msra.gmra.mrb[0].mxu0 %vm1446_vm1, %v4071_v53  ;;  %1750 = vmatprep.mubr.bf16.mxu1 %v4072_v54  ;;  %v4124_v53 = vld [vmem:[%s5608_s0 + $0x52c] ss:$20 sps:$4 sm:$0xff]  }
  0xdb   :  { %3445 = vmatprep.mubr.msk.bf16.mxu0 %vm4214_vm0, %v4213_v39 }
  0xe1   :  { %1751 = vmatmul.mubr.bf16.gmra.mrb[80].mxu1 %v4074_v55 }
  0xe2   :  { %3446 = vmatmul.mubr.msk.bf16.gmra.mrb[4].mxu0 %vm1446_vm1, %v4075_v56  ;;  %1758 = vmatprep.mubr.bf16.mxu1 %v4076_v57  ;;  %v4126_v57 = vld [vmem:[%s5608_s0 + $0x528] ss:$20 sps:$4 sm:$0xff]  }
  0xe3   :  { %3449 = vmatprep.mubr.msk.bf16.mxu0 %vm4214_vm0, %v4213_v39 }
  0xe9   :  { %1759 = vmatmul.mubr.bf16.gmra.mrb[84].mxu1 %v4078_v58  ;;  %v4127_v58 = vld [vmem:[%s5608_s0 + $0x240] ss:$20 sps:$4 sm:$0xff]  }
  0xea   :  { %3450 = vmatmul.mubr.msk.bf16.gmra.mrb[8].mxu0 %vm1446_vm1, %v4079_v59  ;;  %1766 = vmatprep.mubr.bf16.mxu1 %v4080_v60  ;;  %v4128_v60 = vld [vmem:[%s5608_s0 + $0x554] ss:$20 sps:$4 sm:$0xff]  }
  0xeb   :  { %3453 = vmatprep.mubr.msk.bf16.mxu0 %vm4214_vm0, %v4213_v39 }
  0xf1   :  { %1767 = vmatmul.mubr.bf16.gmra.mrb[88].mxu1 %v4082_v61 }
  0xf2   :  { %3454 = vmatmul.mubr.msk.bf16.gmra.mrb[12].mxu0 %vm1446_vm1, %v4083_v62  ;;  %1774 = vmatprep.mubr.bf16.mxu1 %v4084_v63 }
  0xf3   :  { %3457 = vmatprep.mubr.msk.bf16.mxu0 %vm4214_vm0, %v4213_v39 }
  0xf9   :  { %1775 = vmatmul.mubr.bf16.gmra.mrb[92].mxu1 %v4086_v1  ;;  %v4130_v1 = vld [vmem:[%s5608_s0 + $0x550] ss:$20 sps:$4 sm:$0xff]  }
  0xfa   :  { %3458 = vmatmul.mubr.msk.bf16.gmra.mrb[16].mxu0 %vm1446_vm1, %v4087_v2  ;;  %1782 = vmatprep.mubr.bf16.mxu1 %v4088_v3  ;;  %v4131_v2 = vld [vmem:[%s5608_s0 + $0x268] ss:$20 sps:$4 sm:$0xff]  }
  0xfb   :  { %3461 = vmatprep.mubr.msk.bf16.mxu0 %vm4214_vm0, %v4213_v39 }
 0x101   :  { %1783 = vmatmul.mubr.bf16.gmra.mrb[96].mxu1 %v4090_v4  ;;  %v4132_v4 = vld [vmem:[%s5608_s0 + $0x57c] ss:$20 sps:$4 sm:$0xff]  }
 0x102   :  { %3462 = vmatmul.mubr.msk.bf16.gmra.mrb[20].mxu0 %vm1446_vm1, %v4091_v5  ;;  %1790 = vmatprep.mubr.bf16.mxu1 %v4092_v6  ;;  %v231_v6 = vld [vmem:[%s5608_s0 + $0x5a0] sm:$0x11] }
 0x103   :  { %3465 = vmatprep.mubr.msk.bf16.mxu0 %vm4214_vm0, %v4213_v39 }
 0x109   :  { %1791 = vmatmul.mubr.bf16.gmra.mrb[100].mxu1 %v4094_v7 }
 0x10a   :  { %3466 = vmatmul.mubr.msk.bf16.gmra.mrb[24].mxu0 %vm1446_vm1, %v4095_v8  ;;  %1798 = vmatprep.mubr.bf16.mxu1 %v4096_v9  ;;  %v4134_v9 = vld [vmem:[%s5608_s0 + $0x578] ss:$20 sps:$4 sm:$0xff]  }
 0x10b   :  { %3469 = vmatprep.mubr.msk.bf16.mxu0 %vm4214_vm0, %v4213_v39 }
 0x111   :  { %1799 = vmatmul.mubr.bf16.gmra.mrb[104].mxu1 %v4098_v10  ;;  %v4135_v10 = vld [vmem:[%s5608_s0 + $0x290] ss:$20 sps:$4 sm:$0xff]  }
 0x112   :  { %3470 = vmatmul.mubr.msk.bf16.gmra.mrb[28].mxu0 %vm1446_vm1, %v4099_v11  ;;  %1806 = vmatprep.mubr.bf16.mxu1 %v4100_v12  ;;  %v3169_v12 = vcombine.high %v231_v6, %v231_v6 }
 0x113   :  { %3473 = vmatprep.mubr.msk.bf16.mxu0 %vm4214_vm0, %v4213_v39 }
 0x114   :  { %v4788_v13 = vpop.f32.mrb[0].mxu1 }
 0x115   :  { %v1594_v14 = vpop.f32.mrb[1].mxu1 }
 0x116   :  { %v4796_v16 = vpop.f32.mrb[2].mxu1 }
 0x117   :  { %v1597_v18 = vpop.f32.mrb[3].mxu1 }
 0x118   :  { %v4138_v18 = vld [vmem:[%s5608_s0 + $0x2b8] ss:$20 sps:$4 sm:$0xff]  }
 0x119   :  { %1807 = vmatmul.mubr.bf16.gmra.mrb[108].mxu1 %v4102_v0 }
 0x11a   :  { %3474 = vmatmul.mubr.msk.bf16.gmra.mrb[32].mxu0 %vm1446_vm1, %v4103_v15  ;;  %1814 = vmatprep.mubr.bf16.mxu1 %v4104_v17  ;;  %v3168_v17 = vcombine.low %v231_v6, %v231_v6 }
 0x11b   :  { %3477 = vmatprep.mubr.msk.bf16.mxu0 %vm4214_vm0, %v4213_v39 }
 0x11c   :  { %v4804_v19 = vpop.f32.mrb[4].mxu1 }
 0x11d   :  { %v1602_v20 = vpop.f32.mrb[5].mxu1 }
 0x11e   :  { %v4812_v23 = vpop.f32.mrb[6].mxu1 }
 0x11f   :  { %v1605_v25 = vpop.f32.mrb[7].mxu1 }
 0x120   :  { %v4139_v25 = vld [vmem:[%s5608_s0 + $0x300] ss:$20 sps:$4 sm:$0xff]  }
 0x121   :  { %1815 = vmatmul.mubr.bf16.gmra.mrb[112].mxu1 %v4106_v21  ;;  %v4141_v21 = vld [vmem:[%s5608_s0 + $0x304] ss:$20 sps:$4 sm:$0xff]  }
 0x122   :  { %3478 = vmatmul.mubr.msk.bf16.gmra.mrb[36].mxu0 %vm1446_vm1, %v4107_v22  ;;  %1822 = vmatprep.mubr.bf16.mxu1 %v4108_v24 }
 0x123   :  { %3481 = vmatprep.mubr.msk.bf16.mxu0 %vm4214_vm0, %v4213_v39 }
 0x124   :  { %v4820_v26 = vpop.f32.mrb[8].mxu1 }
 0x125   :  { %v1610_v27 = vpop.f32.mrb[9].mxu1 }
 0x126   :  { %v4828_v30 = vpop.f32.mrb[10].mxu1 }
 0x127   :  { %v1613_v32 = vpop.f32.mrb[11].mxu1 }
 0x129   :  { %1823 = vmatmul.mubr.bf16.gmra.mrb[116].mxu1 %v4110_v28  ;;  %v4142_v28 = vld [vmem:[%s5608_s0 + $0x2e0] ss:$20 sps:$4 sm:$0xff]  }
 0x12a   :  { %3482 = vmatmul.mubr.msk.bf16.gmra.mrb[40].mxu0 %vm1446_vm1, %v4111_v29  ;;  %1830 = vmatprep.mubr.bf16.mxu1 %v4112_v31  ;;  %v4143_v31 = vld [vmem:[%s5608_s0 + $0x32c] ss:$20 sps:$4 sm:$0xff]  }
 0x12b   :  { %3485 = vmatprep.mubr.msk.bf16.mxu0 %vm4214_vm0, %v4213_v39 }
 0x12c   :  { %v4836_v33 = vpop.f32.mrb[12].mxu1 }
 0x12d   :  { %v1618_v34 = vpop.f32.mrb[13].mxu1 }
 0x12e   :  { %v4844_v37 = vpop.f32.mrb[14].mxu1 }
 0x12f   :  { %v1621_v40 = vpop.f32.mrb[15].mxu1 }
 0x131   :  { %1831 = vmatmul.mubr.bf16.gmra.mrb[120].mxu1 %v4114_v35 }
 0x132   :  { %3486 = vmatmul.mubr.msk.bf16.gmra.mrb[44].mxu0 %vm1446_vm1, %v4115_v36  ;;  %1838 = vmatprep.mubr.bf16.mxu1 %v4116_v38  ;;  %v4145_v36 = vld [vmem:[%s5608_s0 + $0x328] ss:$20 sps:$4 sm:$0xff]  }
 0x133   :  { %3489 = vmatprep.mubr.msk.bf16.mxu0 %vm4214_vm0, %v4213_v39  ;;  %v4146_v38 = vld [vmem:[%s5608_s0 + $0x308] ss:$20 sps:$4 sm:$0xff]  }
 0x134   :  { %v4852_v41 = vpop.f32.mrb[16].mxu1 }
 0x135   :  { %v1626_v42 = vpop.f32.mrb[17].mxu1 }
 0x136   :  { %v4860_v45 = vpop.f32.mrb[18].mxu1  ;;  %v4147_v42 = vld [vmem:[%s5608_s0 + $0x354] ss:$20 sps:$4 sm:$0xff]  }
 0x137   :  { %v1629_v47 = vpop.f32.mrb[19].mxu1 }
 0x138   :  { %v4149_v47 = vld [vmem:[%s5608_s0 + $0x350] ss:$20 sps:$4 sm:$0xff]  }
 0x139   :  { %1839 = vmatmul.mubr.bf16.gmra.mrb[124].mxu1 %v4118_v43 }
 0x13a   :  { %3490 = vmatmul.mubr.msk.bf16.gmra.mrb[48].mxu0 %vm1446_vm1, %v4119_v44  ;;  %1846 = vmatprep.mubr.bf16.mxu1 %v4120_v46 }
 0x13b   :  { %3493 = vmatprep.mubr.msk.bf16.mxu0 %vm4214_vm0, %v4213_v39 }
 0x13c   :  { %v4868_v48 = vpop.f32.mrb[20].mxu1 }
 0x13d   :  { %v1634_v49 = vpop.f32.mrb[21].mxu1 }
 0x13e   :  { %v4876_v52 = vpop.f32.mrb[22].mxu1  ;;  %v4150_v49 = vld [vmem:[%s5608_s0 + $0x330] ss:$20 sps:$4 sm:$0xff]  }
 0x13f   :  { %v1637_v54 = vpop.f32.mrb[23].mxu1 }
 0x141   :  { %1847 = vmatmul.mubr.bf16.gmra.mrb[128].mxu1 %v4122_v50 }
 0x142   :  { %3494 = vmatmul.mubr.msk.bf16.gmra.mrb[52].mxu0 %vm1446_vm1, %v4123_v51  ;;  %1854 = vmatprep.mubr.bf16.mxu1 %v4124_v53  ;;  %v4151_v51 = vld [vmem:[%s5608_s0 + $0x37c] ss:$20 sps:$4 sm:$0xff]  }
 0x143   :  { %3497 = vmatprep.mubr.msk.bf16.mxu0 %vm4214_vm0, %v4213_v39 }
 0x144   :  { %v4884_v55 = vpop.f32.mrb[24].mxu1 }
 0x145   :  { %v1642_v56 = vpop.f32.mrb[25].mxu1 }
 0x146   :  { %v4892_v59 = vpop.f32.mrb[26].mxu1 }
 0x147   :  { %v1645_v61 = vpop.f32.mrb[27].mxu1 }
 0x148   :  { %v4155_v61 = vld [vmem:[%s5608_s0 + $0x3a4] ss:$20 sps:$4 sm:$0xff]  }
 0x149   :  { %1855 = vmatmul.mubr.bf16.gmra.mrb[132].mxu1 %v4126_v57  ;;  %v4153_v57 = vld [vmem:[%s5608_s0 + $0x378] ss:$20 sps:$4 sm:$0xff]  }
 0x14a   :  { %3498 = vmatmul.mubr.msk.bf16.gmra.mrb[56].mxu0 %vm1446_vm1, %v4127_v58  ;;  %1862 = vmatprep.mubr.bf16.mxu1 %v4128_v60  ;;  %v4154_v58 = vld [vmem:[%s5608_s0 + $0x358] ss:$20 sps:$4 sm:$0xff]  }
 0x14b   :  { %3501 = vmatprep.mubr.msk.bf16.mxu0 %vm4214_vm0, %v4213_v39 }
 0x14c   :  { %v4900_v62 = vpop.f32.mrb[28].mxu1 }
 0x14d   :  { %v1650_v63 = vpop.f32.mrb[29].mxu1 }
 0x14e   :  { %v4908_v3 = vpop.f32.mrb[30].mxu1 }
 0x14f   :  { %v1653_v5 = vpop.f32.mrb[31].mxu1 }
 0x150   :  { %v4158_v5 = vld [vmem:[%s5608_s0 + $0x380] ss:$20 sps:$4 sm:$0xff]  }
 0x151   :  { %1863 = vmatmul.mubr.bf16.gmra.mrb[136].mxu1 %v4130_v1 }
 0x152   :  { %3502 = vmatmul.mubr.msk.bf16.gmra.mrb[60].mxu0 %vm1446_vm1, %v4131_v2  ;;  %1870 = vmatprep.mubr.bf16.mxu1 %v4132_v4  ;;  %v4157_v4 = vld [vmem:[%s5608_s0 + $0x3a0] ss:$20 sps:$4 sm:$0xff]  }
 0x153   :  { %3505 = vmatprep.mubr.msk.bf16.mxu0 %vm4214_vm0, %v4213_v39 }
 0x154   :  { %v4919_v7 = vpop.f32.mrb[32].mxu1 }
 0x155   :  { %v1658_v8 = vpop.f32.mrb[33].mxu1 }
 0x156   :  { %v4927_v11 = vpop.f32.mrb[34].mxu1  ;;  %v4159_v8 = vld [vmem:[%s5608_s0 + $0x3cc] ss:$20 sps:$4 sm:$0xff]  }
 0x157   :  { %v1661_v14 = vpop.f32.mrb[35].mxu1 }
 0x158   :  { %v4161_v14 = vld [vmem:[%s5608_s0 + $0x3c8] ss:$20 sps:$4 sm:$0xff]  }
 0x159   :  { %1871 = vmatmul.mubr.bf16.gmra.mrb[140].mxu1 %v4134_v9 }
 0x15a   :  { %3506 = vmatmul.mubr.msk.bf16.gmra.mrb[64].mxu0 %vm1446_vm1, %v4135_v10  ;;  %1878 = vmatprep.mubr.bf16.mxu1 %v3169_v12 }
 0x15b   :  { %3509 = vmatprep.mubr.msk.bf16.mxu0 %vm4214_vm0, %v4213_v39 }
 0x15c   :  { %v4932_v0 = vpop.f32.mrb[36].mxu1 }
 0x15d   :  { %v1666_v15 = vpop.f32.mrb[37].mxu1 }
 0x15e   :  { %v4937_v20 = vpop.f32.mrb[38].mxu1  ;;  %v4162_v15 = vld [vmem:[%s5608_s0 + $0x3a8] ss:$20 sps:$4 sm:$0xff]  }
 0x15f   :  { %v1669_v22 = vpop.f32.mrb[39].mxu1 }
 0x161   :  { %1879 = vmatmul.mubr.bf16.gmra.mrb[144].mxu1 %v3168_v17 }
 0x162   :  { %3510 = vmatmul.mubr.msk.bf16.gmra.mrb[68].mxu0 %vm1446_vm1, %v4138_v18  ;;  %2070 = vmatprep.mubr.bf16.mxu1 %v4141_v21  ;;  %v4163_v18 = vld [vmem:[%s5608_s0 + $0x3f4] ss:$20 sps:$4 sm:$0xff]  }
 0x163   :  { %3513 = vmatprep.mubr.msk.bf16.mxu0 %vm4214_vm0, %v4213_v39 }
 0x164   :  { %v4945_v24 = vpop.f32.mrb[40].mxu1 }
 0x165   :  { %v1674_v27 = vpop.f32.mrb[41].mxu1 }
 0x166   :  { %v4953_v29 = vpop.f32.mrb[42].mxu1  ;;  %v4165_v27 = vld [vmem:[%s5608_s0 + $0x3f0] ss:$20 sps:$4 sm:$0xff]  }
 0x167   :  { %v1677_v32 = vpop.f32.mrb[43].mxu1 }
 0x168   :  { %v4167_v32 = vld [vmem:[%s5608_s0 + $0x41c] ss:$20 sps:$4 sm:$0xff]  }
 0x169   :  { %2071 = vmatmul.mubr.bf16.vlgmr.msra.gmra.mrb[76].mxu1 %v4139_v25 }
 0x16a   :  { %3514 = vmatmul.mubr.msk.bf16.gmra.mrb[72].mxu0 %vm1446_vm1, %v4142_v28  ;;  %2078 = vmatprep.mubr.bf16.mxu1 %v4143_v31  ;;  %v4166_v28 = vld [vmem:[%s5608_s0 + $0x3d0] ss:$20 sps:$4 sm:$0xff]  }
 0x16b   :  { %3517 = vmatprep.mubr.msk.bf16.mxu0 %vm4214_vm0, %v4213_v39 }
 0x16c   :  { %v4961_v34 = vpop.f32.mrb[44].mxu1 }
 0x16d   :  { %v1682_v35 = vpop.f32.mrb[45].mxu1 }
 0x16e   :  { %v4969_v40 = vpop.f32.mrb[46].mxu1 }
 0x16f   :  { %v1685_v43 = vpop.f32.mrb[47].mxu1 }
 0x170   :  { %v4170_v43 = vld [vmem:[%s5608_s0 + $0x3f8] ss:$20 sps:$4 sm:$0xff]  }
 0x171   :  { %2079 = vmatmul.mubr.bf16.gmra.mrb[80].mxu1 %v4145_v36 }
 0x172   :  { %3518 = vmatmul.mubr.msk.bf16.gmra.mrb[76].mxu0 %vm1446_vm1, %v4146_v38  ;;  %2086 = vmatprep.mubr.bf16.mxu1 %v4147_v42  ;;  %v4169_v42 = vld [vmem:[%s5608_s0 + $0x418] ss:$20 sps:$4 sm:$0xff]  }
 0x173   :  { %3521 = vmatprep.mubr.msk.bf16.mxu0 %vm4214_vm0, %v4213_v39 }
 0x174   :  { %v4977_v44 = vpop.f32.mrb[48].mxu1 }
 0x175   :  { %v1690_v46 = vpop.f32.mrb[49].mxu1 }
 0x176   :  { %v4985_v50 = vpop.f32.mrb[50].mxu1 }
 0x177   :  { %v1693_v53 = vpop.f32.mrb[51].mxu1 }
 0x179   :  { %2087 = vmatmul.mubr.bf16.gmra.mrb[84].mxu1 %v4149_v47  ;;  %v4171_v47 = vld [vmem:[%s5608_s0 + $0x444] ss:$20 sps:$4 sm:$0xff]  }
 0x17a   :  { %3522 = vmatmul.mubr.msk.bf16.gmra.mrb[80].mxu0 %vm1446_vm1, %v4150_v49  ;;  %2094 = vmatprep.mubr.bf16.mxu1 %v4151_v51 }
 0x17b   :  { %3525 = vmatprep.mubr.msk.bf16.mxu0 %vm4214_vm0, %v4213_v39 }
 0x17c   :  { %v4993_v54 = vpop.f32.mrb[52].mxu1 }
 0x17d   :  { %v1698_v56 = vpop.f32.mrb[53].mxu1 }
 0x17e   :  { %v5001_v60 = vpop.f32.mrb[54].mxu1  ;;  %v4173_v56 = vld [vmem:[%s5608_s0 + $0x440] ss:$20 sps:$4 sm:$0xff]  }
 0x17f   :  { %v1701_v63 = vpop.f32.mrb[55].mxu1 }
 0x181   :  { %2095 = vmatmul.mubr.bf16.gmra.mrb[88].mxu1 %v4153_v57  ;;  %v4174_v57 = vld [vmem:[%s5608_s0 + $0x420] ss:$20 sps:$4 sm:$0xff]  }
 0x182   :  { %3526 = vmatmul.mubr.msk.bf16.gmra.mrb[84].mxu0 %vm1446_vm1, %v4154_v58  ;;  %2102 = vmatprep.mubr.bf16.mxu1 %v4155_v61  ;;  %v4175_v61 = vld [vmem:[%s5608_s0 + $0x46c] ss:$20 sps:$4 sm:$0xff]  }
 0x183   :  { %3529 = vmatprep.mubr.msk.bf16.mxu0 %vm4214_vm0, %v4213_v39 }
 0x184   :  { %v5009_v1 = vpop.f32.mrb[56].mxu1 }
 0x185   :  { %v1706_v2 = vpop.f32.mrb[57].mxu1 }
 0x186   :  { %v5017_v6 = vpop.f32.mrb[58].mxu1  ;;  %v5089_v2 = vld [vmem:[%s5609_s2] ss:$0 sm:$0xff] }
 0x187   :  { %v1709_v9 = vpop.f32.mrb[59].mxu1 }
 0x188   :  { %v1596_v9 = vadd.f32 %v5089_v2, %v4796_v16  ;;  %v1601_v16 = vadd.f32 %v5089_v2, %v4804_v19 }
 0x189   :  { %2103 = vmatmul.mubr.bf16.gmra.mrb[92].mxu1 %v4157_v4  ;;  %v1593_v4 = vadd.f32 %v5089_v2, %v4788_v13 }
 0x18a   :  { %3530 = vmatmul.mubr.msk.bf16.gmra.mrb[88].mxu0 %vm1446_vm1, %v4158_v5  ;;  %2110 = vmatprep.mubr.bf16.mxu1 %v4159_v8  ;;  %v4177_v8 = vld [vmem:[%s5608_s0 + $0x468] ss:$20 sps:$4 sm:$0xff]  }
 0x18b   :  { %3533 = vmatprep.mubr.msk.bf16.mxu0 %vm4214_vm0, %v4213_v39 }
 0x18c   :  { %v5025_v10 = vpop.f32.mrb[60].mxu1 }
 0x18d   :  { %v1714_v12 = vpop.f32.mrb[61].mxu1 }
 0x18e   :  { %v5033_v17 = vpop.f32.mrb[62].mxu1 }
 0x18f   :  { %v1717_v21 = vpop.f32.mrb[63].mxu1 }
 0x191   :  { %2111 = vmatmul.mubr.bf16.gmra.mrb[96].mxu1 %v4161_v14 }
 0x192   :  { %3534 = vmatmul.mubr.msk.bf16.gmra.mrb[92].mxu0 %vm1446_vm1, %v4162_v15  ;;  %2118 = vmatprep.mubr.bf16.mxu1 %v4163_v18  ;;  %v4178_v15 = vld [vmem:[%s5608_s0 + $0x448] ss:$20 sps:$4 sm:$0xff]  }
 0x193   :  { %3537 = vmatprep.mubr.msk.bf16.mxu0 %vm4214_vm0, %v4213_v39  ;;  %v4179_v18 = vld [vmem:[%s5608_s0 + $0x494] ss:$20 sps:$4 sm:$0xff]  }
 0x194   :  { %v5041_v22 = vpop.f32.mrb[64].mxu1 }
 0x195   :  { %v1722_v25 = vpop.f32.mrb[65].mxu1 }
 0x196   :  { %v5049_v31 = vpop.f32.mrb[66].mxu1 }
 0x197   :  { %v1725_v35 = vpop.f32.mrb[67].mxu1 }
 0x199   :  { %2119 = vmatmul.mubr.bf16.gmra.mrb[100].mxu1 %v4165_v27 }
 0x19a   :  { %3538 = vmatmul.mubr.msk.bf16.gmra.mrb[96].mxu0 %vm1446_vm1, %v4166_v28  ;;  %2126 = vmatprep.mubr.bf16.mxu1 %v4167_v32 }
 0x19b   :  { %3541 = vmatprep.mubr.msk.bf16.mxu0 %vm4214_vm0, %v4213_v39 }
 0x19c   :  { %v5057_v36 = vpop.f32.mrb[68].mxu1 }
 0x19d   :  { %v1730_v38 = vpop.f32.mrb[69].mxu1 }
 0x19e   :  { %v5065_v46 = vpop.f32.mrb[70].mxu1 }
 0x19f   :  { %v1733_v49 = vpop.f32.mrb[71].mxu1 }
 0x1a0   :  { %v4182_v49 = vld [vmem:[%s5608_s0 + $0x470] ss:$20 sps:$4 sm:$0xff]  }
 0x1a1   :  { %2127 = vmatmul.mubr.bf16.gmra.mrb[104].mxu1 %v4169_v42  ;;  %v4181_v42 = vld [vmem:[%s5608_s0 + $0x490] ss:$20 sps:$4 sm:$0xff]  }
 0x1a2   :  { %3542 = vmatmul.mubr.msk.bf16.gmra.mrb[100].mxu0 %vm1446_vm1, %v4170_v43  ;;  %2134 = vmatprep.mubr.bf16.mxu1 %v4171_v47  ;;  %v1604_v43 = vadd.f32 %v5089_v2, %v4812_v23 }
 0x1a3   :  { %3545 = vmatprep.mubr.msk.bf16.mxu0 %vm4214_vm0, %v4213_v39 }
 0x1a4   :  { %v5073_v51 = vpop.f32.mrb[72].mxu1 }
 0x1a5   :  { %v1738_v53 = vpop.f32.mrb[73].mxu1 }
 0x1a6   :  { %v5081_v58 = vpop.f32.mrb[74].mxu1  ;;  %v4183_v53 = vld [vmem:[%s5608_s0 + $0x4bc] ss:$20 sps:$4 sm:$0xff]  }
 0x1a7   :  { %v1741_v63 = vpop.f32.mrb[75].mxu1 }
 0x1a9   :  { %2135 = vmatmul.mubr.bf16.gmra.mrb[108].mxu1 %v4173_v56 }
 0x1aa   :  { %3546 = vmatmul.mubr.msk.bf16.gmra.mrb[104].mxu0 %vm1446_vm1, %v4174_v57  ;;  %2142 = vmatprep.mubr.bf16.mxu1 %v4175_v61 }
 0x1ab   :  { %3549 = vmatprep.mubr.msk.bf16.mxu0 %vm4214_vm0, %v4213_v39 }
 0x1ad   :  { %v2248_v5 = vpop.f32.mrb[0].mxu0 }
 0x1ae   :  { %v3622_v12 = vadd.f32 %v2248_v5, %v1593_v4  ;;  %v3443_v14 = vpop.f32.mrb[1].mxu0  ;;  %v1609_v5 = vadd.f32 %v5089_v2, %v4820_v26 }
 0x1af   :  { %v2251_v21 = vpop.f32.mrb[2].mxu0  ;;  %v1612_v14 = vadd.f32 %v5089_v2, %v4828_v30 }
 0x1b0   :  { %v2542_v13 = vmax.f32 %v3622_v12, 0.0  ;;  %v3624_v25 = vadd.f32 %v2251_v21, %v1596_v9  ;;  %v3444_v27 = vpop.f32.mrb[3].mxu0  ;;  %v4185_v12 = vld [vmem:[%s5608_s0 + $0x4b8] ss:$20 sps:$4 sm:$0xff]  }
 0x1b1   :  { %2143 = vmatmul.mubr.bf16.gmra.mrb[112].mxu1 %v4177_v8  ;;  %v4187_v21 = vld [vmem:[%s5608_s0 + $0x4e4] ss:$20 sps:$4 sm:$0xff]  }
 0x1b2   :  { %v3319_v28 = vpack.c.bf16 %v2542_v13, %v2542_v13  ;;  %v2543_v32 = vmax.f32 %v3624_v25, 0.0  ;;  %3550 = vmatmul.mubr.msk.bf16.gmra.mrb[108].mxu0 %vm1446_vm1, %v4178_v15  ;;  %2150 = vmatprep.mubr.bf16.mxu1 %v4179_v18  ;;  %v4186_v18 = vld [vmem:[%s5608_s0 + $0x498] ss:$20 sps:$4 sm:$0xff]  }
 0x1b3   :  { %3553 = vmatprep.mubr.msk.bf16.mxu0 %vm4214_vm0, %v4213_v39 }
 0x1b4   :  { %2909 = vst.msk [vmem:[%s5610_s3] sm:$0xf] %vm2908_vm2, %v3319_v28  ;;  %v3320_v35 = vpack.c.bf16 %v2543_v32, %v2543_v32 }
 0x1b5   :  { %v2256_v38 = vpop.f32.mrb[4].mxu0 }
 0x1b6   :  { %2910 = vst.msk [vmem:[%s5610_s3 + $0x4] sm:$0xf] %vm2908_vm2, %v3320_v35  ;;  %v3626_v19 = vadd.f32 %v2256_v38, %v1601_v16  ;;  %v3447_v47 = vpop.f32.mrb[5].mxu0  ;;  %v1617_v16 = vadd.f32 %v5089_v2, %v4836_v33 }
 0x1b7   :  { %v2259_v56 = vpop.f32.mrb[6].mxu0  ;;  %v4190_v47 = vld [vmem:[%s5608_s0 + $0x4c0] ss:$20 sps:$4 sm:$0xff]  }
 0x1b8   :  { %v2544_v57 = vmax.f32 %v3626_v19, 0.0  ;;  %v3628_v61 = vadd.f32 %v2259_v56, %v1604_v43  ;;  %v3448_v63 = vpop.f32.mrb[7].mxu0  ;;  %v1620_v43 = vadd.f32 %v5089_v2, %v4844_v37 }
 0x1b9   :  { %2151 = vmatmul.mubr.bf16.gmra.mrb[116].mxu1 %v4181_v42  ;;  %v4189_v42 = vld [vmem:[%s5608_s0 + $0x4e0] ss:$20 sps:$4 sm:$0xff]  }
 0x1ba   :  { %v3321_v23 = vpack.c.bf16 %v2544_v57, %v2544_v57  ;;  %v2545_v4 = vmax.f32 %v3628_v61, 0.0  ;;  %3554 = vmatmul.mubr.msk.bf16.gmra.mrb[112].mxu0 %vm1446_vm1, %v4182_v49  ;;  %2158 = vmatprep.mubr.bf16.mxu1 %v4183_v53  ;;  %v4191_v49 = vld [vmem:[%s5608_s0 + $0x50c] ss:$20 sps:$4 sm:$0xff]  }
 0x1bb   :  { %3557 = vmatprep.mubr.msk.bf16.mxu0 %vm4214_vm0, %v4213_v39 }
 0x1bc   :  { %2911 = vst.msk [vmem:[%s5610_s3 + $0x8] sm:$0xf] %vm2908_vm2, %v3321_v23  ;;  %v3322_v8 = vpack.c.bf16 %v2545_v4, %v2545_v4  ;;  %v1625_v23 = vadd.f32 %v5089_v2, %v4852_v41 }
 0x1bd   :  { %v2264_v9 = vpop.f32.mrb[8].mxu0 }
 0x1be   :  { %2912 = vst.msk [vmem:[%s5610_s3 + $0xc] sm:$0xf] %vm2908_vm2, %v3322_v8  ;;  %v3630_v26 = vadd.f32 %v2264_v9, %v1609_v5  ;;  %v3451_v15 = vpop.f32.mrb[9].mxu0  ;;  %v4193_v8 = vld [vmem:[%s5608_s0 + $0x508] ss:$20 sps:$4 sm:$0xff]   ;;  %v1628_v9 = vadd.f32 %v5089_v2, %v4860_v45 }
 0x1bf   :  { %v2267_v13 = vpop.f32.mrb[10].mxu0 }
 0x1c0   :  { %v2546_v25 = vmax.f32 %v3630_v26, 0.0  ;;  %v3632_v27 = vadd.f32 %v2267_v13, %v1612_v14  ;;  %v3452_v28 = vpop.f32.mrb[11].mxu0  ;;  %v4194_v14 = vld [vmem:[%s5608_s0 + $0x4e8] ss:$20 sps:$4 sm:$0xff]  }
 0x1c1   :  { %2159 = vmatmul.mubr.bf16.gmra.mrb[120].mxu1 %v4185_v12  ;;  %v4195_v26 = vld [vmem:[%s5608_s0 + $0x534] ss:$20 sps:$4 sm:$0xff]  }
 0x1c2   :  { %v3323_v30 = vpack.c.bf16 %v2546_v25, %v2546_v25  ;;  %v2547_v32 = vmax.f32 %v3632_v27, 0.0  ;;  %3558 = vmatmul.mubr.msk.bf16.gmra.mrb[116].mxu0 %vm1446_vm1, %v4186_v18  ;;  %2166 = vmatprep.mubr.bf16.mxu1 %v4187_v21  ;;  %v1633_v27 = vadd.f32 %v5089_v2, %v4868_v48 }
 0x1c3   :  { %3561 = vmatprep.mubr.msk.bf16.mxu0 %vm4214_vm0, %v4213_v39 }
 0x1c4   :  { %2913 = vst.msk [vmem:[%s5610_s3 + $0x10] sm:$0xf] %vm2908_vm2, %v3323_v30  ;;  %v3324_v35 = vpack.c.bf16 %v2547_v32, %v2547_v32  ;;  %v4197_v32 = vld [vmem:[%s5608_s0 + $0x530] ss:$20 sps:$4 sm:$0xff]  }
 0x1c5   :  { %v2272_v38 = vpop.f32.mrb[12].mxu0 }
 0x1c6   :  { %2914 = vst.msk [vmem:[%s5610_s3 + $0x14] sm:$0xf] %vm2908_vm2, %v3324_v35  ;;  %v3634_v33 = vadd.f32 %v2272_v38, %v1617_v16  ;;  %v3455_v19 = vpop.f32.mrb[13].mxu0  ;;  %v1636_v16 = vadd.f32 %v5089_v2, %v4876_v52  ;;  %v4198_v38 = vld [vmem:[%s5608_s0 + $0x510] ss:$20 sps:$4 sm:$0xff]  }
 0x1c7   :  { %v2275_v53 = vpop.f32.mrb[14].mxu0 }
 0x1c8   :  { %v2548_v56 = vmax.f32 %v3634_v33, 0.0  ;;  %v3636_v57 = vadd.f32 %v2275_v53, %v1620_v43  ;;  %v3456_v61 = vpop.f32.mrb[15].mxu0  ;;  %v1641_v53 = vadd.f32 %v5089_v2, %v4884_v55 }
 0x1c9   :  { %2167 = vmatmul.mubr.bf16.gmra.mrb[124].mxu1 %v4189_v42  ;;  %v4199_v42 = vld [vmem:[%s5608_s0 + $0x55c] ss:$20 sps:$4 sm:$0xff]   ;;  %v4201_v61 = vld [vmem:[%s5608_s0 + $0x558] ss:$20 sps:$4 sm:$0xff]  }
 0x1ca   :  { %v3325_v37 = vpack.c.bf16 %v2548_v56, %v2548_v56  ;;  %v2549_v63 = vmax.f32 %v3636_v57, 0.0  ;;  %3562 = vmatmul.mubr.msk.bf16.gmra.mrb[120].mxu0 %vm1446_vm1, %v4190_v47  ;;  %2174 = vmatprep.mubr.bf16.mxu1 %v4191_v49 }
 0x1cb   :  { %3565 = vmatprep.mubr.msk.bf16.mxu0 %vm4214_vm0, %v4213_v39 }
 0x1cc   :  { %2915 = vst.msk [vmem:[%s5610_s3 + $0x18] sm:$0xf] %vm2908_vm2, %v3325_v37  ;;  %v3326_v4 = vpack.c.bf16 %v2549_v63, %v2549_v63  ;;  %v1644_v37 = vadd.f32 %v5089_v2, %v4892_v59 }
 0x1cd   :  { %v2280_v5 = vpop.f32.mrb[16].mxu0 }
 0x1ce   :  { %2916 = vst.msk [vmem:[%s5610_s3 + $0x1c] sm:$0xf] %vm2908_vm2, %v3326_v4  ;;  %v3638_v41 = vadd.f32 %v2280_v5, %v1625_v23  ;;  %v3459_v12 = vpop.f32.mrb[17].mxu0  ;;  %v4202_v23 = vld [vmem:[%s5608_s0 + $0x538] ss:$20 sps:$4 sm:$0xff]  }
 0x1cf   :  { %v2283_v15 = vpop.f32.mrb[18].mxu0  ;;  %v4203_v4 = vld [vmem:[%s5608_s0 + $0x584] ss:$20 sps:$4 sm:$0xff]  }
 0x1d0   :  { %v2550_v18 = vmax.f32 %v3638_v41, 0.0  ;;  %v3640_v21 = vadd.f32 %v2283_v15, %v1628_v9  ;;  %v3460_v13 = vpop.f32.mrb[19].mxu0 }
 0x1d1   :  { %2175 = vmatmul.mubr.bf16.gmra.mrb[128].mxu1 %v4193_v8  ;;  %v1652_v13 = vadd.f32 %v5089_v2, %v4908_v3  ;;  %v1657_v3 = vadd.f32 %v5089_v2, %v4919_v7  ;;  %v4209_v7 = vld [vmem:[%s5608_s0 + $0x588] ss:$20 sps:$4 sm:$0xff]  }
 0x1d2   :  { %v3327_v45 = vpack.c.bf16 %v2550_v18, %v2550_v18  ;;  %v2551_v25 = vmax.f32 %v3640_v21, 0.0  ;;  %3566 = vmatmul.mubr.msk.bf16.gmra.mrb[124].mxu0 %vm1446_vm1, %v4194_v14  ;;  %2182 = vmatprep.mubr.bf16.mxu1 %v4195_v26  ;;  %v232_v14 = vld [vmem:[%s5608_s0 + $0x5a8] sm:$0x11]  ;;  %v1649_v26 = vadd.f32 %v5089_v2, %v4900_v62  ;;  %v4205_v21 = vld [vmem:[%s5608_s0 + $0x580] ss:$20 sps:$4 sm:$0xff]  }
 0x1d3   :  { %3569 = vmatprep.mubr.msk.bf16.mxu0 %vm4214_vm0, %v4213_v39 }
 0x1d4   :  { %2917 = vst.msk [vmem:[%s5610_s3 + $0x20] sm:$0xf] %vm2908_vm2, %v3327_v45  ;;  %v3328_v28 = vpack.c.bf16 %v2551_v25, %v2551_v25  ;;  %v4206_v25 = vld [vmem:[%s5608_s0 + $0x560] ss:$20 sps:$4 sm:$0xff]  }
 0x1d5   :  { %v2288_v30 = vpop.f32.mrb[20].mxu0 }
 0x1d6   :  { %2918 = vst.msk [vmem:[%s5610_s3 + $0x24] sm:$0xf] %vm2908_vm2, %v3328_v28  ;;  %v3642_v48 = vadd.f32 %v2288_v30, %v1633_v27  ;;  %v3463_v35 = vpop.f32.mrb[21].mxu0  ;;  %v3171_v27 = vcombine.high %v232_v14, %v232_v14 }
 0x1d7   :  { %v2291_v43 = vpop.f32.mrb[22].mxu0 }
 0x1d8   :  { %v2552_v33 = vmax.f32 %v3642_v48, 0.0  ;;  %v3644_v19 = vadd.f32 %v2291_v43, %v1636_v16  ;;  %v3464_v47 = vpop.f32.mrb[23].mxu0  ;;  %v3170_v43 = vcombine.low %v232_v14, %v232_v14 }
 0x1d9   :  { %2183 = vmatmul.mubr.bf16.gmra.mrb[132].mxu1 %v4197_v32 }
 0x1da   :  { %v3329_v52 = vpack.c.bf16 %v2552_v33, %v2552_v33  ;;  %v2553_v49 = vmax.f32 %v3644_v19, 0.0  ;;  %3570 = vmatmul.mubr.msk.bf16.gmra.mrb[128].mxu0 %vm1446_vm1, %v4198_v38  ;;  %2190 = vmatprep.mubr.bf16.mxu1 %v4199_v42  ;;  %v1660_v33 = vadd.f32 %v5089_v2, %v4927_v11  ;;  %v1665_v11 = vadd.f32 %v5089_v2, %v4932_v0  ;;  %v4210_v0 = vld [vmem:[%s5608_s0 + $0x5b0] ss:$0 sps:$4 sm:$0x11]  }
 0x1db   :  { %3573 = vmatprep.mubr.msk.bf16.mxu0 %vm4214_vm0, %v4213_v39 }
 0x1dc   :  { %2919 = vst.msk [vmem:[%s5610_s3 + $0x28] sm:$0xf] %vm2908_vm2, %v3329_v52  ;;  %v3330_v56 = vpack.c.bf16 %v2553_v49, %v2553_v49 }
 0x1dd   :  { %v2296_v57 = vpop.f32.mrb[24].mxu0 }
 0x1de   :  { %2920 = vst.msk [vmem:[%s5610_s3 + $0x2c] sm:$0xf] %vm2908_vm2, %v3330_v56  ;;  %v3646_v55 = vadd.f32 %v2296_v57, %v1641_v53  ;;  %v3467_v63 = vpop.f32.mrb[25].mxu0 }
 0x1df   :  { %v2299_v5 = vpop.f32.mrb[26].mxu0  ;;  %v1668_v63 = vadd.f32 %v5089_v2, %v4937_v20  ;;  %v1673_v20 = vadd.f32 %v5089_v2, %v4945_v24 }
 0x1e0   :  { %v2554_v8 = vmax.f32 %v3646_v55, 0.0  ;;  %v3648_v9 = vadd.f32 %v2299_v5, %v1644_v37  ;;  %v3468_v41 = vpop.f32.mrb[27].mxu0 }
 0x1e1   :  { %2191 = vmatmul.mubr.bf16.gmra.mrb[136].mxu1 %v4201_v61 }
 0x1e2   :  { %v3331_v59 = vpack.c.bf16 %v2554_v8, %v2554_v8  ;;  %v2555_v12 = vmax.f32 %v3648_v9, 0.0  ;;  %3574 = vmatmul.mubr.msk.bf16.gmra.mrb[132].mxu0 %vm1446_vm1, %v4202_v23  ;;  %2198 = vmatprep.mubr.bf16.mxu1 %v4203_v4 }
 0x1e3   :  { %3577 = vmatprep.mubr.msk.bf16.mxu0 %vm4214_vm0, %v4213_v39 }
 0x1e4   :  { %2921 = vst.msk [vmem:[%s5610_s3 + $0x30] sm:$0xf] %vm2908_vm2, %v3331_v59  ;;  %v3332_v15 = vpack.c.bf16 %v2555_v12, %v2555_v12 }
 0x1e5   :  { %v2304_v18 = vpop.f32.mrb[28].mxu0 }
 0x1e6   :  { %2922 = vst.msk [vmem:[%s5610_s3 + $0x34] sm:$0xf] %vm2908_vm2, %v3332_v15  ;;  %v3650_v62 = vadd.f32 %v2304_v18, %v1649_v26  ;;  %v3471_v45 = vpop.f32.mrb[29].mxu0  ;;  %v1676_v26 = vadd.f32 %v5089_v2, %v4953_v29 }
 0x1e7   :  { %v2307_v28 = vpop.f32.mrb[30].mxu0 }
 0x1e8   :  { %v2556_v30 = vmax.f32 %v3650_v62, 0.0  ;;  %v3652_v32 = vadd.f32 %v2307_v28, %v1652_v13  ;;  %v3472_v16 = vpop.f32.mrb[31].mxu0 }
 0x1e9   :  { %2199 = vmatmul.mubr.bf16.gmra.mrb[140].mxu1 %v4205_v21 }
 0x1ea   :  { %v3333_v48 = vpack.c.bf16 %v2556_v30, %v2556_v30  ;;  %v2557_v35 = vmax.f32 %v3652_v32, 0.0  ;;  %3578 = vmatmul.mubr.msk.bf16.gmra.mrb[136].mxu0 %vm1446_vm1, %v4206_v25  ;;  %2206 = vmatprep.mubr.bf16.mxu1 %v3171_v27  ;;  %v1681_v27 = vadd.f32 %v5089_v2, %v4961_v34  ;;  %v1684_v30 = vadd.f32 %v5089_v2, %v4969_v40 }
 0x1eb   :  { %3581 = vmatprep.mubr.msk.bf16.mxu0 %vm4214_vm0, %v4213_v39 }
 0x1ec   :  { %2923 = vst.msk [vmem:[%s5610_s3 + $0x38] sm:$0xf] %vm2908_vm2, %v3333_v48  ;;  %v3334_v38 = vpack.c.bf16 %v2557_v35, %v2557_v35 }
 0x1ed   :  { %v2312_v42 = vpop.f32.mrb[32].mxu0 }
 0x1ee   :  { %2924 = vst.msk [vmem:[%s5610_s3 + $0x3c] sm:$0xf] %vm2908_vm2, %v3334_v38  ;;  %v3654_v19 = vadd.f32 %v2312_v42, %v1657_v3  ;;  %v3475_v47 = vpop.f32.mrb[33].mxu0 }
 0x1ef   :  { %v2315_v52 = vpop.f32.mrb[34].mxu0 }
 0x1f0   :  { %v2558_v49 = vmax.f32 %v3654_v19, 0.0  ;;  %v3656_v53 = vadd.f32 %v2315_v52, %v1660_v33  ;;  %v3476_v56 = vpop.f32.mrb[35].mxu0  ;;  %v1692_v19 = vadd.f32 %v5089_v2, %v4985_v50 }
 0x1f1   :  { %2207 = vmatmul.mubr.bf16.gmra.mrb[144].mxu1 %v3170_v43  ;;  %v1689_v43 = vadd.f32 %v5089_v2, %v4977_v44 }
 0x1f2   :  { %v3335_v57 = vpack.c.bf16 %v2558_v49, %v2558_v49  ;;  %v2559_v61 = vmax.f32 %v3656_v53, 0.0  ;;  %3582 = vmatmul.mubr.msk.bf16.gmra.mrb[140].mxu0 %vm1446_vm1, %v4209_v7 }
 0x1f3   :  { %3585 = vmatprep.mubr.msk.bf16.mxu0 %vm4214_vm0, %v4213_v39 }
 0x1f4   :  { %2925 = vst.msk [vmem:[%s5610_s3 + $0x40] sm:$0xf] %vm2908_vm2, %v3335_v57  ;;  %v3336_v37 = vpack.c.bf16 %v2559_v61, %v2559_v61  ;;  %v1697_v61 = vadd.f32 %v5089_v2, %v4993_v54 }
 0x1f5   :  { %v2320_v55 = vpop.f32.mrb[36].mxu0 }
 0x1f6   :  { %2926 = vst.msk [vmem:[%s5610_s3 + $0x44] sm:$0xf] %vm2908_vm2, %v3336_v37  ;;  %v3658_v23 = vadd.f32 %v2320_v55, %v1665_v11  ;;  %v3479_v39 = vpop.f32.mrb[37].mxu0  ;;  %v1700_v37 = vadd.f32 %v5089_v2, %v5001_v60 }
 0x1f7   :  { %v2323_v4 = vpop.f32.mrb[38].mxu0 }
 0x1f8   :  { %v2560_v5 = vmax.f32 %v3658_v23, 0.0  ;;  %v3660_v8 = vadd.f32 %v2323_v4, %v1668_v63  ;;  %v3480_v9 = vpop.f32.mrb[39].mxu0 }
 0x1fa   :  { %v3337_v41 = vpack.c.bf16 %v2560_v5, %v2560_v5  ;;  %v2561_v59 = vmax.f32 %v3660_v8, 0.0  ;;  %3586 = vmatmul.mubr.msk.bf16.gmra.mrb[144].mxu0 %vm1446_vm1, %v4210_v0  ;;  %v1705_v8 = vadd.f32 %v5089_v2, %v5009_v1 }
 0x1fc   :  { %2927 = vst.msk [vmem:[%s5610_s3 + $0x48] sm:$0xf] %vm2908_vm2, %v3337_v41  ;;  %v3338_v12 = vpack.c.bf16 %v2561_v59, %v2561_v59  ;;  %v1708_v41 = vadd.f32 %v5089_v2, %v5017_v6 }
 0x1fd   :  { %v2328_v14 = vpop.f32.mrb[40].mxu0 }
 0x1fe   :  { %2928 = vst.msk [vmem:[%s5610_s3 + $0x4c] sm:$0xf] %vm2908_vm2, %v3338_v12  ;;  %v3662_v15 = vadd.f32 %v2328_v14, %v1673_v20  ;;  %v3483_v18 = vpop.f32.mrb[41].mxu0 }
 0x1ff   :  { %v2331_v21 = vpop.f32.mrb[42].mxu0 }
 0x200   :  { %v2562_v13 = vmax.f32 %v3662_v15, 0.0  ;;  %v3664_v24 = vadd.f32 %v2331_v21, %v1676_v26  ;;  %v3484_v62 = vpop.f32.mrb[43].mxu0  ;;  %v1713_v21 = vadd.f32 %v5089_v2, %v5025_v10 }
 0x202   :  { %v3339_v45 = vpack.c.bf16 %v2562_v13, %v2562_v13  ;;  %v2563_v25 = vmax.f32 %v3664_v24, 0.0  ;;  %v1716_v24 = vadd.f32 %v5089_v2, %v5033_v17 }
 0x204   :  { %2929 = vst.msk [vmem:[%s5610_s3 + $0x50] sm:$0xf] %vm2908_vm2, %v3339_v45  ;;  %v3340_v29 = vpack.c.bf16 %v2563_v25, %v2563_v25 }
 0x205   :  { %v2336_v28 = vpop.f32.mrb[44].mxu0 }
 0x206   :  { %2930 = vst.msk [vmem:[%s5610_s3 + $0x54] sm:$0xf] %vm2908_vm2, %v3340_v29  ;;  %v3666_v32 = vadd.f32 %v2336_v28, %v1681_v27  ;;  %v3487_v16 = vpop.f32.mrb[45].mxu0 }
 0x207   :  { %v2339_v48 = vpop.f32.mrb[46].mxu0 }
 0x208   :  { %v2564_v35 = vmax.f32 %v3666_v32, 0.0  ;;  %v3668_v34 = vadd.f32 %v2339_v48, %v1684_v30  ;;  %v3488_v3 = vpop.f32.mrb[47].mxu0  ;;  %v1721_v32 = vadd.f32 %v5089_v2, %v5041_v22  ;;  %v1724_v48 = vadd.f32 %v5089_v2, %v5049_v31 }
 0x20a   :  { %v3341_v38 = vpack.c.bf16 %v2564_v35, %v2564_v35  ;;  %v2565_v42 = vmax.f32 %v3668_v34, 0.0 }
 0x20c   :  { %2931 = vst.msk [vmem:[%s5610_s3 + $0x58] sm:$0xf] %vm2908_vm2, %v3341_v38  ;;  %v3342_v40 = vpack.c.bf16 %v2565_v42, %v2565_v42 }
 0x20d   :  { %v2344_v33 = vpop.f32.mrb[48].mxu0 }
 0x20e   :  { %2932 = vst.msk [vmem:[%s5610_s3 + $0x5c] sm:$0xf] %vm2908_vm2, %v3342_v40  ;;  %v3670_v47 = vadd.f32 %v2344_v33, %v1689_v43  ;;  %v3491_v7 = vpop.f32.mrb[49].mxu0  ;;  %v1729_v33 = vadd.f32 %v5089_v2, %v5057_v36 }
 0x20f   :  { %v2347_v52 = vpop.f32.mrb[50].mxu0 }
 0x210   :  { %v2566_v49 = vmax.f32 %v3670_v47, 0.0  ;;  %v3672_v44 = vadd.f32 %v2347_v52, %v1692_v19  ;;  %v3492_v53 = vpop.f32.mrb[51].mxu0  ;;  %v1732_v47 = vadd.f32 %v5089_v2, %v5065_v46 }
 0x212   :  { %v3343_v56 = vpack.c.bf16 %v2566_v49, %v2566_v49  ;;  %v2567_v57 = vmax.f32 %v3672_v44, 0.0 }
 0x214   :  { %2933 = vst.msk [vmem:[%s5610_s3 + $0x60] sm:$0xf] %vm2908_vm2, %v3343_v56  ;;  %v3344_v50 = vpack.c.bf16 %v2567_v57, %v2567_v57 }
 0x215   :  { %v2352_v11 = vpop.f32.mrb[52].mxu0 }
 0x216   :  { %2934 = vst.msk [vmem:[%s5610_s3 + $0x64] sm:$0xf] %vm2908_vm2, %v3344_v50  ;;  %v3674_v55 = vadd.f32 %v2352_v11, %v1697_v61  ;;  %v3495_v63 = vpop.f32.mrb[53].mxu0  ;;  %v1737_v61 = vadd.f32 %v5089_v2, %v5073_v51 }
 0x217   :  { %v2355_v23 = vpop.f32.mrb[54].mxu0 }
 0x218   :  { %v2568_v39 = vmax.f32 %v3674_v55, 0.0  ;;  %v3676_v54 = vadd.f32 %v2355_v23, %v1700_v37  ;;  %v3496_v0 = vpop.f32.mrb[55].mxu0  ;;  %v1740_v55 = vadd.f32 %v5089_v2, %v5081_v58 }
 0x21a   :  { %v3345_v4 = vpack.c.bf16 %v2568_v39, %v2568_v39  ;;  %v2569_v5 = vmax.f32 %v3676_v54, 0.0 }
 0x21c   :  { %2935 = vst.msk [vmem:[%s5610_s3 + $0x68] sm:$0xf] %vm2908_vm2, %v3345_v4  ;;  %v3346_v60 = vpack.c.bf16 %v2569_v5, %v2569_v5 }
 0x21d   :  { %v2360_v9 = vpop.f32.mrb[56].mxu0 }
 0x21e   :  { %2936 = vst.msk [vmem:[%s5610_s3 + $0x6c] sm:$0xf] %vm2908_vm2, %v3346_v60  ;;  %v3678_v59 = vadd.f32 %v2360_v9, %v1705_v8  ;;  %v3499_v20 = vpop.f32.mrb[57].mxu0 }
 0x21f   :  { %v2363_v12 = vpop.f32.mrb[58].mxu0 }
 0x220   :  { %v2570_v14 = vmax.f32 %v3678_v59, 0.0  ;;  %v3680_v1 = vadd.f32 %v2363_v12, %v1708_v41  ;;  %v3500_v26 = vpop.f32.mrb[59].mxu0 }
 0x222   :  { %v3347_v15 = vpack.c.bf16 %v2570_v14, %v2570_v14  ;;  %v2571_v18 = vmax.f32 %v3680_v1, 0.0 }
 0x224   :  { %2937 = vst.msk [vmem:[%s5610_s3 + $0x70] sm:$0xf] %vm2908_vm2, %v3347_v15  ;;  %v3348_v6 = vpack.c.bf16 %v2571_v18, %v2571_v18 }
 0x225   :  { %v2368_v13 = vpop.f32.mrb[60].mxu0 }
 0x226   :  { %2938 = vst.msk [vmem:[%s5610_s3 + $0x74] sm:$0xf] %vm2908_vm2, %v3348_v6  ;;  %v3682_v62 = vadd.f32 %v2368_v13, %v1713_v21  ;;  %v3503_v45 = vpop.f32.mrb[61].mxu0 }
 0x227   :  { %v2371_v25 = vpop.f32.mrb[62].mxu0 }
 0x228   :  { %v2572_v27 = vmax.f32 %v3682_v62, 0.0  ;;  %v3684_v10 = vadd.f32 %v2371_v25, %v1716_v24  ;;  %v3504_v29 = vpop.f32.mrb[63].mxu0 }
 0x22a   :  { %v3349_v28 = vpack.c.bf16 %v2572_v27, %v2572_v27  ;;  %v2573_v30 = vmax.f32 %v3684_v10, 0.0 }
 0x22c   :  { %2939 = vst.msk [vmem:[%s5610_s3 + $0x78] sm:$0xf] %vm2908_vm2, %v3349_v28  ;;  %v3350_v17 = vpack.c.bf16 %v2573_v30, %v2573_v30 }
 0x22d   :  { %v2376_v16 = vpop.f32.mrb[64].mxu0 }
 0x22e   :  { %2940 = vst.msk [vmem:[%s5610_s3 + $0x7c] sm:$0xf] %vm2908_vm2, %v3350_v17  ;;  %v3686_v35 = vadd.f32 %v2376_v16, %v1721_v32  ;;  %v3507_v34 = vpop.f32.mrb[65].mxu0 }
 0x22f   :  { %v2379_v3 = vpop.f32.mrb[66].mxu0 }
 0x230   :  { %v2574_v38 = vmax.f32 %v3686_v35, 0.0  ;;  %v3688_v22 = vadd.f32 %v2379_v3, %v1724_v48  ;;  %v3508_v42 = vpop.f32.mrb[67].mxu0 }
 0x232   :  { %v3351_v43 = vpack.c.bf16 %v2574_v38, %v2574_v38  ;;  %v2575_v40 = vmax.f32 %v3688_v22, 0.0 }
 0x234   :  { %2941 = vst.msk [vmem:[%s5610_s3 + $0x80] sm:$0xf] %vm2908_vm2, %v3351_v43  ;;  %v3352_v31 = vpack.c.bf16 %v2575_v40, %v2575_v40 }
 0x235   :  { %v2384_v19 = vpop.f32.mrb[68].mxu0 }
 0x236   :  { %2942 = vst.msk [vmem:[%s5610_s3 + $0x84] sm:$0xf] %vm2908_vm2, %v3352_v31  ;;  %v3690_v7 = vadd.f32 %v2384_v19, %v1729_v33  ;;  %v3511_v52 = vpop.f32.mrb[69].mxu0 }
 0x237   :  { %v2387_v49 = vpop.f32.mrb[70].mxu0 }
 0x238   :  { %v2576_v44 = vmax.f32 %v3690_v7, 0.0  ;;  %v3692_v36 = vadd.f32 %v2387_v49, %v1732_v47  ;;  %v3512_v53 = vpop.f32.mrb[71].mxu0 }
 0x23a   :  { %v3353_v56 = vpack.c.bf16 %v2576_v44, %v2576_v44  ;;  %v2577_v57 = vmax.f32 %v3692_v36, 0.0 }
 0x23c   :  { %2943 = vst.msk [vmem:[%s5610_s3 + $0x88] sm:$0xf] %vm2908_vm2, %v3353_v56  ;;  %v3354_v46 = vpack.c.bf16 %v2577_v57, %v2577_v57  ;;  %v2072_v50 = vpop.f32.mrb[76].mxu1 }
 0x23d   :  { %v2392_v11 = vpop.f32.mrb[72].mxu0  ;;  %v2074_v37 = vpop.f32.mrb[77].mxu1  ;;  %v3697_v9 = vadd.f32 %v5089_v2, %v2072_v50 }
 0x23e   :  { %2944 = vst.msk [vmem:[%s5610_s3 + $0x8c] sm:$0xf] %vm2908_vm2, %v3354_v46  ;;  %v3694_v63 = vadd.f32 %v2392_v11, %v1737_v61  ;;  %v3515_v23 = vpop.f32.mrb[73].mxu0  ;;  %v2075_v51 = vpop.f32.mrb[78].mxu1 }
 0x23f   :  { %v2395_v39 = vpop.f32.mrb[74].mxu0  ;;  %v2077_v54 = vpop.f32.mrb[79].mxu1  ;;  %v3699_v12 = vadd.f32 %v5089_v2, %v2075_v51 }
 0x240   :  { %v2578_v0 = vmax.f32 %v3694_v63, 0.0  ;;  %v3696_v4 = vadd.f32 %v2395_v39, %v1740_v55  ;;  %v3516_v5 = vpop.f32.mrb[75].mxu0 }
 0x242   :  { %v3355_v8 = vpack.c.bf16 %v2578_v0, %v2578_v0  ;;  %v2579_v60 = vmax.f32 %v3696_v4, 0.0 }
 0x244   :  { %2945 = vst.msk [vmem:[%s5610_s3 + $0x90] sm:$0xf] %vm2908_vm2, %v3355_v8  ;;  %v3356_v58 = vpack.c.bf16 %v2579_v60, %v2579_v60  ;;  %v2080_v41 = vpop.f32.mrb[80].mxu1 }
 0x245   :  { %v2400_v59 = vpop.f32.mrb[76].mxu0  ;;  %v2082_v20 = vpop.f32.mrb[81].mxu1  ;;  %v3701_v45 = vadd.f32 %v5089_v2, %v2080_v41 }
 0x246   :  { %2946 = vst.msk [vmem:[%s5610_s3 + $0x94] sm:$0xf] %vm2908_vm2, %v3356_v58  ;;  %v3698_v14 = vadd.f32 %v3697_v9, %v2400_v59  ;;  %v3519_v1 = vpop.f32.mrb[77].mxu0  ;;  %v2083_v26 = vpop.f32.mrb[82].mxu1 }
 0x247   :  { %v2403_v15 = vpop.f32.mrb[78].mxu0  ;;  %v2085_v18 = vpop.f32.mrb[83].mxu1  ;;  %v3703_v28 = vadd.f32 %v5089_v2, %v2083_v26 }
 0x248   :  { %v2580_v21 = vmax.f32 %v3698_v14, 0.0  ;;  %v3700_v6 = vadd.f32 %v3699_v12, %v2403_v15  ;;  %v3520_v13 = vpop.f32.mrb[79].mxu0 }
 0x24a   :  { %v3357_v24 = vpack.c.bf16 %v2580_v21, %v2580_v21  ;;  %v2581_v62 = vmax.f32 %v3700_v6, 0.0 }
 0x24c   :  { %2947 = vst.msk [vmem:[%s5610_s3 + $0x98] sm:$0xf] %vm2908_vm2, %v3357_v24  ;;  %v3358_v25 = vpack.c.bf16 %v2581_v62, %v2581_v62  ;;  %v2088_v27 = vpop.f32.mrb[84].mxu1 }
 0x24d   :  { %v2408_v10 = vpop.f32.mrb[80].mxu0  ;;  %v2090_v29 = vpop.f32.mrb[85].mxu1  ;;  %v3705_v42 = vadd.f32 %v5089_v2, %v2088_v27 }
 0x24e   :  { %2948 = vst.msk [vmem:[%s5610_s3 + $0x9c] sm:$0xf] %vm2908_vm2, %v3358_v25  ;;  %v3702_v30 = vadd.f32 %v3701_v45, %v2408_v10  ;;  %v3523_v32 = vpop.f32.mrb[81].mxu0  ;;  %v2091_v17 = vpop.f32.mrb[86].mxu1 }
 0x24f   :  { %v2411_v16 = vpop.f32.mrb[82].mxu0  ;;  %v2093_v48 = vpop.f32.mrb[87].mxu1  ;;  %v3707_v19 = vadd.f32 %v5089_v2, %v2091_v17 }
 0x250   :  { %v2582_v35 = vmax.f32 %v3702_v30, 0.0  ;;  %v3704_v34 = vadd.f32 %v3703_v28, %v2411_v16  ;;  %v3524_v3 = vpop.f32.mrb[83].mxu0 }
 0x252   :  { %v3359_v38 = vpack.c.bf16 %v2582_v35, %v2582_v35  ;;  %v2583_v22 = vmax.f32 %v3704_v34, 0.0 }
 0x254   :  { %2949 = vst.msk [vmem:[%s5610_s3 + $0xa0] sm:$0xf] %vm2908_vm2, %v3359_v38  ;;  %v3360_v43 = vpack.c.bf16 %v2583_v22, %v2583_v22  ;;  %v2096_v40 = vpop.f32.mrb[88].mxu1 }
 0x255   :  { %v2416_v33 = vpop.f32.mrb[84].mxu0  ;;  %v2098_v31 = vpop.f32.mrb[89].mxu1  ;;  %v3709_v46 = vadd.f32 %v5089_v2, %v2096_v40 }
 0x256   :  { %2950 = vst.msk [vmem:[%s5610_s3 + $0xa4] sm:$0xf] %vm2908_vm2, %v3360_v43  ;;  %v3706_v47 = vadd.f32 %v3705_v42, %v2416_v33  ;;  %v3527_v7 = vpop.f32.mrb[85].mxu0  ;;  %v2099_v52 = vpop.f32.mrb[90].mxu1 }
 0x257   :  { %v2419_v49 = vpop.f32.mrb[86].mxu0  ;;  %v2101_v44 = vpop.f32.mrb[91].mxu1  ;;  %v3711_v63 = vadd.f32 %v5089_v2, %v2099_v52 }
 0x258   :  { %v2584_v36 = vmax.f32 %v3706_v47, 0.0  ;;  %v3708_v53 = vadd.f32 %v3707_v19, %v2419_v49  ;;  %v3528_v56 = vpop.f32.mrb[87].mxu0 }
 0x25a   :  { %v3361_v57 = vpack.c.bf16 %v2584_v36, %v2584_v36  ;;  %v2585_v61 = vmax.f32 %v3708_v53, 0.0 }
 0x25c   :  { %2951 = vst.msk [vmem:[%s5610_s3 + $0xa8] sm:$0xf] %vm2908_vm2, %v3361_v57  ;;  %v3362_v50 = vpack.c.bf16 %v2585_v61, %v2585_v61  ;;  %v2104_v11 = vpop.f32.mrb[92].mxu1 }
 0x25d   :  { %v2424_v37 = vpop.f32.mrb[88].mxu0  ;;  %v2106_v55 = vpop.f32.mrb[93].mxu1  ;;  %v3713_v58 = vadd.f32 %v5089_v2, %v2104_v11 }
 0x25e   :  { %2952 = vst.msk [vmem:[%s5610_s3 + $0xac] sm:$0xf] %vm2908_vm2, %v3362_v50  ;;  %v3710_v23 = vadd.f32 %v3709_v46, %v2424_v37  ;;  %v3531_v51 = vpop.f32.mrb[89].mxu0  ;;  %v2107_v39 = vpop.f32.mrb[94].mxu1 }
 0x25f   :  { %v2427_v54 = vpop.f32.mrb[90].mxu0  ;;  %v2109_v0 = vpop.f32.mrb[95].mxu1  ;;  %v3715_v14 = vadd.f32 %v5089_v2, %v2107_v39 }
 0x260   :  { %v2586_v4 = vmax.f32 %v3710_v23, 0.0  ;;  %v3712_v5 = vadd.f32 %v3711_v63, %v2427_v54  ;;  %v3532_v8 = vpop.f32.mrb[91].mxu0 }
 0x262   :  { %v3363_v60 = vpack.c.bf16 %v2586_v4, %v2586_v4  ;;  %v2587_v9 = vmax.f32 %v3712_v5, 0.0 }
 0x264   :  { %2953 = vst.msk [vmem:[%s5610_s3 + $0xb0] sm:$0xf] %vm2908_vm2, %v3363_v60  ;;  %v3364_v41 = vpack.c.bf16 %v2587_v9, %v2587_v9  ;;  %v2112_v59 = vpop.f32.mrb[96].mxu1 }
 0x265   :  { %v2432_v20 = vpop.f32.mrb[92].mxu0  ;;  %v2114_v12 = vpop.f32.mrb[97].mxu1  ;;  %v3717_v25 = vadd.f32 %v5089_v2, %v2112_v59 }
 0x266   :  { %2954 = vst.msk [vmem:[%s5610_s3 + $0xb4] sm:$0xf] %vm2908_vm2, %v3364_v41  ;;  %v3714_v1 = vadd.f32 %v3713_v58, %v2432_v20  ;;  %v3535_v26 = vpop.f32.mrb[93].mxu0  ;;  %v2115_v15 = vpop.f32.mrb[98].mxu1 }
 0x267   :  { %v2435_v18 = vpop.f32.mrb[94].mxu0  ;;  %v2117_v21 = vpop.f32.mrb[99].mxu1  ;;  %v3719_v30 = vadd.f32 %v5089_v2, %v2115_v15 }
 0x268   :  { %v2588_v6 = vmax.f32 %v3714_v1, 0.0  ;;  %v3716_v13 = vadd.f32 %v3715_v14, %v2435_v18  ;;  %v3536_v24 = vpop.f32.mrb[95].mxu0 }
 0x26a   :  { %v3365_v62 = vpack.c.bf16 %v2588_v6, %v2588_v6  ;;  %v2589_v45 = vmax.f32 %v3716_v13, 0.0 }
 0x26c   :  { %2955 = vst.msk [vmem:[%s5610_s3 + $0xb8] sm:$0xf] %vm2908_vm2, %v3365_v62  ;;  %v3366_v27 = vpack.c.bf16 %v2589_v45, %v2589_v45  ;;  %v2120_v10 = vpop.f32.mrb[100].mxu1 }
 0x26d   :  { %v2440_v29 = vpop.f32.mrb[96].mxu0  ;;  %v2122_v28 = vpop.f32.mrb[101].mxu1  ;;  %v3721_v43 = vadd.f32 %v5089_v2, %v2120_v10 }
 0x26e   :  { %2956 = vst.msk [vmem:[%s5610_s3 + $0xbc] sm:$0xf] %vm2908_vm2, %v3366_v27  ;;  %v3718_v32 = vadd.f32 %v3717_v25, %v2440_v29  ;;  %v3539_v17 = vpop.f32.mrb[97].mxu0  ;;  %v2123_v16 = vpop.f32.mrb[102].mxu1 }
 0x26f   :  { %v2443_v48 = vpop.f32.mrb[98].mxu0  ;;  %v2125_v35 = vpop.f32.mrb[103].mxu1  ;;  %v3723_v47 = vadd.f32 %v5089_v2, %v2123_v16 }
 0x270   :  { %v2590_v34 = vmax.f32 %v3718_v32, 0.0  ;;  %v3720_v3 = vadd.f32 %v3719_v30, %v2443_v48  ;;  %v3540_v38 = vpop.f32.mrb[99].mxu0 }
 0x272   :  { %v3367_v22 = vpack.c.bf16 %v2590_v34, %v2590_v34  ;;  %v2591_v42 = vmax.f32 %v3720_v3, 0.0 }
 0x274   :  { %2957 = vst.msk [vmem:[%s5610_s3 + $0xc0] sm:$0xf] %vm2908_vm2, %v3367_v22  ;;  %v3368_v40 = vpack.c.bf16 %v2591_v42, %v2591_v42  ;;  %v2128_v33 = vpop.f32.mrb[104].mxu1 }
 0x275   :  { %v2448_v31 = vpop.f32.mrb[100].mxu0  ;;  %v2130_v19 = vpop.f32.mrb[105].mxu1  ;;  %v3725_v50 = vadd.f32 %v5089_v2, %v2128_v33 }
 0x276   :  { %2958 = vst.msk [vmem:[%s5610_s3 + $0xc4] sm:$0xf] %vm2908_vm2, %v3368_v40  ;;  %v3722_v7 = vadd.f32 %v3721_v43, %v2448_v31  ;;  %v3543_v52 = vpop.f32.mrb[101].mxu0  ;;  %v2131_v49 = vpop.f32.mrb[106].mxu1  ;;  %v5523_v40 = vld [vmem:[%s5609_s2] ss:$0 sm:$0xff] }
 0x277   :  { %v2451_v44 = vpop.f32.mrb[102].mxu0  ;;  %v2133_v36 = vpop.f32.mrb[107].mxu1  ;;  %v3727_v23 = vadd.f32 %v5089_v2, %v2131_v49 }
 0x278   :  { %v2592_v53 = vmax.f32 %v3722_v7, 0.0  ;;  %v3724_v56 = vadd.f32 %v3723_v47, %v2451_v44  ;;  %v3544_v57 = vpop.f32.mrb[103].mxu0 }
 0x27a   :  { %v3369_v61 = vpack.c.bf16 %v2592_v53, %v2592_v53  ;;  %v2593_v46 = vmax.f32 %v3724_v56, 0.0 }
 0x27c   :  { %2959 = vst.msk [vmem:[%s5610_s3 + $0xc8] sm:$0xf] %vm2908_vm2, %v3369_v61  ;;  %v3370_v11 = vpack.c.bf16 %v2593_v46, %v2593_v46  ;;  %v2136_v37 = vpop.f32.mrb[108].mxu1 }
 0x27d   :  { %v2456_v55 = vpop.f32.mrb[104].mxu0  ;;  %v2138_v63 = vpop.f32.mrb[109].mxu1  ;;  %v3729_v41 = vadd.f32 %v5089_v2, %v2136_v37 }
 0x27e   :  { %2960 = vst.msk [vmem:[%s5610_s3 + $0xcc] sm:$0xf] %vm2908_vm2, %v3370_v11  ;;  %v3726_v51 = vadd.f32 %v3725_v50, %v2456_v55  ;;  %v3547_v39 = vpop.f32.mrb[105].mxu0  ;;  %v2139_v54 = vpop.f32.mrb[110].mxu1 }
 0x27f   :  { %v2459_v0 = vpop.f32.mrb[106].mxu0  ;;  %v2141_v4 = vpop.f32.mrb[111].mxu1  ;;  %v3731_v1 = vadd.f32 %v5089_v2, %v2139_v54 }
 0x280   :  { %v2594_v5 = vmax.f32 %v3726_v51, 0.0  ;;  %v3728_v8 = vadd.f32 %v3727_v23, %v2459_v0  ;;  %v3548_v60 = vpop.f32.mrb[107].mxu0 }
 0x282   :  { %v3371_v9 = vpack.c.bf16 %v2594_v5, %v2594_v5  ;;  %v2595_v58 = vmax.f32 %v3728_v8, 0.0 }
 0x284   :  { %2961 = vst.msk [vmem:[%s5610_s3 + $0xd0] sm:$0xf] %vm2908_vm2, %v3371_v9  ;;  %v3372_v59 = vpack.c.bf16 %v2595_v58, %v2595_v58  ;;  %v2144_v20 = vpop.f32.mrb[112].mxu1 }
 0x285   :  { %v2464_v12 = vpop.f32.mrb[108].mxu0  ;;  %v2146_v14 = vpop.f32.mrb[113].mxu1  ;;  %v3733_v27 = vadd.f32 %v5089_v2, %v2144_v20 }
 0x286   :  { %2962 = vst.msk [vmem:[%s5610_s3 + $0xd4] sm:$0xf] %vm2908_vm2, %v3372_v59  ;;  %v3730_v26 = vadd.f32 %v3729_v41, %v2464_v12  ;;  %v3551_v15 = vpop.f32.mrb[109].mxu0  ;;  %v2147_v18 = vpop.f32.mrb[114].mxu1 }
 0x287   :  { %v2467_v21 = vpop.f32.mrb[110].mxu0  ;;  %v2149_v6 = vpop.f32.mrb[115].mxu1  ;;  %v3735_v32 = vadd.f32 %v5089_v2, %v2147_v18 }
 0x288   :  { %v2596_v13 = vmax.f32 %v3730_v26, 0.0  ;;  %v3732_v24 = vadd.f32 %v3731_v1, %v2467_v21  ;;  %v3552_v62 = vpop.f32.mrb[111].mxu0 }
 0x28a   :  { %v3373_v45 = vpack.c.bf16 %v2596_v13, %v2596_v13  ;;  %v2597_v25 = vmax.f32 %v3732_v24, 0.0 }
 0x28c   :  { %2963 = vst.msk [vmem:[%s5610_s3 + $0xd8] sm:$0xf] %vm2908_vm2, %v3373_v45  ;;  %v3374_v10 = vpack.c.bf16 %v2597_v25, %v2597_v25  ;;  %v2152_v29 = vpop.f32.mrb[116].mxu1 }
 0x28d   :  { %v2472_v28 = vpop.f32.mrb[112].mxu0  ;;  %v2154_v30 = vpop.f32.mrb[117].mxu1  ;;  %v3737_v2 = vadd.f32 %v5523_v40, %v2152_v29 }
 0x28e   :  { %2964 = vst.msk [vmem:[%s5610_s3 + $0xdc] sm:$0xf] %vm2908_vm2, %v3374_v10  ;;  %v3734_v17 = vadd.f32 %v3733_v27, %v2472_v28  ;;  %v3555_v16 = vpop.f32.mrb[113].mxu0  ;;  %v2155_v48 = vpop.f32.mrb[118].mxu1 }
 0x28f   :  { %v2475_v35 = vpop.f32.mrb[114].mxu0  ;;  %v2157_v34 = vpop.f32.mrb[119].mxu1  ;;  %v3739_v7 = vadd.f32 %v5523_v40, %v2155_v48 }
 0x290   :  { %v2598_v3 = vmax.f32 %v3734_v17, 0.0  ;;  %v3736_v38 = vadd.f32 %v3735_v32, %v2475_v35  ;;  %v3556_v22 = vpop.f32.mrb[115].mxu0 }
 0x292   :  { %v3375_v42 = vpack.c.bf16 %v2598_v3, %v2598_v3  ;;  %v2599_v43 = vmax.f32 %v3736_v38, 0.0 }
 0x294   :  { %2965 = vst.msk [vmem:[%s5610_s3 + $0xe0] sm:$0xf] %vm2908_vm2, %v3375_v42  ;;  %v3376_v33 = vpack.c.bf16 %v2599_v43, %v2599_v43  ;;  %v2160_v31 = vpop.f32.mrb[120].mxu1 }
 0x295   :  { %v2480_v19 = vpop.f32.mrb[116].mxu0  ;;  %v2162_v47 = vpop.f32.mrb[121].mxu1  ;;  %v3741_v11 = vadd.f32 %v5523_v40, %v2160_v31 }
 0x296   :  { %2966 = vst.msk [vmem:[%s5610_s3 + $0xe4] sm:$0xf] %vm2908_vm2, %v3376_v33  ;;  %v3738_v52 = vadd.f32 %v3737_v2, %v2480_v19  ;;  %v3559_v49 = vpop.f32.mrb[117].mxu0  ;;  %v2163_v44 = vpop.f32.mrb[122].mxu1 }
 0x297   :  { %v2483_v36 = vpop.f32.mrb[118].mxu0  ;;  %v2165_v53 = vpop.f32.mrb[123].mxu1  ;;  %v3743_v51 = vadd.f32 %v5523_v40, %v2163_v44 }
 0x298   :  { %v2600_v56 = vmax.f32 %v3738_v52, 0.0  ;;  %v3740_v57 = vadd.f32 %v3739_v7, %v2483_v36  ;;  %v3560_v61 = vpop.f32.mrb[119].mxu0 }
 0x29a   :  { %v3377_v46 = vpack.c.bf16 %v2600_v56, %v2600_v56  ;;  %v2601_v50 = vmax.f32 %v3740_v57, 0.0 }
 0x29c   :  { %2967 = vst.msk [vmem:[%s5610_s3 + $0xe8] sm:$0xf] %vm2908_vm2, %v3377_v46  ;;  %v3378_v37 = vpack.c.bf16 %v2601_v50, %v2601_v50  ;;  %v2168_v55 = vpop.f32.mrb[124].mxu1 }
 0x29d   :  { %v2488_v63 = vpop.f32.mrb[120].mxu0  ;;  %v2170_v23 = vpop.f32.mrb[125].mxu1  ;;  %v3745_v59 = vadd.f32 %v5523_v40, %v2168_v55 }
 0x29e   :  { %2968 = vst.msk [vmem:[%s5610_s3 + $0xec] sm:$0xf] %vm2908_vm2, %v3378_v37  ;;  %v3742_v39 = vadd.f32 %v3741_v11, %v2488_v63  ;;  %v3563_v54 = vpop.f32.mrb[121].mxu0  ;;  %v2171_v0 = vpop.f32.mrb[126].mxu1 }
 0x29f   :  { %v2491_v4 = vpop.f32.mrb[122].mxu0  ;;  %v2173_v5 = vpop.f32.mrb[127].mxu1  ;;  %v3747_v26 = vadd.f32 %v5523_v40, %v2171_v0 }
 0x2a0   :  { %v2602_v8 = vmax.f32 %v3742_v39, 0.0  ;;  %v3744_v60 = vadd.f32 %v3743_v51, %v2491_v4  ;;  %v3564_v9 = vpop.f32.mrb[123].mxu0 }
 0x2a2   :  { %v3379_v58 = vpack.c.bf16 %v2602_v8, %v2602_v8  ;;  %v2603_v41 = vmax.f32 %v3744_v60, 0.0 }
 0x2a4   :  { %2969 = vst.msk [vmem:[%s5610_s3 + $0xf0] sm:$0xf] %vm2908_vm2, %v3379_v58  ;;  %v3380_v20 = vpack.c.bf16 %v2603_v41, %v2603_v41  ;;  %v2176_v12 = vpop.f32.mrb[128].mxu1 }
 0x2a5   :  { %v2496_v14 = vpop.f32.mrb[124].mxu0  ;;  %v2178_v1 = vpop.f32.mrb[129].mxu1  ;;  %v3749_v10 = vadd.f32 %v5523_v40, %v2176_v12 }
 0x2a6   :  { %2970 = vst.msk [vmem:[%s5610_s3 + $0xf4] sm:$0xf] %vm2908_vm2, %v3380_v20  ;;  %v3746_v15 = vadd.f32 %v3745_v59, %v2496_v14  ;;  %v3567_v18 = vpop.f32.mrb[125].mxu0  ;;  %v2179_v21 = vpop.f32.mrb[130].mxu1 }
 0x2a7   :  { %v2499_v6 = vpop.f32.mrb[126].mxu0  ;;  %v2181_v13 = vpop.f32.mrb[131].mxu1  ;;  %v3751_v17 = vadd.f32 %v5523_v40, %v2179_v21 }
 0x2a8   :  { %v2604_v24 = vmax.f32 %v3746_v15, 0.0  ;;  %v3748_v62 = vadd.f32 %v3747_v26, %v2499_v6  ;;  %v3568_v45 = vpop.f32.mrb[127].mxu0 }
 0x2aa   :  { %v3381_v25 = vpack.c.bf16 %v2604_v24, %v2604_v24  ;;  %v2605_v27 = vmax.f32 %v3748_v62, 0.0 }
 0x2ac   :  { %2971 = vst.msk [vmem:[%s5610_s3 + $0xf8] sm:$0xf] %vm2908_vm2, %v3381_v25  ;;  %v3382_v29 = vpack.c.bf16 %v2605_v27, %v2605_v27  ;;  %v2184_v28 = vpop.f32.mrb[132].mxu1 }
 0x2ad   :  { %v2504_v30 = vpop.f32.mrb[128].mxu0  ;;  %v2186_v32 = vpop.f32.mrb[133].mxu1  ;;  %v3753_v33 = vadd.f32 %v5523_v40, %v2184_v28 }
 0x2ae   :  { %2972 = vst.msk [vmem:[%s5610_s3 + $0xfc] sm:$0xf] %vm2908_vm2, %v3382_v29  ;;  %v3750_v16 = vadd.f32 %v3749_v10, %v2504_v30  ;;  %v3571_v48 = vpop.f32.mrb[129].mxu0  ;;  %v2187_v35 = vpop.f32.mrb[134].mxu1 }
 0x2af   :  { %v2507_v34 = vpop.f32.mrb[130].mxu0  ;;  %v2189_v3 = vpop.f32.mrb[135].mxu1  ;;  %v3755_v52 = vadd.f32 %v5523_v40, %v2187_v35 }
 0x2b0   :  { %v2606_v38 = vmax.f32 %v3750_v16, 0.0  ;;  %v3752_v22 = vadd.f32 %v3751_v17, %v2507_v34  ;;  %v3572_v42 = vpop.f32.mrb[131].mxu0 }
 0x2b2   :  { %v3383_v43 = vpack.c.bf16 %v2606_v38, %v2606_v38  ;;  %v2607_v2 = vmax.f32 %v3752_v22, 0.0 }
 0x2b4   :  { %2973 = vst.msk [vmem:[%s5610_s3 + $0x100] sm:$0xf] %vm2908_vm2, %v3383_v43  ;;  %v3384_v31 = vpack.c.bf16 %v2607_v2, %v2607_v2  ;;  %v2192_v19 = vpop.f32.mrb[136].mxu1 }
 0x2b5   :  { %v2512_v47 = vpop.f32.mrb[132].mxu0  ;;  %v2194_v7 = vpop.f32.mrb[137].mxu1  ;;  %v3757_v37 = vadd.f32 %v5523_v40, %v2192_v19 }
 0x2b6   :  { %2974 = vst.msk [vmem:[%s5610_s3 + $0x104] sm:$0xf] %vm2908_vm2, %v3384_v31  ;;  %v3754_v49 = vadd.f32 %v3753_v33, %v2512_v47  ;;  %v3575_v44 = vpop.f32.mrb[133].mxu0  ;;  %v2195_v36 = vpop.f32.mrb[138].mxu1 }
 0x2b7   :  { %v2515_v53 = vpop.f32.mrb[134].mxu0  ;;  %v2197_v56 = vpop.f32.mrb[139].mxu1  ;;  %v3759_v39 = vadd.f32 %v5523_v40, %v2195_v36 }
 0x2b8   :  { %v2608_v57 = vmax.f32 %v3754_v49, 0.0  ;;  %v3756_v61 = vadd.f32 %v3755_v52, %v2515_v53  ;;  %v3576_v46 = vpop.f32.mrb[135].mxu0 }
 0x2ba   :  { %v3385_v50 = vpack.c.bf16 %v2608_v57, %v2608_v57  ;;  %v2609_v11 = vmax.f32 %v3756_v61, 0.0 }
 0x2bc   :  { %2975 = vst.msk [vmem:[%s5610_s3 + $0x108] sm:$0xf] %vm2908_vm2, %v3385_v50  ;;  %v3386_v55 = vpack.c.bf16 %v2609_v11, %v2609_v11  ;;  %v2200_v63 = vpop.f32.mrb[140].mxu1 }
 0x2bd   :  { %v2520_v23 = vpop.f32.mrb[136].mxu0  ;;  %v2202_v51 = vpop.f32.mrb[141].mxu1  ;;  %v3761_v20 = vadd.f32 %v5523_v40, %v2200_v63 }
 0x2be   :  { %2976 = vst.msk [vmem:[%s5610_s3 + $0x10c] sm:$0xf] %vm2908_vm2, %v3386_v55  ;;  %v3758_v54 = vadd.f32 %v3757_v37, %v2520_v23  ;;  %v3579_v0 = vpop.f32.mrb[137].mxu0  ;;  %v2203_v4 = vpop.f32.mrb[142].mxu1 }
 0x2bf   :  { %v2523_v5 = vpop.f32.mrb[138].mxu0  ;;  %v2205_v8 = vpop.f32.mrb[143].mxu1  ;;  %v3763_v15 = vadd.f32 %v5523_v40, %v2203_v4 }
 0x2c0   :  { %v2610_v60 = vmax.f32 %v3758_v54, 0.0  ;;  %v3760_v9 = vadd.f32 %v3759_v39, %v2523_v5  ;;  %v3580_v58 = vpop.f32.mrb[139].mxu0 }
 0x2c2   :  { %v3387_v41 = vpack.c.bf16 %v2610_v60, %v2610_v60  ;;  %v2611_v59 = vmax.f32 %v3760_v9, 0.0 }
 0x2c4   :  { %2977 = vst.msk [vmem:[%s5610_s3 + $0x110] sm:$0xf] %vm2908_vm2, %v3387_v41  ;;  %v3388_v12 = vpack.c.bf16 %v2611_v59, %v2611_v59  ;;  %v2208_v14 = vpop.f32.mrb[144].mxu1 }
 0x2c5   :  { %v2528_v1 = vpop.f32.mrb[140].mxu0  ;;  %v2210_v26 = vpop.f32.mrb[145].mxu1  ;;  %v3765_v29 = vadd.f32 %v5523_v40, %v2208_v14 }
 0x2c6   :  { %2978 = vst.msk [vmem:[%s5610_s3 + $0x114] sm:$0xf] %vm2908_vm2, %v3388_v12  ;;  %v3762_v18 = vadd.f32 %v3761_v20, %v2528_v1  ;;  %v3583_v21 = vpop.f32.mrb[141].mxu0  ;;  %v2211_v6 = vpop.f32.mrb[146].mxu1 }
 0x2c7   :  { %v2531_v13 = vpop.f32.mrb[142].mxu0  ;;  %v2212_v24 = vpop.f32.mrb[147].mxu1 }
 0x2c8   :  { %v2612_v62 = vmax.f32 %v3762_v18, 0.0  ;;  %v3764_v45 = vadd.f32 %v3763_v15, %v2531_v13  ;;  %v3584_v25 = vpop.f32.mrb[143].mxu0 }
 0x2ca   :  { %v3389_v27 = vpack.c.bf16 %v2612_v62, %v2612_v62  ;;  %v2613_v10 = vmax.f32 %v3764_v45, 0.0 }
 0x2cc   :  { %2979 = vst.msk [vmem:[%s5610_s3 + $0x118] sm:$0xf] %vm2908_vm2, %v3389_v27  ;;  %v3390_v28 = vpack.c.bf16 %v2613_v10, %v2613_v10 }
 0x2cd   :  { %v2536_v30 = vpop.f32.mrb[144].mxu0 }
 0x2ce   :  { %2980 = vst.msk [vmem:[%s5610_s3 + $0x11c] sm:$0xf] %vm2908_vm2, %v3390_v28  ;;  %v3766_v32 = vadd.f32 %v3765_v29, %v2536_v30  ;;  %v3587_v17 = vpop.f32.mrb[145].mxu0 }
 0x2cf   :  { %v2539_v16 = vpop.f32.mrb[146].mxu0 }
 0x2d0   :  { %v2614_v48 = vmax.f32 %v3766_v32, 0.0  ;;  %v3588_v35 = vpop.f32.mrb[147].mxu0 }
 0x2d2   :  { %v3391_v34 = vpack.c.bf16 %v2614_v48, %v2614_v48 }
 0x2d4   :  { %2982 = vst.msk [vmem:[%s5610_s3 + $0x120] sm:$0x1] %vm2981_vm3, %v3391_v34 }

// kernel: forward.7
= control target key start
LH: loop header
LB: loop body
LE: loop exit
PB: predicated region body
PF: predicated region fallthrough
CT: control target
= control target key end

     0   :  { %vm798_vm0 = vcmask 785408   ;;  %s2228_s1 = inlined_call_operand.vmem [shape: bf16[864,96], index: 1, kind: input, shape index: {}]   ;;  %s2229_s0 = inlined_call_operand.vmem [shape: bf16[128,864], index: 0, kind: input, shape index: {}]   ;;  %s2230_s2 = inlined_call_operand.vmem [shape: f32[1,96], index: 2, kind: input, shape index: {}]   ;;  %s2231_s3 = inlined_call_operand.vmem [shape: f32[128,96], index: 3, kind: output, shape index: {}]  }
   0x1   :  { %v1600_v0 = vld [vmem:[%s2228_s1 + $0x40] sm:$0xff]   ;;  %v1604_v4 = vld [vmem:[%s2228_s1 + $0x48] sm:$0xff]   ;;  %v1608_v8 = vld [vmem:[%s2228_s1 + $0x50] sm:$0xff]  }
   0x2   :  { %v1601_v1 = vld [vmem:[%s2228_s1] sm:$0xff]   ;;  %1366 = vmatprep.subr.bf16.mxu0 %v1600_v0  ;;  %v1605_v5 = vld [vmem:[%s2228_s1 + $0x8] sm:$0xff]   ;;  %v1609_v9 = vld [vmem:[%s2228_s1 + $0x10] sm:$0xff]  }
   0x3   :  { %v1602_v2 = vld [vmem:[%s2228_s1 + $0xc0] sm:$0xff]   ;;  %1367 = vmatpush3.bf16.msra.mxu0 %v1601_v1  ;;  %v1606_v6 = vld [vmem:[%s2228_s1 + $0xc8] sm:$0xff]   ;;  %v1610_v10 = vld [vmem:[%s2228_s1 + $0xd0] sm:$0xff]  }
   0x4   :  { %v1603_v3 = vld [vmem:[%s2228_s1 + $0x80] sm:$0xff]   ;;  %1430 = vmatprep.subr.bf16.mxu1 %v1602_v2  ;;  %1368 = vmatprep.subr.bf16.mxu0 %v1604_v4  ;;  %v1607_v7 = vld [vmem:[%s2228_s1 + $0x88] sm:$0xff]   ;;  %v1611_v11 = vld [vmem:[%s2228_s1 + $0x90] sm:$0xff]  }
   0x5   :  { %1431 = vmatpush3.bf16.msra.mxu1 %v1603_v3  ;;  %v1612_v12 = vld [vmem:[%s2228_s1 + $0x58] sm:$0xff]   ;;  %v1616_v16 = vld [vmem:[%s2228_s1 + $0x60] sm:$0xff]   ;;  %v1620_v20 = vld [vmem:[%s2228_s1 + $0x68] sm:$0xff]  }
   0x6   :  { %1432 = vmatprep.subr.bf16.mxu1 %v1606_v6  ;;  %v1613_v13 = vld [vmem:[%s2228_s1 + $0x18] sm:$0xff]   ;;  %v1617_v17 = vld [vmem:[%s2228_s1 + $0x20] sm:$0xff]   ;;  %v1621_v21 = vld [vmem:[%s2228_s1 + $0x28] sm:$0xff]  }
   0x7   :  { %1369 = vmatpush3.bf16.msra.mxu0 %v1605_v5  ;;  %v1614_v14 = vld [vmem:[%s2228_s1 + $0xd8] sm:$0xff]   ;;  %v1618_v18 = vld [vmem:[%s2228_s1 + $0xe0] sm:$0xff]   ;;  %v1622_v22 = vld [vmem:[%s2228_s1 + $0xe8] sm:$0xff]  }
   0x8   :  { %1370 = vmatprep.subr.bf16.mxu0 %v1608_v8  ;;  %v1615_v15 = vld [vmem:[%s2228_s1 + $0x98] sm:$0xff]   ;;  %v1619_v19 = vld [vmem:[%s2228_s1 + $0xa0] sm:$0xff]   ;;  %v1623_v23 = vld [vmem:[%s2228_s1 + $0xa8] sm:$0xff]  }
   0x9   :  { %1433 = vmatpush3.bf16.msra.mxu1 %v1607_v7  ;;  %v1624_v24 = vld [vmem:[%s2228_s1 + $0x70] sm:$0xff]   ;;  %v1628_v28 = vld [vmem:[%s2228_s1 + $0x78] sm:$0xff]   ;;  %v1633_v32 = vld [vmem:[%s2229_s0 + $0x4] ss:$28 sps:$4 sm:$0xff]  }
   0xa   :  { %1434 = vmatprep.subr.bf16.mxu1 %v1610_v10  ;;  %v1625_v25 = vld [vmem:[%s2228_s1 + $0x30] sm:$0xff]   ;;  %v1629_v29 = vld [vmem:[%s2228_s1 + $0x38] sm:$0xff]   ;;  %855 = vmatprep.mubr.bf16.mxu0 %v1633_v32  ;;  %v1635_v34 = vld [vmem:[%s2228_s1 + $0x140] sm:$0xff]  }
   0xb   :  { %1371 = vmatpush3.bf16.msra.mxu0 %v1609_v9  ;;  %v1626_v26 = vld [vmem:[%s2228_s1 + $0xf0] sm:$0xff]   ;;  %v1630_v30 = vld [vmem:[%s2228_s1 + $0xf8] sm:$0xff]   ;;  %v1636_v35 = vld [vmem:[%s2229_s0 + $0x8] ss:$28 sps:$4 sm:$0xff]  }
   0xc   :  { %1372 = vmatprep.subr.bf16.mxu0 %v1612_v12  ;;  %v1627_v27 = vld [vmem:[%s2228_s1 + $0xb0] sm:$0xff]   ;;  %v1631_v31 = vld [vmem:[%s2229_s0] ss:$28 sps:$4 sm:$0xff]   ;;  %v1638_v36 = vld [vmem:[%s2229_s0 + $0xc] ss:$28 sps:$4 sm:$0xff]  }
   0xd   :  { %1435 = vmatpush3.bf16.msra.mxu1 %v1611_v11  ;;  %v1634_v33 = vld [vmem:[%s2228_s1 + $0xb8] sm:$0xff]   ;;  %v1639_v37 = vld [vmem:[%s2228_s1 + $0x100] sm:$0xff]   ;;  %952 = vmatprep.mubr.bf16.mxu1 %v1638_v36  ;;  %v1643_v40 = vld [vmem:[%s2228_s1 + $0x148] sm:$0xff]  }
   0xe   :  { %1436 = vmatprep.subr.bf16.mxu1 %v1614_v14  ;;  %v1640_v38 = vld [vmem:[%s2229_s0 + $0x3c] ss:$28 sps:$4 sm:$0xff]   ;;  %v1644_v41 = vld [vmem:[%s2229_s0 + $0x44] ss:$28 sps:$4 sm:$0xff]   ;;  %v1646_v42 = vld [vmem:[%s2228_s1 + $0x108] sm:$0xff]  }
   0xf   :  { %1373 = vmatpush3.bf16.msra.mxu0 %v1613_v13  ;;  %v1642_v39 = vld [vmem:[%s2229_s0 + $0x38] ss:$28 sps:$4 sm:$0xff]   ;;  %v1647_v43 = vld [vmem:[%s2229_s0 + $0x40] ss:$28 sps:$4 sm:$0xff]   ;;  %v1650_v48 = vld [vmem:[%s2229_s0 + $0x70] ss:$28 sps:$4 sm:$0xff]  }
  0x10   :  { %1374 = vmatprep.subr.bf16.mxu0 %v1616_v16  ;;  %v1648_v44 = vld [vmem:[%s2229_s0 + $0x74] ss:$28 sps:$4 sm:$0xff]   ;;  %v1652_v46 = vld [vmem:[%s2229_s0 + $0x7c] ss:$28 sps:$4 sm:$0xff]   ;;  %v1656_v49 = vld [vmem:[%s2229_s0 + $0xac] ss:$28 sps:$4 sm:$0xff]  }
  0x11   :  { %1437 = vmatpush3.bf16.msra.mxu1 %v1615_v15  ;;  %v1651_v45 = vld [vmem:[%s2228_s1 + $0x150] sm:$0xff]   ;;  %v1659_v50 = vld [vmem:[%s2228_s1 + $0x158] sm:$0xff]   ;;  %v1667_v54 = vld [vmem:[%s2228_s1 + $0x160] sm:$0xff]  }
  0x12   :  { %1438 = vmatprep.subr.bf16.mxu1 %v1618_v18  ;;  %v1654_v47 = vld [vmem:[%s2228_s1 + $0x110] sm:$0xff]   ;;  %v1662_v52 = vld [vmem:[%s2228_s1 + $0x118] sm:$0xff]   ;;  %v1658_v55 = vld [vmem:[%s2229_s0 + $0xa8] ss:$28 sps:$4 sm:$0xff]  }
  0x13   :  { %1375 = vmatpush3.bf16.msra.mxu0 %v1617_v17  ;;  %v1655_v51 = vld [vmem:[%s2229_s0 + $0x78] ss:$28 sps:$4 sm:$0xff]   ;;  %v1670_v56 = vld [vmem:[%s2228_s1 + $0x120] sm:$0xff]   ;;  %v1663_v59 = vld [vmem:[%s2229_s0 + $0xb0] ss:$28 sps:$4 sm:$0xff]  }
  0x14   :  { %1376 = vmatprep.subr.bf16.mxu0 %v1620_v20  ;;  %v1660_v53 = vld [vmem:[%s2229_s0 + $0xb4] ss:$28 sps:$4 sm:$0xff]   ;;  %v1664_v57 = vld [vmem:[%s2229_s0 + $0xe4] ss:$28 sps:$4 sm:$0xff]   ;;  %v1676_v60 = vld [vmem:[%s2228_s1 + $0x168] sm:$0xff]  }
  0x15   :  { %1439 = vmatpush3.bf16.msra.mxu1 %v1619_v19  ;;  %v1672_v58 = vld [vmem:[%s2228_s1 + $0x180] sm:$0xff]   ;;  %v1668_v61 = vld [vmem:[%s2229_s0 + $0xec] ss:$28 sps:$4 sm:$0xff]   ;;  %v1673_v1 = vld [vmem:[%s2229_s0 + $0x11c] ss:$28 sps:$4 sm:$0xff]  }
  0x16   :  { %1440 = vmatprep.subr.bf16.mxu1 %v1622_v22  ;;  %v1679_v62 = vld [vmem:[%s2228_s1 + $0x128] sm:$0xff]   ;;  %v1666_v63 = vld [vmem:[%s2229_s0 + $0xe0] ss:$28 sps:$4 sm:$0xff]   ;;  %v1685_v2 = vld [vmem:[%s2228_s1 + $0x170] sm:$0xff]  }
  0x17   :  { %1377 = vmatpush3.bf16.msra.mxu0 %v1621_v21  ;;  %v1683_v0 = vld [vmem:[%s2228_s1 + $0x188] sm:$0xff]   ;;  %v1677_v4 = vld [vmem:[%s2229_s0 + $0x124] ss:$28 sps:$4 sm:$0xff]   ;;  %v1688_v5 = vld [vmem:[%s2228_s1 + $0x130] sm:$0xff]  }
  0x18   :  { %1378 = vmatprep.subr.bf16.mxu0 %v1624_v24  ;;  %v1671_v3 = vld [vmem:[%s2229_s0 + $0xe8] ss:$28 sps:$4 sm:$0xff]   ;;  %v1690_v6 = vld [vmem:[%s2228_s1 + $0x190] sm:$0xff]   ;;  %v1694_v8 = vld [vmem:[%s2228_s1 + $0x178] sm:$0xff]  }
  0x19   :  { %1441 = vmatpush3.bf16.msra.mxu1 %v1623_v23  ;;  %v1675_v7 = vld [vmem:[%s2229_s0 + $0x118] ss:$28 sps:$4 sm:$0xff]   ;;  %v1680_v12 = vld [vmem:[%s2229_s0 + $0x120] ss:$28 sps:$4 sm:$0xff]   ;;  %v1704_v15 = vld [vmem:[%s2228_s1 + $0x1a8] sm:$0xff]  }
  0x1a   :  { %1442 = vmatprep.subr.bf16.mxu1 %v1626_v26  ;;  %v1695_v9 = vld [vmem:[%s2228_s1 + $0x198] sm:$0xff]   ;;  %v1681_v10 = vld [vmem:[%s2229_s0 + $0x154] ss:$28 sps:$4 sm:$0xff]   ;;  %v1700_v13 = vld [vmem:[%s2228_s1 + $0x1a0] sm:$0xff]  }
  0x1b   :  { %1379 = vmatpush3.bf16.msra.mxu0 %v1625_v25  ;;  %v1698_v11 = vld [vmem:[%s2228_s1 + $0x138] sm:$0xff]   ;;  %v1684_v16 = vld [vmem:[%s2229_s0 + $0x150] ss:$28 sps:$4 sm:$0xff]   ;;  %v1693_v20 = vld [vmem:[%s2229_s0 + $0x188] ss:$28 sps:$4 sm:$0xff]  }
  0x1c   :  { %1380 = vmatprep.subr.bf16.mxu0 %v1628_v28  ;;  %v1686_v14 = vld [vmem:[%s2229_s0 + $0x15c] ss:$28 sps:$4 sm:$0xff]   ;;  %v1691_v17 = vld [vmem:[%s2229_s0 + $0x18c] ss:$28 sps:$4 sm:$0xff]   ;;  %v1696_v19 = vld [vmem:[%s2229_s0 + $0x194] ss:$28 sps:$4 sm:$0xff]  }
  0x1d   :  { %1443 = vmatpush3.bf16.msra.mxu1 %v1627_v27  ;;  %v1689_v18 = vld [vmem:[%s2229_s0 + $0x158] ss:$28 sps:$4 sm:$0xff]   ;;  %v1699_v22 = vld [vmem:[%s2229_s0 + $0x190] ss:$28 sps:$4 sm:$0xff]   ;;  %v1713_v27 = vld [vmem:[%s2229_s0 + $0x88] ss:$28 sps:$4 sm:$0xff]  }
  0x1e   :  { %1444 = vmatprep.subr.bf16.mxu1 %v1630_v30  ;;  %v1703_v21 = vld [vmem:[%s2229_s0 + $0x14] ss:$28 sps:$4 sm:$0xff]   ;;  %v1707_v25 = vld [vmem:[%s2229_s0 + $0x4c] ss:$28 sps:$4 sm:$0xff]   ;;  %v1714_v30 = vld [vmem:[%s2229_s0 + $0xc0] ss:$28 sps:$4 sm:$0xff]  }
  0x1f   :  { %1381 = vmatpush3.bf16.msra.mxu0 %v1629_v29  ;;  %v1705_v23 = vld [vmem:[%s2229_s0 + $0x18] ss:$28 sps:$4 sm:$0xff]   ;;  %v1701_v24 = vld [vmem:[%s2229_s0 + $0x10] ss:$28 sps:$4 sm:$0xff]   ;;  %v1709_v28 = vld [vmem:[%s2229_s0 + $0x48] ss:$28 sps:$4 sm:$0xff]  }
  0x20   :  { %1494 = vmatprep.subr.bf16.mxu0 %v1635_v34  ;;  %v1706_v26 = vld [vmem:[%s2229_s0 + $0x50] ss:$28 sps:$4 sm:$0xff]   ;;  %v1710_v29 = vld [vmem:[%s2229_s0 + $0x84] ss:$28 sps:$4 sm:$0xff]   ;;  %v1717_v36 = vld [vmem:[%s2229_s0 + $0xb8] ss:$28 sps:$4 sm:$0xff]  }
  0x21   :  { %1445 = vmatpush3.bf16.msra.mxu1 %v1634_v33  ;;  %v1712_v32 = vld [vmem:[%s2229_s0 + $0x80] ss:$28 sps:$4 sm:$0xff]   ;;  %v1722_v34 = vld [vmem:[%s2229_s0 + $0x130] ss:$28 sps:$4 sm:$0xff]  }
  0x22   :  { %856 = vmatmul.mubr.bf16.vlgmr.msra.gmra.mrb[0].mxu0 %v1631_v31  ;;  %1572 = vmatprep.subr.bf16.mxu1 %v1672_v58  ;;  %v1721_v31 = vld [vmem:[%s2229_s0 + $0xf8] ss:$28 sps:$4 sm:$0xff]  }
  0x23   :  { %1495 = vmatpush3.bf16.msra.mxu0 %v1639_v37  ;;  %863 = vmatprep.mubr.bf16.mxu0 %v1640_v38  ;;  %v1715_v33 = vld [vmem:[%s2229_s0 + $0xbc] ss:$28 sps:$4 sm:$0xff]   ;;  %v1718_v37 = vld [vmem:[%s2229_s0 + $0xf4] ss:$28 sps:$4 sm:$0xff]  }
  0x24   :  { %953 = vmatmul.mubr.bf16.vlgmr.msra.gmra.mrb[0].mxu1 %v1636_v35  ;;  %1496 = vmatprep.subr.bf16.mxu0 %v1643_v40  ;;  %v1729_v35 = vld [vmem:[%s2229_s0 + $0x168] ss:$28 sps:$4 sm:$0xff]   ;;  %v1730_v38 = vld [vmem:[%s2229_s0 + $0x1a0] ss:$28 sps:$4 sm:$0xff]  }
  0x25   :  { %960 = vmatprep.mubr.bf16.mxu1 %v1644_v41  ;;  %1573 = vmatpush3.bf16.msra.mxu1 %v1672_v58  ;;  %v1723_v40 = vld [vmem:[%s2229_s0 + $0x12c] ss:$28 sps:$4 sm:$0xff]  }
  0x26   :  { %1574 = vmatprep.subr.bf16.mxu1 %v1683_v0  ;;  %v1725_v41 = vld [vmem:[%s2229_s0 + $0x128] ss:$28 sps:$4 sm:$0xff]  }
  0x27   :  { %1497 = vmatpush3.bf16.msra.mxu0 %v1646_v42  ;;  %v1726_v42 = vld [vmem:[%s2229_s0 + $0x164] ss:$28 sps:$4 sm:$0xff]  }
  0x28   :  { %1498 = vmatprep.subr.bf16.mxu0 %v1651_v45  ;;  %v1733_v45 = vld [vmem:[%s2229_s0 + $0x198] ss:$28 sps:$4 sm:$0xff]  }
  0x29   :  { %1575 = vmatpush3.bf16.msra.mxu1 %v1683_v0 }
  0x2a   :  { %864 = vmatmul.mubr.bf16.gmra.mrb[4].mxu0 %v1642_v39  ;;  %1576 = vmatprep.subr.bf16.mxu1 %v1690_v6  ;;  %v1720_v39 = vld [vmem:[%s2229_s0 + $0xf0] ss:$28 sps:$4 sm:$0xff]  }
  0x2b   :  { %871 = vmatprep.mubr.bf16.mxu0 %v1648_v44  ;;  %1499 = vmatpush3.bf16.msra.mxu0 %v1654_v47  ;;  %v1731_v44 = vld [vmem:[%s2229_s0 + $0x19c] ss:$28 sps:$4 sm:$0xff]   ;;  %v2095_v47 = vld [vmem:[%s2230_s2] ss:$0 sm:$0xff] }
  0x2c   :  { %961 = vmatmul.mubr.bf16.gmra.mrb[4].mxu1 %v1647_v43  ;;  %1500 = vmatprep.subr.bf16.mxu0 %v1659_v50  ;;  %v1728_v43 = vld [vmem:[%s2229_s0 + $0x160] ss:$28 sps:$4 sm:$0xff]  }
  0x2d   :  { %968 = vmatprep.mubr.bf16.mxu1 %v1652_v46  ;;  %1577 = vmatpush3.bf16.msra.mxu1 %v1690_v6 }
  0x2e   :  { %1578 = vmatprep.subr.bf16.mxu1 %v1695_v9 }
  0x2f   :  { %1501 = vmatpush3.bf16.msra.mxu0 %v1662_v52 }
  0x30   :  { %1502 = vmatprep.subr.bf16.mxu0 %v1667_v54 }
  0x31   :  { %1579 = vmatpush3.bf16.msra.mxu1 %v1695_v9 }
  0x32   :  { %872 = vmatmul.mubr.bf16.gmra.mrb[8].mxu0 %v1650_v48  ;;  %1580 = vmatprep.subr.bf16.mxu1 %v1700_v13 }
  0x33   :  { %879 = vmatprep.mubr.bf16.mxu0 %v1656_v49  ;;  %1503 = vmatpush3.bf16.msra.mxu0 %v1670_v56 }
  0x34   :  { %969 = vmatmul.mubr.bf16.gmra.mrb[8].mxu1 %v1655_v51  ;;  %1504 = vmatprep.subr.bf16.mxu0 %v1676_v60 }
  0x35   :  { %976 = vmatprep.mubr.bf16.mxu1 %v1660_v53  ;;  %1581 = vmatpush3.bf16.msra.mxu1 %v1700_v13 }
  0x36   :  { %1582 = vmatprep.subr.bf16.mxu1 %v1704_v15 }
  0x37   :  { %1505 = vmatpush3.bf16.msra.mxu0 %v1679_v62 }
  0x38   :  { %1506 = vmatprep.subr.bf16.mxu0 %v1685_v2 }
  0x39   :  { %1583 = vmatpush3.bf16.msra.mxu1 %v1704_v15 }
  0x3a   :  { %880 = vmatmul.mubr.bf16.gmra.mrb[12].mxu0 %v1658_v55 }
  0x3b   :  { %887 = vmatprep.mubr.bf16.mxu0 %v1664_v57  ;;  %1507 = vmatpush3.bf16.msra.mxu0 %v1688_v5 }
  0x3c   :  { %977 = vmatmul.mubr.bf16.gmra.mrb[12].mxu1 %v1663_v59  ;;  %1508 = vmatprep.subr.bf16.mxu0 %v1694_v8 }
  0x3d   :  { %984 = vmatprep.mubr.bf16.mxu1 %v1668_v61 }
  0x3f   :  { %1509 = vmatpush3.bf16.msra.mxu0 %v1698_v11 }
  0x42   :  { %888 = vmatmul.mubr.bf16.gmra.mrb[16].mxu0 %v1666_v63 }
  0x43   :  { %895 = vmatprep.mubr.bf16.mxu0 %v1673_v1 }
  0x44   :  { %985 = vmatmul.mubr.bf16.gmra.mrb[16].mxu1 %v1671_v3 }
  0x45   :  { %992 = vmatprep.mubr.bf16.mxu1 %v1677_v4 }
  0x4a   :  { %896 = vmatmul.mubr.bf16.gmra.mrb[20].mxu0 %v1675_v7 }
  0x4b   :  { %903 = vmatprep.mubr.bf16.mxu0 %v1681_v10 }
  0x4c   :  { %993 = vmatmul.mubr.bf16.gmra.mrb[20].mxu1 %v1680_v12 }
  0x4d   :  { %1000 = vmatprep.mubr.bf16.mxu1 %v1686_v14 }
  0x52   :  { %904 = vmatmul.mubr.bf16.gmra.mrb[24].mxu0 %v1684_v16 }
  0x53   :  { %911 = vmatprep.mubr.bf16.mxu0 %v1691_v17 }
  0x54   :  { %1001 = vmatmul.mubr.bf16.gmra.mrb[24].mxu1 %v1689_v18 }
  0x55   :  { %1008 = vmatprep.mubr.bf16.mxu1 %v1696_v19 }
  0x5a   :  { %912 = vmatmul.mubr.bf16.gmra.mrb[28].mxu0 %v1693_v20 }
  0x5b   :  { %1049 = vmatprep.mubr.bf16.mxu0 %v1703_v21 }
  0x5c   :  { %1009 = vmatmul.mubr.bf16.gmra.mrb[28].mxu1 %v1699_v22 }
  0x5d   :  { %1584 = vmatprep.mubr.msk.bf16.mxu1 %vm798_vm0, %v1705_v23 }
  0x62   :  { %1050 = vmatmul.mubr.bf16.vlgmr.msra.gmra.mrb[32].mxu0 %v1701_v24 }
  0x63   :  { %1057 = vmatprep.mubr.bf16.mxu0 %v1707_v25 }
  0x64   :  { %1585 = vmatmul.mubr.msk.bf16.vlgmr.msra.gmra.mrb[32].mxu1 %vm798_vm0, %v1706_v26 }
  0x65   :  { %1588 = vmatprep.mubr.msk.bf16.mxu1 %vm798_vm0, %v1713_v27 }
  0x6a   :  { %1058 = vmatmul.mubr.bf16.gmra.mrb[36].mxu0 %v1709_v28 }
  0x6b   :  { %1065 = vmatprep.mubr.bf16.mxu0 %v1710_v29 }
  0x6c   :  { %1589 = vmatmul.mubr.msk.bf16.gmra.mrb[36].mxu1 %vm798_vm0, %v1714_v30 }
  0x6d   :  { %1592 = vmatprep.mubr.msk.bf16.mxu1 %vm798_vm0, %v1721_v31 }
  0x72   :  { %1066 = vmatmul.mubr.bf16.gmra.mrb[40].mxu0 %v1712_v32 }
  0x73   :  { %1073 = vmatprep.mubr.bf16.mxu0 %v1715_v33 }
  0x74   :  { %1593 = vmatmul.mubr.msk.bf16.gmra.mrb[40].mxu1 %vm798_vm0, %v1722_v34 }
  0x75   :  { %1596 = vmatprep.mubr.msk.bf16.mxu1 %vm798_vm0, %v1729_v35 }
  0x7a   :  { %1074 = vmatmul.mubr.bf16.gmra.mrb[44].mxu0 %v1717_v36 }
  0x7b   :  { %1081 = vmatprep.mubr.bf16.mxu0 %v1718_v37 }
  0x7c   :  { %1597 = vmatmul.mubr.msk.bf16.gmra.mrb[44].mxu1 %vm798_vm0, %v1730_v38 }
  0x82   :  { %1082 = vmatmul.mubr.bf16.gmra.mrb[48].mxu0 %v1720_v39 }
  0x83   :  { %1089 = vmatprep.mubr.bf16.mxu0 %v1723_v40 }
  0x8a   :  { %1090 = vmatmul.mubr.bf16.gmra.mrb[52].mxu0 %v1725_v41 }
  0x8b   :  { %1097 = vmatprep.mubr.bf16.mxu0 %v1726_v42 }
  0x92   :  { %1098 = vmatmul.mubr.bf16.gmra.mrb[56].mxu0 %v1728_v43 }
  0x93   :  { %1105 = vmatprep.mubr.bf16.mxu0 %v1731_v44 }
  0x9a   :  { %1106 = vmatmul.mubr.bf16.gmra.mrb[60].mxu0 %v1733_v45 }
  0xf5   :  { %v1382_v46 = vpop.f32.mrb[0].mxu0 }
  0xf6   :  { %v1383_v48 = vpop.f32.mrb[1].mxu0 }
  0xf7   :  { %v1384_v49 = vadd.f32 %v1383_v48, %v1382_v46  ;;  %v1385_v50 = vpop.f32.mrb[2].mxu0  ;;  %v1446_v51 = vpop.f32.mrb[0].mxu1 }
  0xf8   :  { %v1386_v52 = vpop.f32.mrb[3].mxu0  ;;  %v1447_v55 = vpop.f32.mrb[1].mxu1 }
  0xf9   :  { %v858_v53 = vadd.f32 %v1384_v49, %v2095_v47  ;;  %v1387_v54 = vadd.f32 %v1386_v52, %v1385_v50  ;;  %v1448_v56 = vadd.f32 %v1447_v55, %v1446_v51  ;;  %v1449_v57 = vpop.f32.mrb[2].mxu1 }
  0xfa   :  { %v1450_v59 = vpop.f32.mrb[3].mxu1 }
  0xfb   :  { %v861_v58 = vadd.f32 %v1387_v54, %v2095_v47  ;;  %v2099_v60 = vadd.f32 %v1448_v56, %v858_v53  ;;  %v1451_v61 = vadd.f32 %v1450_v59, %v1449_v57 }
  0xfd   :  { %v1388_v62 = vpop.f32.mrb[4].mxu0  ;;  %v2101_v63 = vadd.f32 %v1451_v61, %v861_v58 }
  0xfe   :  { %v1389_v0 = vpop.f32.mrb[5].mxu0 }
  0xff   :  { %v1390_v1 = vadd.f32 %v1389_v0, %v1388_v62  ;;  %v1391_v2 = vpop.f32.mrb[6].mxu0  ;;  %v1452_v3 = vpop.f32.mrb[4].mxu1 }
 0x100   :  { %v1392_v4 = vpop.f32.mrb[7].mxu0  ;;  %v1453_v7 = vpop.f32.mrb[5].mxu1 }
 0x101   :  { %v866_v5 = vadd.f32 %v1390_v1, %v2095_v47  ;;  %v1393_v6 = vadd.f32 %v1392_v4, %v1391_v2  ;;  %v1454_v8 = vadd.f32 %v1453_v7, %v1452_v3  ;;  %v1455_v9 = vpop.f32.mrb[6].mxu1 }
 0x102   :  { %v1456_v11 = vpop.f32.mrb[7].mxu1 }
 0x103   :  { %v869_v10 = vadd.f32 %v1393_v6, %v2095_v47  ;;  %v2105_v12 = vadd.f32 %v1454_v8, %v866_v5  ;;  %v1457_v13 = vadd.f32 %v1456_v11, %v1455_v9 }
 0x105   :  { %v1394_v14 = vpop.f32.mrb[8].mxu0  ;;  %v2107_v15 = vadd.f32 %v1457_v13, %v869_v10 }
 0x106   :  { %v1395_v16 = vpop.f32.mrb[9].mxu0 }
 0x107   :  { %v1396_v17 = vadd.f32 %v1395_v16, %v1394_v14  ;;  %v1397_v18 = vpop.f32.mrb[10].mxu0  ;;  %v1458_v19 = vpop.f32.mrb[8].mxu1 }
 0x108   :  { %v1398_v20 = vpop.f32.mrb[11].mxu0  ;;  %v1459_v23 = vpop.f32.mrb[9].mxu1 }
 0x109   :  { %v874_v21 = vadd.f32 %v1396_v17, %v2095_v47  ;;  %v1399_v22 = vadd.f32 %v1398_v20, %v1397_v18  ;;  %v1460_v24 = vadd.f32 %v1459_v23, %v1458_v19  ;;  %v1461_v25 = vpop.f32.mrb[10].mxu1 }
 0x10a   :  { %v1462_v27 = vpop.f32.mrb[11].mxu1 }
 0x10b   :  { %v877_v26 = vadd.f32 %v1399_v22, %v2095_v47  ;;  %v2111_v28 = vadd.f32 %v1460_v24, %v874_v21  ;;  %v1463_v29 = vadd.f32 %v1462_v27, %v1461_v25 }
 0x10d   :  { %v1400_v30 = vpop.f32.mrb[12].mxu0  ;;  %v2113_v31 = vadd.f32 %v1463_v29, %v877_v26 }
 0x10e   :  { %v1401_v32 = vpop.f32.mrb[13].mxu0 }
 0x10f   :  { %v1402_v33 = vadd.f32 %v1401_v32, %v1400_v30  ;;  %v1403_v34 = vpop.f32.mrb[14].mxu0  ;;  %v1464_v35 = vpop.f32.mrb[12].mxu1 }
 0x110   :  { %v1404_v36 = vpop.f32.mrb[15].mxu0  ;;  %v1465_v39 = vpop.f32.mrb[13].mxu1 }
 0x111   :  { %v882_v37 = vadd.f32 %v1402_v33, %v2095_v47  ;;  %v1405_v38 = vadd.f32 %v1404_v36, %v1403_v34  ;;  %v1466_v40 = vadd.f32 %v1465_v39, %v1464_v35  ;;  %v1467_v41 = vpop.f32.mrb[14].mxu1 }
 0x112   :  { %v1468_v43 = vpop.f32.mrb[15].mxu1 }
 0x113   :  { %v885_v42 = vadd.f32 %v1405_v38, %v2095_v47  ;;  %v2117_v44 = vadd.f32 %v1466_v40, %v882_v37  ;;  %v1469_v45 = vadd.f32 %v1468_v43, %v1467_v41 }
 0x115   :  { %v1406_v46 = vpop.f32.mrb[16].mxu0  ;;  %v2119_v48 = vadd.f32 %v1469_v45, %v885_v42 }
 0x116   :  { %v1407_v49 = vpop.f32.mrb[17].mxu0 }
 0x117   :  { %v1408_v50 = vadd.f32 %v1407_v49, %v1406_v46  ;;  %v1409_v51 = vpop.f32.mrb[18].mxu0  ;;  %v1470_v52 = vpop.f32.mrb[16].mxu1 }
 0x118   :  { %v1410_v53 = vpop.f32.mrb[19].mxu0  ;;  %v1471_v56 = vpop.f32.mrb[17].mxu1 }
 0x119   :  { %v890_v54 = vadd.f32 %v1408_v50, %v2095_v47  ;;  %v1411_v55 = vadd.f32 %v1410_v53, %v1409_v51  ;;  %v1472_v57 = vadd.f32 %v1471_v56, %v1470_v52  ;;  %v1473_v58 = vpop.f32.mrb[18].mxu1 }
 0x11a   :  { %v1474_v61 = vpop.f32.mrb[19].mxu1 }
 0x11b   :  { %v893_v59 = vadd.f32 %v1411_v55, %v2095_v47  ;;  %v2123_v62 = vadd.f32 %v1472_v57, %v890_v54  ;;  %v1475_v0 = vadd.f32 %v1474_v61, %v1473_v58 }
 0x11d   :  { %v1412_v1 = vpop.f32.mrb[20].mxu0  ;;  %v2125_v2 = vadd.f32 %v1475_v0, %v893_v59 }
 0x11e   :  { %v1413_v3 = vpop.f32.mrb[21].mxu0 }
 0x11f   :  { %v1414_v4 = vadd.f32 %v1413_v3, %v1412_v1  ;;  %v1415_v5 = vpop.f32.mrb[22].mxu0  ;;  %v1476_v6 = vpop.f32.mrb[20].mxu1 }
 0x120   :  { %v1416_v7 = vpop.f32.mrb[23].mxu0  ;;  %v1477_v10 = vpop.f32.mrb[21].mxu1 }
 0x121   :  { %v898_v8 = vadd.f32 %v1414_v4, %v2095_v47  ;;  %v1417_v9 = vadd.f32 %v1416_v7, %v1415_v5  ;;  %v1478_v11 = vadd.f32 %v1477_v10, %v1476_v6  ;;  %v1479_v13 = vpop.f32.mrb[22].mxu1 }
 0x122   :  { %v1480_v16 = vpop.f32.mrb[23].mxu1 }
 0x123   :  { %v901_v14 = vadd.f32 %v1417_v9, %v2095_v47  ;;  %v2129_v17 = vadd.f32 %v1478_v11, %v898_v8  ;;  %v1481_v18 = vadd.f32 %v1480_v16, %v1479_v13 }
 0x125   :  { %v1418_v19 = vpop.f32.mrb[24].mxu0  ;;  %v2131_v20 = vadd.f32 %v1481_v18, %v901_v14 }
 0x126   :  { %v1419_v21 = vpop.f32.mrb[25].mxu0 }
 0x127   :  { %v1420_v22 = vadd.f32 %v1419_v21, %v1418_v19  ;;  %v1421_v23 = vpop.f32.mrb[26].mxu0  ;;  %v1482_v24 = vpop.f32.mrb[24].mxu1 }
 0x128   :  { %v1422_v25 = vpop.f32.mrb[27].mxu0  ;;  %v1483_v29 = vpop.f32.mrb[25].mxu1 }
 0x129   :  { %v906_v26 = vadd.f32 %v1420_v22, %v2095_v47  ;;  %v1423_v27 = vadd.f32 %v1422_v25, %v1421_v23  ;;  %v1484_v30 = vadd.f32 %v1483_v29, %v1482_v24  ;;  %v1485_v32 = vpop.f32.mrb[26].mxu1 }
 0x12a   :  { %v1486_v34 = vpop.f32.mrb[27].mxu1 }
 0x12b   :  { %v909_v33 = vadd.f32 %v1423_v27, %v2095_v47  ;;  %v2135_v35 = vadd.f32 %v1484_v30, %v906_v26  ;;  %v1487_v36 = vadd.f32 %v1486_v34, %v1485_v32 }
 0x12d   :  { %v1424_v37 = vpop.f32.mrb[28].mxu0  ;;  %v2137_v38 = vadd.f32 %v1487_v36, %v909_v33 }
 0x12e   :  { %v1425_v39 = vpop.f32.mrb[29].mxu0 }
 0x12f   :  { %v1426_v40 = vadd.f32 %v1425_v39, %v1424_v37  ;;  %v1427_v41 = vpop.f32.mrb[30].mxu0  ;;  %v1488_v42 = vpop.f32.mrb[28].mxu1 }
 0x130   :  { %v1428_v43 = vpop.f32.mrb[31].mxu0  ;;  %v1489_v49 = vpop.f32.mrb[29].mxu1 }
 0x131   :  { %v914_v45 = vadd.f32 %v1426_v40, %v2095_v47  ;;  %v1429_v46 = vadd.f32 %v1428_v43, %v1427_v41  ;;  %v1490_v50 = vadd.f32 %v1489_v49, %v1488_v42  ;;  %v1491_v51 = vpop.f32.mrb[30].mxu1 }
 0x132   :  { %v1492_v53 = vpop.f32.mrb[31].mxu1 }
 0x133   :  { %v917_v52 = vadd.f32 %v1429_v46, %v2095_v47  ;;  %v2141_v54 = vadd.f32 %v1490_v50, %v914_v45  ;;  %v1493_v55 = vadd.f32 %v1492_v53, %v1491_v51 }
 0x135   :  { %v1510_v56 = vpop.f32.mrb[32].mxu0  ;;  %v2143_v57 = vadd.f32 %v1493_v55, %v917_v52 }
 0x136   :  { %v1511_v58 = vpop.f32.mrb[33].mxu0 }
 0x137   :  { %v1512_v59 = vadd.f32 %v1511_v58, %v1510_v56  ;;  %v1513_v61 = vpop.f32.mrb[34].mxu0  ;;  %v1586_v1 = vpop.f32.mrb[32].mxu1 }
 0x138   :  { %v1514_v0 = vpop.f32.mrb[35].mxu0  ;;  %v1148_v5 = vpop.f32.mrb[33].mxu1 }
 0x139   :  { %v1515_v3 = vadd.f32 %v1514_v0, %v1513_v61  ;;  %v1052_v4 = vadd.f32 %v1512_v59, %v2099_v60  ;;  %v1587_v6 = vpop.f32.mrb[34].mxu1 }
 0x13a   :  { %v1151_v8 = vpop.f32.mrb[35].mxu1 }
 0x13b   :  { %v1149_v7 = vadd.f32 %v1148_v5, %v1052_v4  ;;  %v1055_v47 = vadd.f32 %v1515_v3, %v2101_v63 }
 0x13d   :  { %v1211_v9 = vmax.f32 %v1149_v7, 0.0  ;;  %v1152_v10 = vadd.f32 %v1151_v8, %v1055_v47  ;;  %v1516_v11 = vpop.f32.mrb[36].mxu0 }
 0x13e   :  { %v1517_v13 = vpop.f32.mrb[37].mxu0 }
 0x13f   :  { %1227 = vst.msk [vmem:[%s2231_s3] sm:$0xff] %vm798_vm0, %v1211_v9  ;;  %v1212_v14 = vmax.f32 %v1152_v10, 0.0  ;;  %v1518_v16 = vadd.f32 %v1517_v13, %v1516_v11  ;;  %v1519_v18 = vpop.f32.mrb[38].mxu0  ;;  %v1590_v60 = vpop.f32.mrb[36].mxu1 }
 0x140   :  { %v1520_v19 = vpop.f32.mrb[39].mxu0  ;;  %v1164_v22 = vpop.f32.mrb[37].mxu1 }
 0x141   :  { %1228 = vst.msk [vmem:[%s2231_s3 + $0x8] sm:$0xff] %vm798_vm0, %v1212_v14  ;;  %v1060_v63 = vadd.f32 %v1518_v16, %v2105_v12  ;;  %v1521_v21 = vadd.f32 %v1520_v19, %v1519_v18  ;;  %v1591_v23 = vpop.f32.mrb[38].mxu1 }
 0x142   :  { %v1167_v26 = vpop.f32.mrb[39].mxu1 }
 0x143   :  { %v1157_v24 = vadd.f32 %v1586_v1, %v1060_v63  ;;  %v1063_v25 = vadd.f32 %v1521_v21, %v2107_v15 }
 0x145   :  { %v1213_v27 = vmax.f32 %v1157_v24, 0.0  ;;  %v1160_v29 = vadd.f32 %v1587_v6, %v1063_v25  ;;  %v1522_v30 = vpop.f32.mrb[40].mxu0 }
 0x146   :  { %v1523_v32 = vpop.f32.mrb[41].mxu0 }
 0x147   :  { %1229 = vst.msk [vmem:[%s2231_s3 + $0x10] sm:$0xff] %vm798_vm0, %v1213_v27  ;;  %v1214_v33 = vmax.f32 %v1160_v29, 0.0  ;;  %v1524_v34 = vadd.f32 %v1523_v32, %v1522_v30  ;;  %v1525_v36 = vpop.f32.mrb[42].mxu0  ;;  %v1594_v37 = vpop.f32.mrb[40].mxu1 }
 0x148   :  { %v1526_v12 = vpop.f32.mrb[43].mxu0  ;;  %v1180_v40 = vpop.f32.mrb[41].mxu1 }
 0x149   :  { %1230 = vst.msk [vmem:[%s2231_s3 + $0x18] sm:$0xff] %vm798_vm0, %v1214_v33  ;;  %v1527_v15 = vadd.f32 %v1526_v12, %v1525_v36  ;;  %v1068_v39 = vadd.f32 %v1524_v34, %v2111_v28  ;;  %v1595_v41 = vpop.f32.mrb[42].mxu1 }
 0x14a   :  { %v1183_v45 = vpop.f32.mrb[43].mxu1 }
 0x14b   :  { %v1165_v42 = vadd.f32 %v1164_v22, %v1068_v39  ;;  %v1071_v43 = vadd.f32 %v1527_v15, %v2113_v31 }
 0x14d   :  { %v1215_v46 = vmax.f32 %v1165_v42, 0.0  ;;  %v1168_v49 = vadd.f32 %v1167_v26, %v1071_v43  ;;  %v1528_v50 = vpop.f32.mrb[44].mxu0 }
 0x14e   :  { %v1529_v51 = vpop.f32.mrb[45].mxu0 }
 0x14f   :  { %1231 = vst.msk [vmem:[%s2231_s3 + $0x20] sm:$0xff] %vm798_vm0, %v1215_v46  ;;  %v1216_v52 = vmax.f32 %v1168_v49, 0.0  ;;  %v1530_v53 = vadd.f32 %v1529_v51, %v1528_v50  ;;  %v1531_v55 = vpop.f32.mrb[46].mxu0  ;;  %v2171_v28 = vpop.f32.mrb[44].mxu1 }
 0x150   :  { %v1532_v56 = vpop.f32.mrb[47].mxu0  ;;  %v1196_v59 = vpop.f32.mrb[45].mxu1 }
 0x151   :  { %1232 = vst.msk [vmem:[%s2231_s3 + $0x28] sm:$0xff] %vm798_vm0, %v1216_v52  ;;  %v1076_v31 = vadd.f32 %v1530_v53, %v2117_v44  ;;  %v1533_v58 = vadd.f32 %v1532_v56, %v1531_v55  ;;  %v1599_v61 = vpop.f32.mrb[46].mxu1 }
 0x152   :  { %v1199_v3 = vpop.f32.mrb[47].mxu1 }
 0x153   :  { %v1173_v0 = vadd.f32 %v1590_v60, %v1076_v31  ;;  %v1079_v1 = vadd.f32 %v1533_v58, %v2119_v48 }
 0x155   :  { %v1217_v4 = vmax.f32 %v1173_v0, 0.0  ;;  %v1176_v5 = vadd.f32 %v1591_v23, %v1079_v1  ;;  %v1534_v6 = vpop.f32.mrb[48].mxu0 }
 0x156   :  { %v1535_v7 = vpop.f32.mrb[49].mxu0 }
 0x157   :  { %1233 = vst.msk [vmem:[%s2231_s3 + $0x30] sm:$0xff] %vm798_vm0, %v1217_v4  ;;  %v1218_v47 = vmax.f32 %v1176_v5, 0.0  ;;  %v1536_v8 = vadd.f32 %v1535_v7, %v1534_v6  ;;  %v1537_v9 = vpop.f32.mrb[50].mxu0 }
 0x158   :  { %v1538_v44 = vpop.f32.mrb[51].mxu0 }
 0x159   :  { %1234 = vst.msk [vmem:[%s2231_s3 + $0x38] sm:$0xff] %vm798_vm0, %v1218_v47  ;;  %v1539_v48 = vadd.f32 %v1538_v44, %v1537_v9  ;;  %v1084_v10 = vadd.f32 %v1536_v8, %v2123_v62 }
 0x15b   :  { %v1181_v11 = vadd.f32 %v1180_v40, %v1084_v10  ;;  %v1087_v13 = vadd.f32 %v1539_v48, %v2125_v2 }
 0x15d   :  { %v1219_v14 = vmax.f32 %v1181_v11, 0.0  ;;  %v1184_v16 = vadd.f32 %v1183_v45, %v1087_v13  ;;  %v1540_v18 = vpop.f32.mrb[52].mxu0 }
 0x15e   :  { %v1541_v19 = vpop.f32.mrb[53].mxu0 }
 0x15f   :  { %1235 = vst.msk [vmem:[%s2231_s3 + $0x40] sm:$0xff] %vm798_vm0, %v1219_v14  ;;  %v1220_v60 = vmax.f32 %v1184_v16, 0.0  ;;  %v1542_v63 = vadd.f32 %v1541_v19, %v1540_v18  ;;  %v1543_v21 = vpop.f32.mrb[54].mxu0 }
 0x160   :  { %v1544_v22 = vpop.f32.mrb[55].mxu0 }
 0x161   :  { %1236 = vst.msk [vmem:[%s2231_s3 + $0x48] sm:$0xff] %vm798_vm0, %v1220_v60  ;;  %v1092_v62 = vadd.f32 %v1542_v63, %v2129_v17  ;;  %v1545_v2 = vadd.f32 %v1544_v22, %v1543_v21 }
 0x163   :  { %v1189_v23 = vadd.f32 %v1594_v37, %v1092_v62  ;;  %v1095_v24 = vadd.f32 %v1545_v2, %v2131_v20 }
 0x165   :  { %v1221_v25 = vmax.f32 %v1189_v23, 0.0  ;;  %v1192_v26 = vadd.f32 %v1595_v41, %v1095_v24  ;;  %v1546_v27 = vpop.f32.mrb[56].mxu0 }
 0x166   :  { %v1547_v29 = vpop.f32.mrb[57].mxu0 }
 0x167   :  { %1237 = vst.msk [vmem:[%s2231_s3 + $0x50] sm:$0xff] %vm798_vm0, %v1221_v25  ;;  %v1222_v30 = vmax.f32 %v1192_v26, 0.0  ;;  %v1548_v32 = vadd.f32 %v1547_v29, %v1546_v27  ;;  %v1549_v33 = vpop.f32.mrb[58].mxu0 }
 0x168   :  { %v1550_v34 = vpop.f32.mrb[59].mxu0 }
 0x169   :  { %1238 = vst.msk [vmem:[%s2231_s3 + $0x58] sm:$0xff] %vm798_vm0, %v1222_v30  ;;  %v1551_v17 = vadd.f32 %v1550_v34, %v1549_v33  ;;  %v1100_v20 = vadd.f32 %v1548_v32, %v2135_v35 }
 0x16b   :  { %v1197_v36 = vadd.f32 %v1196_v59, %v1100_v20  ;;  %v1103_v12 = vadd.f32 %v1551_v17, %v2137_v38 }
 0x16d   :  { %v1223_v37 = vmax.f32 %v1197_v36, 0.0  ;;  %v1200_v15 = vadd.f32 %v1199_v3, %v1103_v12  ;;  %v1552_v39 = vpop.f32.mrb[60].mxu0 }
 0x16e   :  { %v1553_v40 = vpop.f32.mrb[61].mxu0 }
 0x16f   :  { %1239 = vst.msk [vmem:[%s2231_s3 + $0x60] sm:$0xff] %vm798_vm0, %v1223_v37  ;;  %v1224_v41 = vmax.f32 %v1200_v15, 0.0  ;;  %v1554_v42 = vadd.f32 %v1553_v40, %v1552_v39  ;;  %v1555_v43 = vpop.f32.mrb[62].mxu0 }
 0x170   :  { %v1556_v45 = vpop.f32.mrb[63].mxu0 }
 0x171   :  { %1240 = vst.msk [vmem:[%s2231_s3 + $0x68] sm:$0xff] %vm798_vm0, %v1224_v41  ;;  %v1108_v35 = vadd.f32 %v1554_v42, %v2141_v54  ;;  %v1557_v38 = vadd.f32 %v1556_v45, %v1555_v43 }
 0x173   :  { %v1205_v46 = vadd.f32 %v2171_v28, %v1108_v35  ;;  %v1111_v49 = vadd.f32 %v1557_v38, %v2143_v57 }
 0x175   :  { %v1225_v50 = vmax.f32 %v1205_v46, 0.0  ;;  %v1208_v51 = vadd.f32 %v1599_v61, %v1111_v49 }
 0x177   :  { %1241 = vst.msk [vmem:[%s2231_s3 + $0x70] sm:$0xff] %vm798_vm0, %v1225_v50  ;;  %v1226_v52 = vmax.f32 %v1208_v51, 0.0 }
 0x179   :  { %1242 = vst.msk [vmem:[%s2231_s3 + $0x78] sm:$0xff] %vm798_vm0, %v1226_v52 }

// kernel: forward.4
= control target key start
LH: loop header
LB: loop body
LE: loop exit
PB: predicated region body
PF: predicated region fallthrough
CT: control target
= control target key end

     0   :  { %v2388_v1 = vmov 0   ;;  %vm1000_vm0 = vcmask 523264   ;;  %s3271_s1 = inlined_call_operand.vmem [shape: bf16[576,384], index: 1, kind: input, shape index: {}]   ;;  %s3272_s0 = inlined_call_operand.vmem [shape: bf16[128,576], index: 0, kind: input, shape index: {}]   ;;  %s3273_s2 = inlined_call_operand.vmem [shape: f32[1,384], index: 2, kind: input, shape index: {}]   ;;  %s3274_s3 = inlined_call_operand.vmem [shape: f32[128,384], index: 3, kind: output, shape index: {}]  }
   0x1   :  { %v2188_v0 = vld [vmem:[%s3271_s1 + $0x4] ss:$12 sps:$4 sm:$0xff]   ;;  %1313 = vmatprep.mubr.bf16.mxu1 %v2388_v1  ;;  %v2192_v3 = vld [vmem:[%s3271_s1] ss:$12 sps:$4 sm:$0xff]   ;;  %v2194_v5 = vld [vmem:[%s3271_s1 + $0x1c] ss:$12 sps:$4 sm:$0xff]  }
   0x2   :  { %v2416_v2 = vld [vmem:[%s3271_s1 + $0x304] ss:$12 sps:$4 sm:$0xff]   ;;  %1025 = vmatprep.subr.bf16.mxu0 %v2188_v0  ;;  %v2424_v4 = vld [vmem:[%s3271_s1 + $0x300] ss:$12 sps:$4 sm:$0xff]   ;;  %v2434_v6 = vld [vmem:[%s3271_s1 + $0x31c] ss:$12 sps:$4 sm:$0xff]  }
   0x3   :  { %2083 = vmatprep.subr.bf16.mxu1 %v2416_v2  ;;  %1026 = vmatpush1.bf16.msra.mxu0 %v2192_v3  ;;  %v2198_v7 = vld [vmem:[%s3271_s1 + $0x18] ss:$12 sps:$4 sm:$0xff]   ;;  %v2200_v9 = vld [vmem:[%s3271_s1 + $0x34] ss:$12 sps:$4 sm:$0xff]   ;;  %v2204_v11 = vld [vmem:[%s3271_s1 + $0x30] ss:$12 sps:$4 sm:$0xff]  }
   0x4   :  { %2087 = vmatpush1.bf16.msra.mxu1 %v2424_v4  ;;  %1027 = vmatprep.subr.bf16.mxu0 %v2194_v5  ;;  %v2442_v8 = vld [vmem:[%s3271_s1 + $0x318] ss:$12 sps:$4 sm:$0xff]   ;;  %v2451_v10 = vld [vmem:[%s3271_s1 + $0x334] ss:$12 sps:$4 sm:$0xff]   ;;  %v2459_v12 = vld [vmem:[%s3271_s1 + $0x330] ss:$12 sps:$4 sm:$0xff]  }
   0x5   :  { %2084 = vmatprep.subr.bf16.mxu1 %v2434_v6  ;;  %v2206_v13 = vld [vmem:[%s3271_s1 + $0x4c] ss:$12 sps:$4 sm:$0xff]   ;;  %v2210_v15 = vld [vmem:[%s3271_s1 + $0x48] ss:$12 sps:$4 sm:$0xff]   ;;  %v2212_v17 = vld [vmem:[%s3271_s1 + $0x64] ss:$12 sps:$4 sm:$0xff]  }
   0x6   :  { %v2469_v14 = vld [vmem:[%s3271_s1 + $0x34c] ss:$12 sps:$4 sm:$0xff]   ;;  %v2477_v16 = vld [vmem:[%s3271_s1 + $0x348] ss:$12 sps:$4 sm:$0xff]   ;;  %v2523_v28 = vld [vmem:[%s3272_s0 + $0xb0] ss:$20 sps:$4 sm:$0xff]  }
   0x7   :  { %1028 = vmatpush1.bf16.msra.mxu0 %v2198_v7  ;;  %v2487_v18 = vld [vmem:[%s3272_s0 + $0x88] ss:$20 sps:$4 sm:$0xff]   ;;  %v2216_v20 = vld [vmem:[%s3271_s1 + $0x60] ss:$12 sps:$4 sm:$0xff]   ;;  %v2220_v24 = vld [vmem:[%s3271_s1 + $0x78] ss:$12 sps:$4 sm:$0xff]  }
   0x8   :  { %2088 = vmatpush1.bf16.msra.mxu1 %v2442_v8  ;;  %1029 = vmatprep.subr.bf16.mxu0 %v2200_v9  ;;  %v2215_v19 = vld [vmem:[%s3271_s1 + $0xc8] ss:$12 sps:$4 sm:$0xff]   ;;  %v2221_v23 = vld [vmem:[%s3271_s1 + $0xe0] ss:$12 sps:$4 sm:$0xff]   ;;  %v2227_v27 = vld [vmem:[%s3271_s1 + $0xf8] ss:$12 sps:$4 sm:$0xff]  }
   0x9   :  { %2085 = vmatprep.subr.bf16.mxu1 %v2451_v10  ;;  %v2217_v21 = vld [vmem:[%s3271_s1 + $0x8] ss:$12 sps:$4 sm:$0xff]   ;;  %v2222_v25 = vld [vmem:[%s3271_s1 + $0x20] ss:$12 sps:$4 sm:$0xff]   ;;  %v2226_v29 = vld [vmem:[%s3271_s1 + $0x90] ss:$12 sps:$4 sm:$0xff]  }
   0xa   :  { %v2218_v22 = vld [vmem:[%s3271_s1 + $0x7c] ss:$12 sps:$4 sm:$0xff]   ;;  %v2223_v26 = vld [vmem:[%s3271_s1 + $0x94] ss:$12 sps:$4 sm:$0xff]   ;;  %v2228_v30 = vld [vmem:[%s3271_s1 + $0x38] ss:$12 sps:$4 sm:$0xff]  }
   0xb   :  { %1030 = vmatpush1.bf16.msra.mxu0 %v2204_v11  ;;  %v2229_v31 = vld [vmem:[%s3271_s1 + $0xac] ss:$12 sps:$4 sm:$0xff]   ;;  %v2232_v32 = vld [vmem:[%s3271_s1 + $0x110] ss:$12 sps:$4 sm:$0xff]   ;;  %v2231_v33 = vld [vmem:[%s3271_s1 + $0xa8] ss:$12 sps:$4 sm:$0xff]  }
   0xc   :  { %2089 = vmatpush1.bf16.msra.mxu1 %v2459_v12  ;;  %1031 = vmatprep.subr.bf16.mxu0 %v2206_v13  ;;  %v2236_v34 = vld [vmem:[%s3271_s1 + $0x50] ss:$12 sps:$4 sm:$0xff]   ;;  %v2552_v36 = vld [vmem:[%s3272_s0 + $0xd8] ss:$20 sps:$4 sm:$0xff]   ;;  %v2240_v37 = vld [vmem:[%s3271_s1 + $0x128] ss:$12 sps:$4 sm:$0xff]  }
   0xd   :  { %2086 = vmatprep.subr.bf16.mxu1 %v2469_v14  ;;  %v2233_v35 = vld [vmem:[%s3271_s1 + $0xc4] ss:$12 sps:$4 sm:$0xff]   ;;  %v2237_v38 = vld [vmem:[%s3271_s1 + $0xc0] ss:$12 sps:$4 sm:$0xff]   ;;  %v2242_v39 = vld [vmem:[%s3271_s1 + $0x68] ss:$12 sps:$4 sm:$0xff]  }
   0xe   :  { %v2238_v40 = vld [vmem:[%s3271_s1 + $0xdc] ss:$12 sps:$4 sm:$0xff]   ;;  %v2247_v41 = vld [vmem:[%s3271_s1 + $0x140] ss:$12 sps:$4 sm:$0xff]   ;;  %v2241_v42 = vld [vmem:[%s3271_s1 + $0xd8] ss:$12 sps:$4 sm:$0xff]  }
   0xf   :  { %1032 = vmatpush1.bf16.msra.mxu0 %v2210_v15  ;;  %v2248_v43 = vld [vmem:[%s3271_s1 + $0x80] ss:$12 sps:$4 sm:$0xff]   ;;  %v2252_v45 = vld [vmem:[%s3271_s1 + $0x158] ss:$12 sps:$4 sm:$0xff]   ;;  %v2246_v47 = vld [vmem:[%s3271_s1 + $0xf0] ss:$12 sps:$4 sm:$0xff]  }
  0x10   :  { %2090 = vmatpush1.bf16.msra.mxu1 %v2477_v16  ;;  %1033 = vmatprep.subr.bf16.mxu0 %v2212_v17  ;;  %v2243_v44 = vld [vmem:[%s3271_s1 + $0xf4] ss:$12 sps:$4 sm:$0xff]   ;;  %v2249_v48 = vld [vmem:[%s3271_s1 + $0x10c] ss:$12 sps:$4 sm:$0xff]   ;;  %v2258_v50 = vld [vmem:[%s3271_s1 + $0x170] ss:$12 sps:$4 sm:$0xff]  }
  0x11   :  { %1919 = vmatprep.subr.bf16.mxu1 %v2215_v19  ;;  %v2587_v46 = vld [vmem:[%s3272_s0 + $0x100] ss:$20 sps:$4 sm:$0xff]   ;;  %v2253_v49 = vld [vmem:[%s3271_s1 + $0x98] ss:$12 sps:$4 sm:$0xff]   ;;  %v2261_v53 = vld [vmem:[%s3271_s1 + $0xb0] ss:$12 sps:$4 sm:$0xff]  }
  0x12   :  { %v2251_v51 = vld [vmem:[%s3271_s1 + $0x108] ss:$12 sps:$4 sm:$0xff]   ;;  %v2254_v52 = vld [vmem:[%s3271_s1 + $0x124] ss:$12 sps:$4 sm:$0xff]   ;;  %v2257_v56 = vld [vmem:[%s3271_s1 + $0x120] ss:$12 sps:$4 sm:$0xff]  }
  0x13   :  { %1906 = vmatmul.mubr.msk.bf16.vlgmr.msra.gmra.mrb[0].mxu1 %vm1000_vm0, %v2487_v18  ;;  %1034 = vmatpush1.bf16.msra.mxu0 %v2216_v20  ;;  %v2265_v54 = vld [vmem:[%s3272_s0 + $0x4] ss:$20 sps:$4 sm:$0xff]   ;;  %v2619_v55 = vld [vmem:[%s3272_s0 + $0x128] ss:$20 sps:$4 sm:$0xff]   ;;  %v2266_v60 = vld [vmem:[%s3271_s1 + $0x154] ss:$12 sps:$4 sm:$0xff]  }
  0x14   :  { %1920 = vmatpush3.bf16.msra.mxu1 %v2217_v21  ;;  %1035 = vmatprep.subr.bf16.mxu0 %v2218_v22  ;;  %v2268_v57 = vld [vmem:[%s3271_s1 + $0x248] ss:$12 sps:$4 sm:$0xff]   ;;  %v2262_v59 = vld [vmem:[%s3271_s1 + $0x138] ss:$12 sps:$4 sm:$0xff]   ;;  %v2269_v62 = vld [vmem:[%s3271_s1 + $0x150] ss:$12 sps:$4 sm:$0xff]  }
  0x15   :  { %1921 = vmatprep.subr.bf16.mxu1 %v2221_v23  ;;  %1323 = vmatprep.mubr.bf16.mxu1 %v2388_v1  ;;  %v2259_v58 = vld [vmem:[%s3271_s1 + $0x13c] ss:$12 sps:$4 sm:$0xff]   ;;  %v2263_v61 = vld [vmem:[%s3272_s0] ss:$20 sps:$4 sm:$0xff]   ;;  %v2271_v0 = vld [vmem:[%s3271_s1 + $0x16c] ss:$12 sps:$4 sm:$0xff]  }
  0x16   :  { %1057 = vmatprep.mubr.bf16.mxu0 %v2265_v54  ;;  %v2270_v63 = vld [vmem:[%s3271_s1 + $0x188] ss:$12 sps:$4 sm:$0xff]   ;;  %v2274_v3 = vld [vmem:[%s3272_s0 + $0x2c] ss:$20 sps:$4 sm:$0xff]   ;;  %v2278_v9 = vld [vmem:[%s3271_s1 + $0x184] ss:$12 sps:$4 sm:$0xff]  }
  0x17   :  { %1036 = vmatpush1.bf16.msra.mxu0 %v2220_v24  ;;  %v2280_v5 = vld [vmem:[%s3271_s1 + $0x260] ss:$12 sps:$4 sm:$0xff]   ;;  %v2273_v7 = vld [vmem:[%s3271_s1 + $0x168] ss:$12 sps:$4 sm:$0xff]   ;;  %v2291_v13 = vld [vmem:[%s3271_s1 + $0x278] ss:$12 sps:$4 sm:$0xff]  }
  0x18   :  { %1922 = vmatpush3.bf16.msra.mxu1 %v2222_v25  ;;  %1037 = vmatprep.subr.bf16.mxu0 %v2223_v26  ;;  %v2281_v11 = vld [vmem:[%s3271_s1 + $0x1a0] ss:$12 sps:$4 sm:$0xff]   ;;  %v2279_v15 = vld [vmem:[%s3272_s0 + $0x28] ss:$20 sps:$4 sm:$0xff]   ;;  %v2292_v21 = vld [vmem:[%s3271_s1 + $0x1b8] ss:$12 sps:$4 sm:$0xff]  }
  0x19   :  { %1923 = vmatprep.subr.bf16.mxu1 %v2227_v27  ;;  %v2276_v17 = vld [vmem:[%s3271_s1 + $0x180] ss:$12 sps:$4 sm:$0xff]   ;;  %v2284_v19 = vld [vmem:[%s3271_s1 + $0x19c] ss:$12 sps:$4 sm:$0xff]   ;;  %v2282_v23 = vld [vmem:[%s3271_s1 + $0x198] ss:$12 sps:$4 sm:$0xff]  }
  0x1a   :  { %v2285_v20 = vld [vmem:[%s3272_s0 + $0x54] ss:$20 sps:$4 sm:$0xff]   ;;  %v2302_v22 = vld [vmem:[%s3271_s1 + $0x290] ss:$12 sps:$4 sm:$0xff]  }
  0x1b   :  { %1907 = vmatmul.mubr.msk.bf16.gmra.mrb[4].mxu1 %vm1000_vm0, %v2523_v28  ;;  %1038 = vmatpush1.bf16.msra.mxu0 %v2226_v29  ;;  %v2289_v24 = vld [vmem:[%s3271_s1 + $0x1b4] ss:$12 sps:$4 sm:$0xff]   ;;  %v2303_v25 = vld [vmem:[%s3271_s1 + $0x1d0] ss:$12 sps:$4 sm:$0xff]   ;;  %v2295_v29 = vld [vmem:[%s3271_s1 + $0x1cc] ss:$12 sps:$4 sm:$0xff]  }
  0x1c   :  { %1924 = vmatpush3.bf16.msra.mxu1 %v2228_v30  ;;  %1039 = vmatprep.subr.bf16.mxu0 %v2229_v31  ;;  %v2287_v26 = vld [vmem:[%s3271_s1 + $0x1b0] ss:$12 sps:$4 sm:$0xff]   ;;  %v2313_v31 = vld [vmem:[%s3271_s1 + $0x2a8] ss:$12 sps:$4 sm:$0xff]  }
  0x1d   :  { %1333 = vmatprep.mubr.bf16.mxu1 %v2388_v1  ;;  %1925 = vmatprep.subr.bf16.mxu1 %v2232_v32  ;;  %v2290_v27 = vld [vmem:[%s3272_s0 + $0x50] ss:$20 sps:$4 sm:$0xff]   ;;  %v2314_v32 = vld [vmem:[%s3271_s1 + $0x1e8] ss:$12 sps:$4 sm:$0xff]  }
  0x1e   :  { %v2296_v30 = vld [vmem:[%s3272_s0 + $0x7c] ss:$20 sps:$4 sm:$0xff]  }
  0x1f   :  { %1040 = vmatpush1.bf16.msra.mxu0 %v2231_v33  ;;  %v2293_v33 = vld [vmem:[%s3271_s1 + $0x1c8] ss:$12 sps:$4 sm:$0xff]  }
  0x20   :  { %1926 = vmatpush3.bf16.msra.mxu1 %v2236_v34  ;;  %1041 = vmatprep.subr.bf16.mxu0 %v2233_v35  ;;  %v2300_v34 = vld [vmem:[%s3271_s1 + $0x1e4] ss:$12 sps:$4 sm:$0xff]   ;;  %v2324_v35 = vld [vmem:[%s3271_s1 + $0x2c0] ss:$12 sps:$4 sm:$0xff]  }
  0x21   :  { %1927 = vmatprep.subr.bf16.mxu1 %v2240_v37  ;;  %v2301_v37 = vld [vmem:[%s3272_s0 + $0x78] ss:$20 sps:$4 sm:$0xff]  }
  0x23   :  { %1908 = vmatmul.mubr.msk.bf16.gmra.mrb[8].mxu1 %vm1000_vm0, %v2552_v36  ;;  %1042 = vmatpush1.bf16.msra.mxu0 %v2237_v38  ;;  %v2298_v38 = vld [vmem:[%s3271_s1 + $0x1e0] ss:$12 sps:$4 sm:$0xff]  }
  0x24   :  { %1928 = vmatpush3.bf16.msra.mxu1 %v2242_v39  ;;  %1043 = vmatprep.subr.bf16.mxu0 %v2238_v40  ;;  %v2306_v39 = vld [vmem:[%s3271_s1 + $0x1fc] ss:$12 sps:$4 sm:$0xff]   ;;  %v2307_v40 = vld [vmem:[%s3272_s0 + $0xa4] ss:$20 sps:$4 sm:$0xff]  }
  0x25   :  { %1343 = vmatprep.mubr.bf16.mxu1 %v2388_v1  ;;  %1929 = vmatprep.subr.bf16.mxu1 %v2247_v41  ;;  %v2325_v41 = vld [vmem:[%s3271_s1 + $0x200] ss:$12 sps:$4 sm:$0xff]  }
  0x27   :  { %1044 = vmatpush1.bf16.msra.mxu0 %v2241_v42  ;;  %v2304_v42 = vld [vmem:[%s3271_s1 + $0x1f8] ss:$12 sps:$4 sm:$0xff]  }
  0x28   :  { %1930 = vmatpush3.bf16.msra.mxu1 %v2248_v43  ;;  %1045 = vmatprep.subr.bf16.mxu0 %v2243_v44  ;;  %v2335_v43 = vld [vmem:[%s3271_s1 + $0x2d8] ss:$12 sps:$4 sm:$0xff]   ;;  %v2311_v44 = vld [vmem:[%s3271_s1 + $0x214] ss:$12 sps:$4 sm:$0xff]  }
  0x29   :  { %1931 = vmatprep.subr.bf16.mxu1 %v2252_v45  ;;  %v2336_v45 = vld [vmem:[%s3271_s1 + $0x218] ss:$12 sps:$4 sm:$0xff]  }
  0x2b   :  { %1909 = vmatmul.mubr.msk.bf16.gmra.mrb[12].mxu1 %vm1000_vm0, %v2587_v46  ;;  %1046 = vmatpush1.bf16.msra.mxu0 %v2246_v47  ;;  %v2312_v47 = vld [vmem:[%s3272_s0 + $0xa0] ss:$20 sps:$4 sm:$0xff]  }
  0x2c   :  { %1353 = vmatprep.mubr.bf16.mxu1 %v2388_v1  ;;  %1047 = vmatprep.subr.bf16.mxu0 %v2249_v48  ;;  %v2309_v48 = vld [vmem:[%s3271_s1 + $0x210] ss:$12 sps:$4 sm:$0xff]  }
  0x2d   :  { %1932 = vmatpush3.bf16.msra.mxu1 %v2253_v49  ;;  %v2317_v49 = vld [vmem:[%s3271_s1 + $0x22c] ss:$12 sps:$4 sm:$0xff]  }
  0x2e   :  { %1933 = vmatprep.subr.bf16.mxu1 %v2258_v50  ;;  %v2318_v50 = vld [vmem:[%s3272_s0 + $0xcc] ss:$20 sps:$4 sm:$0xff]  }
  0x2f   :  { %1048 = vmatpush1.bf16.msra.mxu0 %v2251_v51  ;;  %v2346_v51 = vld [vmem:[%s3271_s1 + $0x2f0] ss:$12 sps:$4 sm:$0xff]  }
  0x30   :  { %1049 = vmatprep.subr.bf16.mxu0 %v2254_v52  ;;  %v2347_v52 = vld [vmem:[%s3271_s1 + $0x230] ss:$12 sps:$4 sm:$0xff]  }
  0x31   :  { %1934 = vmatpush3.bf16.msra.mxu1 %v2261_v53  ;;  %v2315_v53 = vld [vmem:[%s3271_s1 + $0x228] ss:$12 sps:$4 sm:$0xff]  }
  0x32   :  { %1983 = vmatprep.subr.bf16.mxu1 %v2268_v57  ;;  %v2323_v57 = vld [vmem:[%s3272_s0 + $0xc8] ss:$20 sps:$4 sm:$0xff]  }
  0x33   :  { %1910 = vmatmul.mubr.msk.bf16.gmra.mrb[16].mxu1 %vm1000_vm0, %v2619_v55  ;;  %1050 = vmatpush1.bf16.msra.mxu0 %v2257_v56  ;;  %v2320_v56 = vld [vmem:[%s3271_s1 + $0x240] ss:$12 sps:$4 sm:$0xff]  }
  0x34   :  { %1396 = vmatprep.mubr.bf16.mxu1 %v2265_v54  ;;  %1051 = vmatprep.subr.bf16.mxu0 %v2259_v58  ;;  %v2322_v54 = vld [vmem:[%s3271_s1 + $0x244] ss:$12 sps:$4 sm:$0xff]   ;;  %v2357_v58 = vld [vmem:[%s3271_s1 + $0x308] ss:$12 sps:$4 sm:$0xff]  }
  0x37   :  { %1052 = vmatpush1.bf16.msra.mxu0 %v2262_v59  ;;  %v2328_v59 = vld [vmem:[%s3271_s1 + $0x25c] ss:$12 sps:$4 sm:$0xff]  }
  0x38   :  { %1053 = vmatprep.subr.bf16.mxu0 %v2266_v60  ;;  %v2329_v60 = vld [vmem:[%s3272_s0 + $0xf4] ss:$20 sps:$4 sm:$0xff]  }
  0x3b   :  { %1397 = vmatmul.mubr.bf16.vlgmr.msra.gmra.mrb[20].mxu1 %v2263_v61  ;;  %1054 = vmatpush1.bf16.msra.mxu0 %v2269_v62  ;;  %v2333_v62 = vld [vmem:[%s3271_s1 + $0x274] ss:$12 sps:$4 sm:$0xff]  }
  0x3c   :  { %1984 = vmatpush3.bf16.msra.mxu1 %v2270_v63  ;;  %1055 = vmatprep.subr.bf16.mxu0 %v2271_v0  ;;  %v2331_v63 = vld [vmem:[%s3271_s1 + $0x270] ss:$12 sps:$4 sm:$0xff]  }
  0x3d   :  { %1404 = vmatprep.mubr.bf16.mxu1 %v2274_v3  ;;  %1985 = vmatprep.subr.bf16.mxu1 %v2280_v5  ;;  %v2334_v0 = vld [vmem:[%s3272_s0 + $0xf0] ss:$20 sps:$4 sm:$0xff]  }
  0x3e   :  { %v2340_v5 = vld [vmem:[%s3272_s0 + $0x11c] ss:$20 sps:$4 sm:$0xff]  }
  0x3f   :  { %1056 = vmatpush1.bf16.msra.mxu0 %v2273_v7  ;;  %v2337_v7 = vld [vmem:[%s3271_s1 + $0x288] ss:$12 sps:$4 sm:$0xff]  }
  0x40   :  { %1986 = vmatpush3.bf16.msra.mxu1 %v2281_v11  ;;  %1138 = vmatprep.subr.bf16.mxu0 %v2278_v9  ;;  %v2344_v9 = vld [vmem:[%s3271_s1 + $0x2a4] ss:$12 sps:$4 sm:$0xff]   ;;  %v2345_v11 = vld [vmem:[%s3272_s0 + $0x118] ss:$20 sps:$4 sm:$0xff]  }
  0x41   :  { %1987 = vmatprep.subr.bf16.mxu1 %v2291_v13  ;;  %v2342_v13 = vld [vmem:[%s3271_s1 + $0x2a0] ss:$12 sps:$4 sm:$0xff]  }
  0x42   :  { %1058 = vmatmul.mubr.bf16.vlgmr.msra.gmra.mrb[0].mxu0 %v2263_v61  ;;  %v2326_v61 = vld [vmem:[%s3271_s1 + $0x258] ss:$12 sps:$4 sm:$0xff]  }
  0x43   :  { %1405 = vmatmul.mubr.bf16.gmra.mrb[24].mxu1 %v2279_v15  ;;  %1139 = vmatpush1.bf16.msra.mxu0 %v2276_v17  ;;  %v2353_v17 = vld [vmem:[%s3272_s0 + $0xc] ss:$20 sps:$4 sm:$0xff]  }
  0x44   :  { %1067 = vmatprep.mubr.bf16.mxu0 %v2274_v3  ;;  %1140 = vmatprep.subr.bf16.mxu0 %v2284_v19  ;;  %v2339_v3 = vld [vmem:[%s3271_s1 + $0x28c] ss:$12 sps:$4 sm:$0xff]  }
  0x45   :  { %1412 = vmatprep.mubr.bf16.mxu1 %v2285_v20  ;;  %1988 = vmatpush3.bf16.msra.mxu1 %v2292_v21  ;;  %v2348_v19 = vld [vmem:[%s3271_s1 + $0x2b8] ss:$12 sps:$4 sm:$0xff]   ;;  %v2351_v21 = vld [vmem:[%s3272_s0 + $0x8] ss:$20 sps:$4 sm:$0xff]  }
  0x46   :  { %1989 = vmatprep.subr.bf16.mxu1 %v2302_v22  ;;  %v2354_v22 = vld [vmem:[%s3271_s1 + $0x2d0] ss:$12 sps:$4 sm:$0xff]  }
  0x47   :  { %1141 = vmatpush1.bf16.msra.mxu0 %v2282_v23  ;;  %v2360_v23 = vld [vmem:[%s3271_s1 + $0x2ec] ss:$12 sps:$4 sm:$0xff]  }
  0x48   :  { %1142 = vmatprep.subr.bf16.mxu0 %v2289_v24  ;;  %v2361_v24 = vld [vmem:[%s3272_s0 + $0x34] ss:$20 sps:$4 sm:$0xff]  }
  0x49   :  { %1990 = vmatpush3.bf16.msra.mxu1 %v2303_v25  ;;  %v2367_v25 = vld [vmem:[%s3271_s1 + $0x320] ss:$12 sps:$4 sm:$0xff]  }
  0x4a   :  { %1068 = vmatmul.mubr.bf16.gmra.mrb[4].mxu0 %v2279_v15  ;;  %1991 = vmatprep.subr.bf16.mxu1 %v2313_v31  ;;  %v2350_v15 = vld [vmem:[%s3271_s1 + $0x2bc] ss:$12 sps:$4 sm:$0xff]  }
  0x4b   :  { %1413 = vmatmul.mubr.bf16.gmra.mrb[28].mxu1 %v2290_v27  ;;  %1143 = vmatpush1.bf16.msra.mxu0 %v2287_v26  ;;  %v2358_v26 = vld [vmem:[%s3271_s1 + $0x2e8] ss:$12 sps:$4 sm:$0xff]   ;;  %v2381_v31 = vld [vmem:[%s3271_s1 + $0x350] ss:$12 sps:$4 sm:$0xff]  }
  0x4c   :  { %1077 = vmatprep.mubr.bf16.mxu0 %v2285_v20  ;;  %1144 = vmatprep.subr.bf16.mxu0 %v2295_v29  ;;  %v2356_v20 = vld [vmem:[%s3271_s1 + $0x2d4] ss:$12 sps:$4 sm:$0xff]   ;;  %v2363_v29 = vld [vmem:[%s3272_s0 + $0x30] ss:$20 sps:$4 sm:$0xff]  }
  0x4d   :  { %1420 = vmatprep.mubr.bf16.mxu1 %v2296_v30  ;;  %1992 = vmatpush3.bf16.msra.mxu1 %v2314_v32  ;;  %v2368_v32 = vld [vmem:[%s3272_s0 + $0x84] ss:$20 sps:$4 sm:$0xff]  }
  0x4e   :  { %1993 = vmatprep.subr.bf16.mxu1 %v2324_v35  ;;  %v2385_v35 = vld [vmem:[%s3272_s0 + $0x10] ss:$20 sps:$4 sm:$0xff]  }
  0x4f   :  { %1145 = vmatpush1.bf16.msra.mxu0 %v2293_v33  ;;  %v2382_v33 = vld [vmem:[%s3272_s0 + $0x124] ss:$20 sps:$4 sm:$0xff]  }
  0x50   :  { %1146 = vmatprep.subr.bf16.mxu0 %v2300_v34  ;;  %v2384_v34 = vld [vmem:[%s3272_s0 + $0x120] ss:$20 sps:$4 sm:$0xff]  }
  0x51   :  { %1994 = vmatpush3.bf16.msra.mxu1 %v2325_v41 }
  0x52   :  { %1078 = vmatmul.mubr.bf16.gmra.mrb[8].mxu0 %v2290_v27  ;;  %1995 = vmatprep.subr.bf16.mxu1 %v2335_v43  ;;  %v2374_v27 = vld [vmem:[%s3271_s1 + $0x338] ss:$12 sps:$4 sm:$0xff]  }
  0x53   :  { %1421 = vmatmul.mubr.bf16.gmra.mrb[32].mxu1 %v2301_v37  ;;  %1147 = vmatpush1.bf16.msra.mxu0 %v2298_v38  ;;  %v2387_v38 = vld [vmem:[%s3272_s0 + $0x60] ss:$20 sps:$4 sm:$0xff]  }
  0x54   :  { %1087 = vmatprep.mubr.bf16.mxu0 %v2296_v30  ;;  %1148 = vmatprep.subr.bf16.mxu0 %v2306_v39  ;;  %v2364_v30 = vld [vmem:[%s3272_s0 + $0x5c] ss:$20 sps:$4 sm:$0xff]  }
  0x55   :  { %1428 = vmatprep.mubr.bf16.mxu1 %v2307_v40  ;;  %1996 = vmatpush3.bf16.msra.mxu1 %v2336_v45 }
  0x56   :  { %1997 = vmatprep.subr.bf16.mxu1 %v2346_v51 }
  0x57   :  { %1149 = vmatpush1.bf16.msra.mxu0 %v2304_v42 }
  0x58   :  { %1150 = vmatprep.subr.bf16.mxu0 %v2311_v44 }
  0x59   :  { %1998 = vmatpush3.bf16.msra.mxu1 %v2347_v52 }
  0x5a   :  { %1088 = vmatmul.mubr.bf16.gmra.mrb[12].mxu0 %v2301_v37  ;;  %2059 = vmatprep.subr.bf16.mxu1 %v2357_v58  ;;  %v2386_v37 = vld [vmem:[%s3272_s0 + $0x38] ss:$20 sps:$4 sm:$0xff]  }
  0x5b   :  { %1429 = vmatmul.mubr.bf16.gmra.mrb[36].mxu1 %v2312_v47  ;;  %1151 = vmatpush1.bf16.msra.mxu0 %v2309_v48 }
  0x5c   :  { %1097 = vmatprep.mubr.bf16.mxu0 %v2307_v40  ;;  %1152 = vmatprep.subr.bf16.mxu0 %v2317_v49 }
  0x5d   :  { %1436 = vmatprep.mubr.bf16.mxu1 %v2318_v50 }
  0x5f   :  { %1153 = vmatpush1.bf16.msra.mxu0 %v2315_v53 }
  0x60   :  { %1154 = vmatprep.subr.bf16.mxu0 %v2322_v54 }
  0x62   :  { %1098 = vmatmul.mubr.bf16.gmra.mrb[16].mxu0 %v2312_v47 }
  0x63   :  { %1437 = vmatmul.mubr.bf16.gmra.mrb[40].mxu1 %v2323_v57  ;;  %1155 = vmatpush1.bf16.msra.mxu0 %v2320_v56 }
  0x64   :  { %1107 = vmatprep.mubr.bf16.mxu0 %v2318_v50  ;;  %1156 = vmatprep.subr.bf16.mxu0 %v2328_v59 }
  0x65   :  { %1444 = vmatprep.mubr.bf16.mxu1 %v2329_v60 }
  0x67   :  { %1157 = vmatpush1.bf16.msra.mxu0 %v2326_v61 }
  0x68   :  { %1158 = vmatprep.subr.bf16.mxu0 %v2333_v62 }
  0x6a   :  { %1108 = vmatmul.mubr.bf16.gmra.mrb[20].mxu0 %v2323_v57 }
  0x6b   :  { %1445 = vmatmul.mubr.bf16.gmra.mrb[44].mxu1 %v2334_v0  ;;  %1159 = vmatpush1.bf16.msra.mxu0 %v2331_v63 }
  0x6c   :  { %1117 = vmatprep.mubr.bf16.mxu0 %v2329_v60  ;;  %1160 = vmatprep.subr.bf16.mxu0 %v2339_v3 }
  0x6d   :  { %1452 = vmatprep.mubr.bf16.mxu1 %v2340_v5 }
  0x6f   :  { %1161 = vmatpush1.bf16.msra.mxu0 %v2337_v7 }
  0x70   :  { %1162 = vmatprep.subr.bf16.mxu0 %v2344_v9 }
  0x72   :  { %1118 = vmatmul.mubr.bf16.gmra.mrb[24].mxu0 %v2334_v0 }
  0x73   :  { %1453 = vmatmul.mubr.bf16.gmra.mrb[48].mxu1 %v2345_v11  ;;  %1163 = vmatpush1.bf16.msra.mxu0 %v2342_v13 }
  0x74   :  { %1127 = vmatprep.mubr.bf16.mxu0 %v2340_v5  ;;  %1164 = vmatprep.subr.bf16.mxu0 %v2350_v15 }
  0x75   :  { %1493 = vmatprep.mubr.bf16.mxu1 %v2353_v17 }
  0x77   :  { %1165 = vmatpush1.bf16.msra.mxu0 %v2348_v19 }
  0x78   :  { %1166 = vmatprep.subr.bf16.mxu0 %v2356_v20 }
  0x7a   :  { %1128 = vmatmul.mubr.bf16.gmra.mrb[28].mxu0 %v2345_v11 }
  0x7b   :  { %1494 = vmatmul.mubr.bf16.vlgmr.msra.gmra.mrb[52].mxu1 %v2351_v21  ;;  %1167 = vmatpush1.bf16.msra.mxu0 %v2354_v22 }
  0x7c   :  { %2060 = vmatpush3.bf16.msra.mxu1 %v2357_v58  ;;  %1168 = vmatprep.subr.bf16.mxu0 %v2360_v23 }
  0x7d   :  { %1170 = vmatprep.mubr.bf16.mxu0 %v2353_v17  ;;  %1501 = vmatprep.mubr.bf16.mxu1 %v2361_v24 }
  0x7e   :  { %2061 = vmatprep.subr.bf16.mxu1 %v2367_v25 }
  0x7f   :  { %1169 = vmatpush1.bf16.msra.mxu0 %v2358_v26 }
  0x80   :  { %2062 = vmatpush3.bf16.msra.mxu1 %v2367_v25  ;;  %1251 = vmatprep.subr.bf16.mxu0 %v2416_v2  ;;  %v2366_v2 = vld [vmem:[%s3272_s0 + $0x58] ss:$20 sps:$4 sm:$0xff]  }
  0x81   :  { %2063 = vmatprep.subr.bf16.mxu1 %v2374_v27 }
  0x82   :  { %1171 = vmatmul.mubr.bf16.vlgmr.msra.gmra.mrb[0].mxu0 %v2351_v21 }
  0x83   :  { %1502 = vmatmul.mubr.bf16.gmra.mrb[56].mxu1 %v2363_v29  ;;  %1252 = vmatpush1.bf16.msra.mxu0 %v2424_v4  ;;  %v2370_v4 = vld [vmem:[%s3272_s0 + $0x80] ss:$20 sps:$4 sm:$0xff]  }
  0x84   :  { %1180 = vmatprep.mubr.bf16.mxu0 %v2361_v24  ;;  %1509 = vmatprep.mubr.bf16.mxu1 %v2364_v30 }
  0x85   :  { %1253 = vmatprep.subr.bf16.mxu0 %v2434_v6  ;;  %2064 = vmatpush3.bf16.msra.mxu1 %v2374_v27  ;;  %v2371_v6 = vld [vmem:[%s3272_s0 + $0xac] ss:$20 sps:$4 sm:$0xff]  }
  0x86   :  { %2065 = vmatprep.subr.bf16.mxu1 %v2381_v31 }
  0x87   :  { %1254 = vmatpush1.bf16.msra.mxu0 %v2442_v8  ;;  %v2373_v8 = vld [vmem:[%s3272_s0 + $0xa8] ss:$20 sps:$4 sm:$0xff]  }
  0x88   :  { %1255 = vmatprep.subr.bf16.mxu0 %v2451_v10  ;;  %v2375_v10 = vld [vmem:[%s3272_s0 + $0xd4] ss:$20 sps:$4 sm:$0xff]  }
  0x89   :  { %2066 = vmatpush3.bf16.msra.mxu1 %v2381_v31 }
  0x8a   :  { %1181 = vmatmul.mubr.bf16.gmra.mrb[4].mxu0 %v2363_v29 }
  0x8b   :  { %1510 = vmatmul.mubr.bf16.gmra.mrb[60].mxu1 %v2366_v2  ;;  %1190 = vmatprep.mubr.bf16.mxu0 %v2364_v30 }
  0x8c   :  { %1517 = vmatprep.mubr.bf16.mxu1 %v2368_v32  ;;  %1256 = vmatpush1.bf16.msra.mxu0 %v2459_v12  ;;  %v2377_v12 = vld [vmem:[%s3272_s0 + $0xd0] ss:$20 sps:$4 sm:$0xff]  }
  0x8d   :  { %1257 = vmatprep.subr.bf16.mxu0 %v2469_v14  ;;  %v2378_v14 = vld [vmem:[%s3272_s0 + $0xfc] ss:$20 sps:$4 sm:$0xff]  }
  0x90   :  { %1258 = vmatpush1.bf16.msra.mxu0 %v2477_v16  ;;  %v2380_v16 = vld [vmem:[%s3272_s0 + $0xf8] ss:$20 sps:$4 sm:$0xff]  }
  0x92   :  { %1191 = vmatmul.mubr.bf16.gmra.mrb[8].mxu0 %v2366_v2 }
  0x93   :  { %1518 = vmatmul.mubr.bf16.gmra.mrb[64].mxu1 %v2370_v4  ;;  %1200 = vmatprep.mubr.bf16.mxu0 %v2368_v32 }
  0x94   :  { %1525 = vmatprep.mubr.bf16.mxu1 %v2371_v6 }
  0x9a   :  { %1201 = vmatmul.mubr.bf16.gmra.mrb[12].mxu0 %v2370_v4 }
  0x9b   :  { %1526 = vmatmul.mubr.bf16.gmra.mrb[68].mxu1 %v2373_v8  ;;  %1210 = vmatprep.mubr.bf16.mxu0 %v2371_v6 }
  0x9c   :  { %1533 = vmatprep.mubr.bf16.mxu1 %v2375_v10 }
  0xa2   :  { %1211 = vmatmul.mubr.bf16.gmra.mrb[16].mxu0 %v2373_v8 }
  0xa3   :  { %1534 = vmatmul.mubr.bf16.gmra.mrb[72].mxu1 %v2377_v12  ;;  %1220 = vmatprep.mubr.bf16.mxu0 %v2375_v10 }
  0xa4   :  { %1541 = vmatprep.mubr.bf16.mxu1 %v2378_v14 }
  0xaa   :  { %1221 = vmatmul.mubr.bf16.gmra.mrb[20].mxu0 %v2377_v12 }
  0xab   :  { %1542 = vmatmul.mubr.bf16.gmra.mrb[76].mxu1 %v2380_v16  ;;  %1230 = vmatprep.mubr.bf16.mxu0 %v2378_v14 }
  0xac   :  { %1549 = vmatprep.mubr.bf16.mxu1 %v2382_v33 }
  0xb2   :  { %1231 = vmatmul.mubr.bf16.gmra.mrb[24].mxu0 %v2380_v16  ;;  %v209_v16 = vlaneseq }
  0xb3   :  { %1550 = vmatmul.mubr.bf16.gmra.mrb[80].mxu1 %v2384_v34  ;;  %1240 = vmatprep.mubr.bf16.mxu0 %v2382_v33 }
  0xb4   :  { %2067 = vmatprep.mubr.msk.bf16.mxu1 %vm1000_vm0, %v2385_v35 }
  0xba   :  { %1241 = vmatmul.mubr.bf16.gmra.mrb[28].mxu0 %v2384_v34 }
  0xbb   :  { %2068 = vmatmul.mubr.msk.bf16.vlgmr.msra.gmra.mrb[84].mxu1 %vm1000_vm0, %v2386_v37  ;;  %1283 = vmatprep.mubr.bf16.mxu0 %v2388_v1 }
  0xbc   :  { %2071 = vmatprep.mubr.msk.bf16.mxu1 %vm1000_vm0, %v2387_v38 }
  0xc2   :  { %1903 = vmatmul.mubr.msk.bf16.vlgmr.msra.gmra.mrb[0].mxu0 %vm1000_vm0, %v2385_v35 }
  0xc3   :  { %2072 = vmatmul.mubr.msk.bf16.gmra.mrb[88].mxu1 %vm1000_vm0, %v2487_v18  ;;  %1293 = vmatprep.mubr.bf16.mxu0 %v2388_v1 }
  0xc4   :  { %2075 = vmatprep.mubr.msk.bf16.mxu1 %vm1000_vm0, %v2523_v28 }
  0xca   :  { %1904 = vmatmul.mubr.msk.bf16.gmra.mrb[4].mxu0 %vm1000_vm0, %v2386_v37 }
  0xcb   :  { %2076 = vmatmul.mubr.msk.bf16.gmra.mrb[92].mxu1 %vm1000_vm0, %v2552_v36  ;;  %1303 = vmatprep.mubr.bf16.mxu0 %v2388_v1 }
  0xcc   :  { %2079 = vmatprep.mubr.msk.bf16.mxu1 %vm1000_vm0, %v2587_v46 }
  0xd2   :  { %1905 = vmatmul.mubr.msk.bf16.gmra.mrb[8].mxu0 %vm1000_vm0, %v2387_v38  ;;  %v210_v38 = vshrl.u32 %v209_v16, 7 }
  0xd3   :  { %2080 = vmatmul.mubr.msk.bf16.gmra.mrb[96].mxu1 %vm1000_vm0, %v2619_v55 }
  0xe6   :  { %v2929_v18 = vpop.f32.mrb[0].mxu1 }
  0xe7   :  { %v2931_v39 = vpop.f32.mrb[1].mxu1 }
  0xe8   :  { %v2933_v28 = vpop.f32.mrb[2].mxu1 }
  0xe9   :  { %v2935_v40 = vpop.f32.mrb[3].mxu1 }
  0xee   :  { %v2937_v41 = vpop.f32.mrb[4].mxu1 }
  0xef   :  { %v2939_v36 = vpop.f32.mrb[5].mxu1 }
  0xf0   :  { %v2941_v1 = vpop.f32.mrb[6].mxu1 }
  0xf1   :  { %v2943_v46 = vpop.f32.mrb[7].mxu1 }
  0xf6   :  { %v2945_v42 = vpop.f32.mrb[8].mxu1 }
  0xf7   :  { %v2947_v43 = vpop.f32.mrb[9].mxu1 }
  0xf8   :  { %v2949_v55 = vpop.f32.mrb[10].mxu1 }
  0xf9   :  { %v2951_v44 = vpop.f32.mrb[11].mxu1 }
  0xfe   :  { %v2953_v45 = vpop.f32.mrb[12].mxu1 }
  0xff   :  { %v2955_v47 = vpop.f32.mrb[13].mxu1 }
 0x100   :  { %v2957_v48 = vpop.f32.mrb[14].mxu1 }
 0x101   :  { %v2959_v49 = vpop.f32.mrb[15].mxu1 }
 0x106   :  { %v2961_v50 = vpop.f32.mrb[16].mxu1 }
 0x107   :  { %v2963_v51 = vpop.f32.mrb[17].mxu1 }
 0x108   :  { %v2965_v52 = vpop.f32.mrb[18].mxu1 }
 0x109   :  { %v2967_v53 = vpop.f32.mrb[19].mxu1 }
 0x10e   :  { %v1935_v54 = vpop.f32.mrb[20].mxu1 }
 0x10f   :  { %v1936_v56 = vpop.f32.mrb[21].mxu1 }
 0x110   :  { %v1937_v57 = vadd.f32 %v1936_v56, %v1935_v54  ;;  %v1938_v58 = vpop.f32.mrb[22].mxu1 }
 0x111   :  { %v1939_v59 = vpop.f32.mrb[23].mxu1 }
 0x112   :  { %v1940_v60 = vadd.f32 %v1939_v59, %v1938_v58  ;;  %v219_v58 = vsub.s32 2, %v210_v38 }
 0x116   :  { %v1941_v61 = vpop.f32.mrb[24].mxu1 }
 0x117   :  { %v1942_v62 = vpop.f32.mrb[25].mxu1 }
 0x118   :  { %v1943_v63 = vadd.f32 %v1942_v62, %v1941_v61  ;;  %v1944_v0 = vpop.f32.mrb[26].mxu1  ;;  %v207_v62 = vld [vmem:[%s3273_s2] sm:$0x7] }
 0x119   :  { %v1945_v3 = vpop.f32.mrb[27].mxu1 }
 0x11a   :  { %v1946_v5 = vadd.f32 %v1945_v3, %v1944_v0 }
 0x11e   :  { %v1947_v7 = vpop.f32.mrb[28].mxu1 }
 0x11f   :  { %v1948_v9 = vpop.f32.mrb[29].mxu1 }
 0x120   :  { %v1949_v11 = vadd.f32 %v1948_v9, %v1947_v7  ;;  %v1950_v13 = vpop.f32.mrb[30].mxu1  ;;  %v2994_v7 = vrot.slane %v207_v62, %v219_v58 }
 0x121   :  { %v1951_v15 = vpop.f32.mrb[31].mxu1 }
 0x122   :  { %v2969_v17 = vadd.f32 %v1951_v15, %v1950_v13  ;;  %v1399_v15 = vadd.f32 %v1937_v57, %v2994_v7 }
 0x126   :  { %v1953_v19 = vpop.f32.mrb[32].mxu1 }
 0x127   :  { %v1954_v20 = vpop.f32.mrb[33].mxu1 }
 0x128   :  { %v2971_v21 = vadd.f32 %v1954_v20, %v1953_v19  ;;  %v1956_v22 = vpop.f32.mrb[34].mxu1 }
 0x129   :  { %v1957_v23 = vpop.f32.mrb[35].mxu1 }
 0x12a   :  { %v2973_v24 = vadd.f32 %v1957_v23, %v1956_v22  ;;  %v1402_v23 = vadd.f32 %v1940_v60, %v2994_v7 }
 0x12e   :  { %v1959_v25 = vpop.f32.mrb[36].mxu1 }
 0x12f   :  { %v1960_v26 = vpop.f32.mrb[37].mxu1 }
 0x130   :  { %v2975_v27 = vadd.f32 %v1960_v26, %v1959_v25  ;;  %v1962_v29 = vpop.f32.mrb[38].mxu1 }
 0x131   :  { %v1963_v30 = vpop.f32.mrb[39].mxu1 }
 0x132   :  { %v2977_v31 = vadd.f32 %v1963_v30, %v1962_v29 }
 0x136   :  { %v1965_v2 = vpop.f32.mrb[40].mxu1 }
 0x137   :  { %v1966_v32 = vpop.f32.mrb[41].mxu1 }
 0x138   :  { %v2979_v4 = vadd.f32 %v1966_v32, %v1965_v2  ;;  %v1968_v6 = vpop.f32.mrb[42].mxu1  ;;  %v1407_v32 = vadd.f32 %v1943_v63, %v2994_v7  ;;  %v1418_v63 = vadd.f32 %v2969_v17, %v2994_v7 }
 0x139   :  { %v1969_v8 = vpop.f32.mrb[43].mxu1 }
 0x13a   :  { %v2981_v10 = vadd.f32 %v1969_v8, %v1968_v6 }
 0x13e   :  { %v1971_v12 = vpop.f32.mrb[44].mxu1 }
 0x13f   :  { %v1972_v14 = vpop.f32.mrb[45].mxu1 }
 0x140   :  { %v2983_v33 = vadd.f32 %v1972_v14, %v1971_v12  ;;  %v1974_v34 = vpop.f32.mrb[46].mxu1  ;;  %v1410_v14 = vadd.f32 %v1946_v5, %v2994_v7 }
 0x141   :  { %v1975_v35 = vpop.f32.mrb[47].mxu1 }
 0x142   :  { %v2985_v37 = vadd.f32 %v1975_v35, %v1974_v34 }
 0x146   :  { %v1977_v54 = vpop.f32.mrb[48].mxu1 }
 0x147   :  { %v1978_v56 = vpop.f32.mrb[49].mxu1 }
 0x148   :  { %v2987_v59 = vadd.f32 %v1978_v56, %v1977_v54  ;;  %v1980_v61 = vpop.f32.mrb[50].mxu1  ;;  %v1415_v54 = vadd.f32 %v1949_v11, %v2994_v7  ;;  %v215_v11 = vsub.s32 1, %v210_v38 }
 0x149   :  { %v1981_v0 = vpop.f32.mrb[51].mxu1 }
 0x14a   :  { %v2992_v3 = vadd.f32 %v1981_v0, %v1980_v61 }
 0x14e   :  { %v1999_v9 = vpop.f32.mrb[52].mxu1 }
 0x14f   :  { %v2000_v13 = vpop.f32.mrb[53].mxu1 }
 0x150   :  { %v2001_v19 = vadd.f32 %v2000_v13, %v1999_v9  ;;  %v2002_v20 = vpop.f32.mrb[54].mxu1 }
 0x151   :  { %v2003_v22 = vpop.f32.mrb[55].mxu1 }
 0x152   :  { %v2004_v25 = vadd.f32 %v2003_v22, %v2002_v20  ;;  %v2998_v26 = vadd.f32 %v2001_v19, %v1399_v15  ;;  %v211_v19 = vsub.s32 0, %v210_v38  ;;  %v1423_v20 = vadd.f32 %v2971_v21, %v2994_v7 }
 0x153   :  { %v1431_v38 = vadd.f32 %v2975_v27, %v2994_v7 }
 0x154   :  { %v3000_v29 = vadd.f32 %v2004_v25, %v1402_v23 }
 0x156   :  { %v2005_v30 = vpop.f32.mrb[56].mxu1 }
 0x157   :  { %v2006_v2 = vpop.f32.mrb[57].mxu1 }
 0x158   :  { %v2007_v6 = vadd.f32 %v2006_v2, %v2005_v30  ;;  %v2008_v8 = vpop.f32.mrb[58].mxu1  ;;  %v1426_v30 = vadd.f32 %v2973_v24, %v2994_v7 }
 0x159   :  { %v2009_v12 = vpop.f32.mrb[59].mxu1 }
 0x15a   :  { %v2010_v57 = vadd.f32 %v2009_v12, %v2008_v8  ;;  %v3004_v16 = vadd.f32 %v2007_v6, %v1407_v32  ;;  %v3021_v32 = vrot.slane %v207_v62, %v211_v19  ;;  %v3023_v6 = vrot.slane %v207_v62, %v215_v11 }
 0x15b   :  { %v1434_v62 = vadd.f32 %v2977_v31, %v2994_v7 }
 0x15c   :  { %v3006_v34 = vadd.f32 %v2010_v57, %v1410_v14 }
 0x15e   :  { %v2011_v60 = vpop.f32.mrb[60].mxu1 }
 0x15f   :  { %v2012_v35 = vpop.f32.mrb[61].mxu1 }
 0x160   :  { %v2013_v56 = vadd.f32 %v2012_v35, %v2011_v60  ;;  %v2014_v58 = vpop.f32.mrb[62].mxu1 }
 0x161   :  { %v2015_v61 = vpop.f32.mrb[63].mxu1 }
 0x162   :  { %v2016_v0 = vadd.f32 %v2015_v61, %v2014_v58  ;;  %v3011_v9 = vadd.f32 %v2013_v56, %v1415_v54 }
 0x164   :  { %v3013_v13 = vadd.f32 %v2016_v0, %v1418_v63 }
 0x166   :  { %v2017_v5 = vpop.f32.mrb[64].mxu1 }
 0x167   :  { %v2018_v15 = vpop.f32.mrb[65].mxu1 }
 0x168   :  { %v2019_v22 = vadd.f32 %v2018_v15, %v2017_v5  ;;  %v2020_v23 = vpop.f32.mrb[66].mxu1 }
 0x169   :  { %v2021_v25 = vpop.f32.mrb[67].mxu1 }
 0x16a   :  { %v2022_v2 = vadd.f32 %v2021_v25, %v2020_v23  ;;  %v3019_v17 = vadd.f32 %v2019_v22, %v1423_v20 }
 0x16c   :  { %v3025_v8 = vadd.f32 %v2022_v2, %v1426_v30 }
 0x16d   :  { %v1202_v12 = vpop.f32.mrb[12].mxu0 }
 0x16e   :  { %v2023_v14 = vpop.f32.mrb[68].mxu1  ;;  %v2103_v21 = vadd.f32 %v1202_v12, %v3021_v32  ;;  %v1204_v57 = vpop.f32.mrb[13].mxu0  ;;  %v1439_v12 = vadd.f32 %v2979_v4, %v2994_v7 }
 0x16f   :  { %v2024_v60 = vpop.f32.mrb[69].mxu1  ;;  %v2105_v24 = vadd.f32 %v1204_v57, %v3023_v6  ;;  %v1206_v54 = vpop.f32.mrb[14].mxu0 }
 0x170   :  { %v2025_v35 = vadd.f32 %v2024_v60, %v2023_v14  ;;  %v2026_v56 = vpop.f32.mrb[70].mxu1  ;;  %v2104_v58 = vadd.f32 %v2103_v21, %v2929_v18  ;;  %v2107_v61 = vadd.f32 %v1206_v54, %v3021_v32  ;;  %v1208_v63 = vpop.f32.mrb[15].mxu0 }
 0x171   :  { %v2027_v0 = vpop.f32.mrb[71].mxu1  ;;  %v2106_v5 = vadd.f32 %v2105_v24, %v2931_v39  ;;  %v2109_v15 = vadd.f32 %v1208_v63, %v3023_v6 }
 0x172   :  { %v2028_v19 = vadd.f32 %v2027_v0, %v2026_v56  ;;  %v3037_v27 = vadd.f32 %v2025_v35, %v1431_v38  ;;  %v1673_v20 = vmax.f32 %v2104_v58, 0.0  ;;  %v2108_v22 = vadd.f32 %v2107_v61, %v2933_v28 }
 0x173   :  { %v1674_v23 = vmax.f32 %v2106_v5, 0.0  ;;  %v2110_v11 = vadd.f32 %v2109_v15, %v2935_v40  ;;  %v1442_v38 = vadd.f32 %v2981_v10, %v2994_v7 }
 0x174   :  { %v3041_v31 = vadd.f32 %v2028_v19, %v1434_v62  ;;  %1721 = vst [vmem:[%s3274_s3 + $0x90] sm:$0xff] %v1673_v20  ;;  %v1676_v18 = vmax.f32 %v2108_v22, 0.0 }
 0x175   :  { %1722 = vst [vmem:[%s3274_s3 + $0x98] sm:$0xff] %v1674_v23  ;;  %v1677_v39 = vmax.f32 %v2110_v11, 0.0  ;;  %v1212_v25 = vpop.f32.mrb[16].mxu0  ;;  %v1447_v23 = vadd.f32 %v2983_v33, %v2994_v7 }
 0x176   :  { %v2029_v30 = vpop.f32.mrb[72].mxu1  ;;  %1724 = vst [vmem:[%s3274_s3 + $0xa8] sm:$0xff] %v1676_v18  ;;  %v2111_v28 = vadd.f32 %v1212_v25, %v3021_v32  ;;  %v1214_v40 = vpop.f32.mrb[17].mxu0 }
 0x177   :  { %v2030_v2 = vpop.f32.mrb[73].mxu1  ;;  %1725 = vst [vmem:[%s3274_s3 + $0xb0] sm:$0xff] %v1677_v39  ;;  %v2113_v14 = vadd.f32 %v1214_v40, %v3023_v6  ;;  %v1216_v57 = vpop.f32.mrb[18].mxu0 }
 0x178   :  { %v2031_v21 = vadd.f32 %v2030_v2, %v2029_v30  ;;  %v2032_v60 = vpop.f32.mrb[74].mxu1  ;;  %v2112_v24 = vadd.f32 %v2111_v28, %v2937_v41  ;;  %v2115_v35 = vadd.f32 %v1216_v57, %v3021_v32  ;;  %v1218_v54 = vpop.f32.mrb[19].mxu0  ;;  %v1450_v30 = vadd.f32 %v2985_v37, %v2994_v7 }
 0x179   :  { %v2033_v56 = vpop.f32.mrb[75].mxu1  ;;  %v2114_v4 = vadd.f32 %v2113_v14, %v2939_v36  ;;  %v2117_v62 = vadd.f32 %v1218_v54, %v3023_v6 }
 0x17a   :  { %v2034_v58 = vadd.f32 %v2033_v56, %v2032_v60  ;;  %v3065_v61 = vadd.f32 %v2031_v21, %v1439_v12  ;;  %v1679_v63 = vmax.f32 %v2112_v24, 0.0  ;;  %v2116_v0 = vadd.f32 %v2115_v35, %v2941_v1 }
 0x17b   :  { %v1680_v5 = vmax.f32 %v2114_v4, 0.0  ;;  %v2118_v15 = vadd.f32 %v2117_v62, %v2943_v46  ;;  %v1455_v62 = vadd.f32 %v2987_v59, %v2994_v7 }
 0x17c   :  { %v3069_v10 = vadd.f32 %v2034_v58, %v1442_v38  ;;  %1727 = vst [vmem:[%s3274_s3 + $0xc0] sm:$0xff] %v1679_v63  ;;  %v1682_v41 = vmax.f32 %v2116_v0, 0.0 }
 0x17d   :  { %1728 = vst [vmem:[%s3274_s3 + $0xc8] sm:$0xff] %v1680_v5  ;;  %v1683_v36 = vmax.f32 %v2118_v15, 0.0  ;;  %v1222_v19 = vpop.f32.mrb[20].mxu0  ;;  %v1458_v15 = vadd.f32 %v2992_v3, %v2994_v7 }
 0x17e   :  { %v2035_v20 = vpop.f32.mrb[76].mxu1  ;;  %1730 = vst [vmem:[%s3274_s3 + $0xd8] sm:$0xff] %v1682_v41  ;;  %v2119_v1 = vadd.f32 %v1222_v19, %v3021_v32  ;;  %v1224_v46 = vpop.f32.mrb[21].mxu0 }
 0x17f   :  { %v2036_v22 = vpop.f32.mrb[77].mxu1  ;;  %1731 = vst [vmem:[%s3274_s3 + $0xe0] sm:$0xff] %v1683_v36  ;;  %v2121_v11 = vadd.f32 %v1224_v46, %v3023_v6  ;;  %v1226_v39 = vpop.f32.mrb[22].mxu0 }
 0x180   :  { %v2037_v18 = vadd.f32 %v2036_v22, %v2035_v20  ;;  %v2038_v25 = vpop.f32.mrb[78].mxu1  ;;  %v2120_v28 = vadd.f32 %v2119_v1, %v2945_v42  ;;  %v2123_v40 = vadd.f32 %v1226_v39, %v3021_v32  ;;  %v1228_v2 = vpop.f32.mrb[23].mxu0 }
 0x181   :  { %v2039_v12 = vpop.f32.mrb[79].mxu1  ;;  %v2122_v33 = vadd.f32 %v2121_v11, %v2947_v43  ;;  %v2125_v14 = vadd.f32 %v1228_v2, %v3023_v6 }
 0x182   :  { %v2040_v21 = vadd.f32 %v2039_v12, %v2038_v25  ;;  %v3093_v57 = vadd.f32 %v2037_v18, %v1447_v23  ;;  %v1685_v60 = vmax.f32 %v2120_v28, 0.0  ;;  %v2124_v38 = vadd.f32 %v2123_v40, %v2949_v55 }
 0x183   :  { %v1686_v24 = vmax.f32 %v2122_v33, 0.0  ;;  %v2126_v35 = vadd.f32 %v2125_v14, %v2951_v44 }
 0x184   :  { %v3097_v37 = vadd.f32 %v2040_v21, %v1450_v30  ;;  %1733 = vst [vmem:[%s3274_s3 + $0xf0] sm:$0xff] %v1685_v60  ;;  %v1688_v42 = vmax.f32 %v2124_v38, 0.0 }
 0x185   :  { %1734 = vst [vmem:[%s3274_s3 + $0xf8] sm:$0xff] %v1686_v24  ;;  %v1689_v43 = vmax.f32 %v2126_v35, 0.0  ;;  %v1232_v54 = vpop.f32.mrb[24].mxu0 }
 0x186   :  { %v2041_v56 = vpop.f32.mrb[80].mxu1  ;;  %1736 = vst [vmem:[%s3274_s3 + $0x108] sm:$0xff] %v1688_v42  ;;  %v2127_v55 = vadd.f32 %v1232_v54, %v3021_v32  ;;  %v1234_v44 = vpop.f32.mrb[25].mxu0 }
 0x187   :  { %v2042_v4 = vpop.f32.mrb[81].mxu1  ;;  %1737 = vst [vmem:[%s3274_s3 + $0x110] sm:$0xff] %v1689_v43  ;;  %v2129_v58 = vadd.f32 %v1234_v44, %v3023_v6  ;;  %v1236_v0 = vpop.f32.mrb[26].mxu0 }
 0x188   :  { %v2043_v63 = vadd.f32 %v2042_v4, %v2041_v56  ;;  %v2044_v5 = vpop.f32.mrb[82].mxu1  ;;  %v2128_v41 = vadd.f32 %v2127_v55, %v2953_v45  ;;  %v2131_v36 = vadd.f32 %v1236_v0, %v3021_v32  ;;  %v1238_v19 = vpop.f32.mrb[27].mxu0 }
 0x189   :  { %v2045_v20 = vpop.f32.mrb[83].mxu1  ;;  %v2130_v59 = vadd.f32 %v2129_v58, %v2955_v47  ;;  %v2133_v1 = vadd.f32 %v1238_v19, %v3023_v6 }
 0x18a   :  { %v2046_v46 = vadd.f32 %v2045_v20, %v2044_v5  ;;  %v3121_v22 = vadd.f32 %v2043_v63, %v1455_v62  ;;  %v1691_v23 = vmax.f32 %v2128_v41, 0.0  ;;  %v2132_v11 = vadd.f32 %v2131_v36, %v2957_v48 }
 0x18b   :  { %v1692_v18 = vmax.f32 %v2130_v59, 0.0  ;;  %v2134_v39 = vadd.f32 %v2133_v1, %v2959_v49 }
 0x18c   :  { %v3125_v3 = vadd.f32 %v2046_v46, %v1458_v15  ;;  %1739 = vst [vmem:[%s3274_s3 + $0x120] sm:$0xff] %v1691_v23  ;;  %v1694_v45 = vmax.f32 %v2132_v11, 0.0 }
 0x18d   :  { %1740 = vst [vmem:[%s3274_s3 + $0x128] sm:$0xff] %v1692_v18  ;;  %v1695_v47 = vmax.f32 %v2134_v39, 0.0  ;;  %v1242_v7 = vpop.f32.mrb[28].mxu0 }
 0x18e   :  { %v2069_v25 = vpop.f32.mrb[84].mxu1  ;;  %1742 = vst [vmem:[%s3274_s3 + $0x138] sm:$0xff] %v1694_v45  ;;  %v2135_v48 = vadd.f32 %v1242_v7, %v3021_v32  ;;  %v1244_v30 = vpop.f32.mrb[29].mxu0 }
 0x18f   :  { %v1601_v49 = vadd.f32 %v2069_v25, %v3004_v16  ;;  %v1592_v28 = vpop.f32.mrb[85].mxu1  ;;  %1743 = vst [vmem:[%s3274_s3 + $0x140] sm:$0xff] %v1695_v47  ;;  %v2137_v40 = vadd.f32 %v1244_v30, %v3023_v6  ;;  %v1246_v12 = vpop.f32.mrb[30].mxu0 }
 0x190   :  { %v1593_v2 = vadd.f32 %v1592_v28, %v2998_v26  ;;  %v2070_v33 = vpop.f32.mrb[86].mxu1  ;;  %v2136_v14 = vadd.f32 %v2135_v48, %v2961_v50  ;;  %v2139_v60 = vadd.f32 %v1246_v12, %v3021_v32  ;;  %v1248_v16 = vpop.f32.mrb[31].mxu0 }
 0x191   :  { %v1663_v21 = vmax.f32 %v1601_v49, 0.0  ;;  %v1604_v38 = vadd.f32 %v2070_v33, %v3006_v34  ;;  %v1595_v24 = vpop.f32.mrb[87].mxu1  ;;  %v2138_v35 = vadd.f32 %v2137_v40, %v2963_v51  ;;  %v2141_v43 = vadd.f32 %v1248_v16, %v3023_v6 }
 0x192   :  { %v1657_v42 = vmax.f32 %v1593_v2, 0.0  ;;  %v1596_v54 = vadd.f32 %v1595_v24, %v3000_v29  ;;  %v1697_v56 = vmax.f32 %v2136_v14, 0.0  ;;  %v2140_v50 = vadd.f32 %v2139_v60, %v2965_v52 }
 0x193   :  { %1711 = vst [vmem:[%s3274_s3 + $0x40] sm:$0xff] %v1663_v21  ;;  %v1666_v26 = vmax.f32 %v1604_v38, 0.0  ;;  %v1698_v55 = vmax.f32 %v2138_v35, 0.0  ;;  %v2142_v51 = vadd.f32 %v2141_v43, %v2967_v53 }
 0x194   :  { %1705 = vst [vmem:[%s3274_s3 + $0x10] sm:$0xff] %v1657_v42  ;;  %v1660_v34 = vmax.f32 %v1596_v54, 0.0  ;;  %1745 = vst [vmem:[%s3274_s3 + $0x150] sm:$0xff] %v1697_v56  ;;  %v1700_v29 = vmax.f32 %v2140_v50, 0.0 }
 0x195   :  { %1714 = vst [vmem:[%s3274_s3 + $0x58] sm:$0xff] %v1666_v26  ;;  %1746 = vst [vmem:[%s3274_s3 + $0x158] sm:$0xff] %v1698_v55  ;;  %v1701_v52 = vmax.f32 %v2142_v51, 0.0  ;;  %v1285_v53 = vpop.f32.mrb[0].mxu0 }
 0x196   :  { %1708 = vst [vmem:[%s3274_s3 + $0x28] sm:$0xff] %v1660_v34  ;;  %v2073_v44 = vpop.f32.mrb[88].mxu1  ;;  %1748 = vst [vmem:[%s3274_s3 + $0x168] sm:$0xff] %v1700_v29  ;;  %v2091_v4 = vadd.f32 %v1285_v53, %v3021_v32  ;;  %v1287_v58 = vpop.f32.mrb[1].mxu0 }
 0x197   :  { %v1617_v62 = vadd.f32 %v2073_v44, %v3019_v17  ;;  %v1608_v63 = vpop.f32.mrb[89].mxu1  ;;  %1749 = vst [vmem:[%s3274_s3 + $0x170] sm:$0xff] %v1701_v52  ;;  %v2092_v0 = vadd.f32 %v1287_v58, %v3023_v6  ;;  %v1289_v15 = vpop.f32.mrb[2].mxu0 }
 0x198   :  { %v1609_v5 = vadd.f32 %v1608_v63, %v3011_v9  ;;  %v2074_v41 = vpop.f32.mrb[90].mxu1  ;;  %v1655_v36 = vmax.f32 %v2091_v4, 0.0  ;;  %v2093_v20 = vadd.f32 %v1289_v15, %v3021_v32  ;;  %v1291_v1 = vpop.f32.mrb[3].mxu0 }
 0x199   :  { %v1675_v19 = vmax.f32 %v1617_v62, 0.0  ;;  %v1620_v59 = vadd.f32 %v2074_v41, %v3025_v8  ;;  %v1611_v17 = vpop.f32.mrb[91].mxu1  ;;  %v1656_v46 = vmax.f32 %v2092_v0, 0.0  ;;  %v2094_v11 = vadd.f32 %v1291_v1, %v3023_v6 }
 0x19a   :  { %v1669_v23 = vmax.f32 %v1609_v5, 0.0  ;;  %v1612_v18 = vadd.f32 %v1611_v17, %v3013_v13  ;;  %1703 = vst [vmem:[%s3274_s3] sm:$0xff] %v1655_v36  ;;  %v1658_v9 = vmax.f32 %v2093_v20, 0.0 }
 0x19b   :  { %1723 = vst [vmem:[%s3274_s3 + $0xa0] sm:$0xff] %v1675_v19  ;;  %v1678_v39 = vmax.f32 %v1620_v59, 0.0  ;;  %1704 = vst [vmem:[%s3274_s3 + $0x8] sm:$0xff] %v1656_v46  ;;  %v1659_v8 = vmax.f32 %v2094_v11, 0.0 }
 0x19c   :  { %1717 = vst [vmem:[%s3274_s3 + $0x70] sm:$0xff] %v1669_v23  ;;  %v1672_v13 = vmax.f32 %v1612_v18, 0.0  ;;  %1706 = vst [vmem:[%s3274_s3 + $0x18] sm:$0xff] %v1658_v9 }
 0x19d   :  { %1726 = vst [vmem:[%s3274_s3 + $0xb8] sm:$0xff] %v1678_v39  ;;  %1707 = vst [vmem:[%s3274_s3 + $0x20] sm:$0xff] %v1659_v8  ;;  %v1295_v45 = vpop.f32.mrb[4].mxu0 }
 0x19e   :  { %1720 = vst [vmem:[%s3274_s3 + $0x88] sm:$0xff] %v1672_v13  ;;  %v2077_v47 = vpop.f32.mrb[92].mxu1  ;;  %v2095_v7 = vadd.f32 %v1295_v45, %v3021_v32  ;;  %v1297_v48 = vpop.f32.mrb[5].mxu0 }
 0x19f   :  { %v1633_v25 = vadd.f32 %v2077_v47, %v3065_v61  ;;  %v1624_v49 = vpop.f32.mrb[93].mxu1  ;;  %v2096_v30 = vadd.f32 %v1297_v48, %v3023_v6  ;;  %v1299_v40 = vpop.f32.mrb[6].mxu0 }
 0x1a0   :  { %v1625_v28 = vadd.f32 %v1624_v49, %v3037_v27  ;;  %v2078_v2 = vpop.f32.mrb[94].mxu1  ;;  %v1661_v12 = vmax.f32 %v2095_v7, 0.0  ;;  %v2097_v14 = vadd.f32 %v1299_v40, %v3021_v32  ;;  %v1301_v60 = vpop.f32.mrb[7].mxu0 }
 0x1a1   :  { %v1687_v33 = vmax.f32 %v1633_v25, 0.0  ;;  %v1636_v21 = vadd.f32 %v2078_v2, %v3069_v10  ;;  %v1627_v38 = vpop.f32.mrb[95].mxu1  ;;  %v1662_v16 = vmax.f32 %v2096_v30, 0.0  ;;  %v2098_v61 = vadd.f32 %v1301_v60, %v3023_v6 }
 0x1a2   :  { %v1681_v24 = vmax.f32 %v1625_v28, 0.0  ;;  %v1628_v35 = vadd.f32 %v1627_v38, %v3041_v31  ;;  %1709 = vst [vmem:[%s3274_s3 + $0x30] sm:$0xff] %v1661_v12  ;;  %v1664_v27 = vmax.f32 %v2097_v14, 0.0 }
 0x1a3   :  { %1735 = vst [vmem:[%s3274_s3 + $0x100] sm:$0xff] %v1687_v33  ;;  %v1690_v42 = vmax.f32 %v1636_v21, 0.0  ;;  %1710 = vst [vmem:[%s3274_s3 + $0x38] sm:$0xff] %v1662_v16  ;;  %v1665_v10 = vmax.f32 %v2098_v61, 0.0 }
 0x1a4   :  { %1729 = vst [vmem:[%s3274_s3 + $0xd0] sm:$0xff] %v1681_v24  ;;  %v1684_v31 = vmax.f32 %v1628_v35, 0.0  ;;  %1712 = vst [vmem:[%s3274_s3 + $0x48] sm:$0xff] %v1664_v27 }
 0x1a5   :  { %1738 = vst [vmem:[%s3274_s3 + $0x118] sm:$0xff] %v1690_v42  ;;  %1713 = vst [vmem:[%s3274_s3 + $0x50] sm:$0xff] %v1665_v10  ;;  %v1305_v43 = vpop.f32.mrb[8].mxu0 }
 0x1a6   :  { %1732 = vst [vmem:[%s3274_s3 + $0xe8] sm:$0xff] %v1684_v31  ;;  %v2081_v54 = vpop.f32.mrb[96].mxu1  ;;  %v2099_v56 = vadd.f32 %v1305_v43, %v3021_v32  ;;  %v1307_v26 = vpop.f32.mrb[9].mxu0 }
 0x1a7   :  { %v1649_v50 = vadd.f32 %v2081_v54, %v3121_v22  ;;  %v1640_v55 = vpop.f32.mrb[97].mxu1  ;;  %v2100_v51 = vadd.f32 %v1307_v26, %v3023_v6  ;;  %v1309_v29 = vpop.f32.mrb[10].mxu0 }
 0x1a8   :  { %v1641_v34 = vadd.f32 %v1640_v55, %v3093_v57  ;;  %v2082_v52 = vpop.f32.mrb[98].mxu1  ;;  %v1667_v53 = vmax.f32 %v2099_v56, 0.0  ;;  %v2101_v4 = vadd.f32 %v1309_v29, %v3021_v32  ;;  %v1311_v58 = vpop.f32.mrb[11].mxu0 }
 0x1a9   :  { %v1699_v44 = vmax.f32 %v1649_v50, 0.0  ;;  %v1652_v62 = vadd.f32 %v2082_v52, %v3125_v3  ;;  %v1643_v63 = vpop.f32.mrb[99].mxu1  ;;  %v1668_v0 = vmax.f32 %v2100_v51, 0.0  ;;  %v2102_v22 = vadd.f32 %v1311_v58, %v3023_v6 }
 0x1aa   :  { %v1693_v5 = vmax.f32 %v1641_v34, 0.0  ;;  %v1644_v15 = vadd.f32 %v1643_v63, %v3097_v37  ;;  %1715 = vst [vmem:[%s3274_s3 + $0x60] sm:$0xff] %v1667_v53  ;;  %v1670_v57 = vmax.f32 %v2101_v4, 0.0 }
 0x1ab   :  { %1747 = vst [vmem:[%s3274_s3 + $0x160] sm:$0xff] %v1699_v44  ;;  %v1702_v32 = vmax.f32 %v1652_v62, 0.0  ;;  %1716 = vst [vmem:[%s3274_s3 + $0x68] sm:$0xff] %v1668_v0  ;;  %v1671_v6 = vmax.f32 %v2102_v22, 0.0 }
 0x1ac   :  { %1741 = vst [vmem:[%s3274_s3 + $0x130] sm:$0xff] %v1693_v5  ;;  %v1696_v37 = vmax.f32 %v1644_v15, 0.0  ;;  %1718 = vst [vmem:[%s3274_s3 + $0x78] sm:$0xff] %v1670_v57 }
 0x1ad   :  { %1750 = vst [vmem:[%s3274_s3 + $0x178] sm:$0xff] %v1702_v32  ;;  %1719 = vst [vmem:[%s3274_s3 + $0x80] sm:$0xff] %v1671_v6 }
 0x1ae   :  { %1744 = vst [vmem:[%s3274_s3 + $0x148] sm:$0xff] %v1696_v37 }

</bundles_post_ra>
